<compile_context>
chip_gen: v7x
topology: tpu7x:2x2x1
jax: 0.10.0
libtpu: 0.0.40
codegen_flags: <defaults>
</compile_context>

<pallas_src>
import functools

import jax
import jax.numpy as jnp
from jax.experimental import pallas as pl
from jax.experimental.pallas import tpu as pltpu


def _round_up(x, m):
    return ((x + m - 1) // m) * m


def _largest_divisor_tile(dim, candidates):
    for c in candidates:
        if c <= dim and dim % c == 0:
            return c
    return dim


# ----------------------------------------------------------------------------
# Classifier matmul kernel
# ----------------------------------------------------------------------------
def _matmul_bias_kernel(a_ref, b_ref, bias_ref, o_ref, *, relu):
    """(tm, tk) @ (tk, tn) K-step; o_ref (f32) is the resident accumulator."""
    k = pl.program_id(2)

    @pl.when(k == 0)
    def _():
        o_ref[...] = jnp.zeros_like(o_ref)

    o_ref[...] += jnp.dot(a_ref[...], b_ref[...],
                          preferred_element_type=jnp.float32)

    @pl.when(k == pl.num_programs(2) - 1)
    def _():
        r = o_ref[...] + bias_ref[...]
        if relu:
            r = jnp.maximum(r, 0.0)
        o_ref[...] = r


def matmul_bias_act(a, b, bias, *, relu):
    """y = act(a @ b + bias); bf16 operands, f32 accumulation/epilogue."""
    M, K = a.shape
    K2, N = b.shape
    assert K == K2
    a = a.astype(jnp.bfloat16)
    b = b.astype(jnp.bfloat16)
    bias = bias.astype(jnp.float32)

    Kp = _round_up(K, 128)
    Np = _round_up(N, 128)
    if M >= 256:
        tm = 256
        Mp = _round_up(M, tm)
    else:
        Mp = _round_up(max(M, 16), 16)   # >= 16 rows (bf16 sublane packing)
        tm = Mp
    # Big weight tiles: few grid steps, ~8-15 MiB per tile, double-buffered.
    tk = _largest_divisor_tile(Kp, (4096, 3584, 2048, 1792, 1536, 1024, 512, 256, 128))
    tn = _largest_divisor_tile(Np, (1024, 512, 256, 128))

    if Mp > M or Kp > K:
        a = jnp.pad(a, ((0, Mp - M), (0, Kp - K)))
    if Kp > K or Np > N:
        b = jnp.pad(b, ((0, Kp - K), (0, Np - N)))
    if Np > N:
        bias = jnp.pad(bias, (0, Np - N))
    bias2d = bias.reshape(1, Np)

    grid = (Mp // tm, Np // tn, Kp // tk)
    out = pl.pallas_call(
        functools.partial(_matmul_bias_kernel, relu=relu),
        out_shape=jax.ShapeDtypeStruct((Mp, Np), jnp.float32),
        grid_spec=pltpu.PrefetchScalarGridSpec(
            num_scalar_prefetch=0,
            grid=grid,
            in_specs=[
                pl.BlockSpec((tm, tk), lambda i, j, k: (i, k)),
                pl.BlockSpec((tk, tn), lambda i, j, k: (k, j)),
                pl.BlockSpec((1, tn), lambda i, j, k: (0, j)),
            ],
            out_specs=pl.BlockSpec((tm, tn), lambda i, j, k: (i, j)),
        ),
        compiler_params=pltpu.CompilerParams(
            dimension_semantics=("parallel", "parallel", "arbitrary"),
            vmem_limit_bytes=48 * 1024 * 1024),
    )(a, b, bias2d)
    if Mp > M or Np > N:
        out = out[:M, :N]
    return out


# ----------------------------------------------------------------------------
# 3x3 conv (+ bias + ReLU) kernel: one image x one Cout tile per grid step
# ----------------------------------------------------------------------------
def _conv3x3_kernel(x_ref, w_ref, b_ref, o_ref, shift_ref):
    """x_ref  : (1, H+2, W+2, Cin) bf16  zero-padded input image
    w_ref     : (3, 3, Cin, tnc)   bf16
    b_ref     : (1, tnc)           f32
    o_ref     : (1, H, W, tnc)     bf16
    shift_ref : (3, H+2, W, Cin)   bf16  dx-pre-shifted copies of the image
    """
    H = o_ref.shape[1]
    W = o_ref.shape[2]
    tnc = o_ref.shape[3]

    # Pre-shift the three horizontal taps once per image instead of doing a
    # sublane-unaligned slice per tap per row inside the loop.
    for dx in range(3):
        shift_ref[dx] = x_ref[0, :, dx:dx + W, :]

    bias = b_ref[...]                                   # (1, tnc) f32

    def row_body(h, carry):
        acc = jnp.zeros((W, tnc), jnp.float32)
        for dy in range(3):
            for dx in range(3):
                acc += jnp.dot(shift_ref[dx, h + dy], w_ref[dy, dx],
                               preferred_element_type=jnp.float32)
        acc = jnp.maximum(acc + bias, 0.0)
        o_ref[0, h] = acc.astype(o_ref.dtype)
        return carry

    jax.lax.fori_loop(0, H, row_body, 0)


def conv3x3_relu(x, w, b):
    """3x3 'same' conv + ReLU with lane-dense (128-padded) output channels.

    x : (N, H, W, Cin_act) bf16 (Cin_act may already carry zero padding)
    w : (3, 3, Cin_true, Cout), b : (Cout,)
    Returns (y, Cout) where y is (N, H, W, Cout_padded) bf16.
    """
    N, H, W, Cin_x = x.shape
    _, _, Cin_w, Cout = w.shape

    # Match weight input channels to the (possibly zero-padded) activation.
    if Cin_x > Cin_w:
        w = jnp.pad(w, ((0, 0), (0, 0), (0, Cin_x - Cin_w), (0, 0)))
    # Pad output channels to a lane-dense multiple of 128.
    Cout_p = _round_up(Cout, 128)
    if Cout_p > Cout:
        w = jnp.pad(w, ((0, 0), (0, 0), (0, 0), (0, Cout_p - Cout)))
        b = jnp.pad(b, (0, Cout_p - Cout))

    if Cout_p <= 512:
        tnc = Cout_p
    elif Cout_p % 512 == 0:
        tnc = 512
    elif Cout_p % 256 == 0:
        tnc = 256
    else:
        tnc = 128
    n_c = Cout_p // tnc

    # TODO(synk): at real VGG sizes fuse the 1-pixel halo pad into the kernel
    # instead of a per-layer jnp.pad (negligible at 28x28).
    xp = jnp.pad(x.astype(jnp.bfloat16), ((0, 0), (1, 1), (1, 1), (0, 0)))
    w = w.astype(jnp.bfloat16)
    b2d = b.astype(jnp.float32).reshape(1, Cout_p)

    # Cout-tile axis outermost so each weight tile is DMA'd once for all images.
    grid = (n_c, N)
    out = pl.pallas_call(
        _conv3x3_kernel,
        out_shape=jax.ShapeDtypeStruct((N, H, W, Cout_p), jnp.bfloat16),
        grid_spec=pltpu.PrefetchScalarGridSpec(
            num_scalar_prefetch=0,
            grid=grid,
            in_specs=[
                pl.BlockSpec((1, H + 2, W + 2, Cin_x), lambda c, n: (n, 0, 0, 0)),
                pl.BlockSpec((3, 3, Cin_x, tnc), lambda c, n: (0, 0, 0, c)),
                pl.BlockSpec((1, tnc), lambda c, n: (0, c)),
            ],
            out_specs=pl.BlockSpec((1, H, W, tnc), lambda c, n: (n, 0, 0, c)),
            scratch_shapes=[pltpu.VMEM((3, H + 2, W, Cin_x), jnp.bfloat16)],
        ),
        compiler_params=pltpu.CompilerParams(
            dimension_semantics=("parallel", "parallel")),
    )(xp, w, b2d)
    return out, Cout


# ----------------------------------------------------------------------------
# 2x2 max pool kernel (lane-dense, channels already padded to 128)
# ----------------------------------------------------------------------------
def _maxpool_kernel(x_ref, o_ref):
    x = x_ref[...]                   # (tr, 2, Wo, 2, C)
    v = jnp.max(x, axis=3)           # reduce the W-pair dim
    o_ref[...] = jnp.max(v, axis=1)  # reduce the H-pair dim -> (tr, Wo, C)


def maxpool2x2(x):
    """2x2 stride-2 max pool on NHWC (H, W even), read-once/write-once."""
    N, H, W, C = x.shape
    assert H % 2 == 0 and W % 2 == 0, "maxpool2x2 requires even H and W"
    Ho, Wo = H // 2, W // 2
    rows = N * Ho
    x5 = x.reshape(rows, 2, Wo, 2, C)     # free reshape (no data movement)
    tr = rows if rows <= 512 else 256
    grid = (pl.cdiv(rows, tr),)
    out = pl.pallas_call(
        _maxpool_kernel,
        out_shape=jax.ShapeDtypeStruct((rows, Wo, C), x.dtype),
        grid_spec=pltpu.PrefetchScalarGridSpec(
            num_scalar_prefetch=0,
            grid=grid,
            in_specs=[pl.BlockSpec((tr, 2, Wo, 2, C),
                                   lambda i: (i, 0, 0, 0, 0))],
            out_specs=pl.BlockSpec((tr, Wo, C), lambda i: (i, 0, 0)),
        ),
        compiler_params=pltpu.CompilerParams(
            dimension_semantics=("parallel",)),
    )(x5)
    return out.reshape(N, Ho, Wo, C)


# ----------------------------------------------------------------------------
# Plain-JAX glue
# ----------------------------------------------------------------------------
def adaptive_avg_pool(x, out_hw):
    """nn.AdaptiveAvgPool2d on NHWC; identity fast path (always hit here)."""
    N, H, W, C = x.shape
    oh, ow = out_hw
    if (H, W) == (oh, ow):
        return x
    # Generic fallback (plain JAX); not exercised in this model.
    rows = []
    for i in range(oh):
        h0, h1 = (i * H) // oh, -(-((i + 1) * H) // oh)
        cols = []
        for j in range(ow):
            w0, w1 = (j * W) // ow, -(-((j + 1) * W) // ow)
            cols.append(jnp.mean(x[:, h0:h1, w0:w1, :], axis=(1, 2)))
        rows.append(jnp.stack(cols, axis=1))
    return jnp.stack(rows, axis=1)


# ----------------------------------------------------------------------------
# Parameter init (mirrors VGG._initialize_weights); weights stored in bf16
# ----------------------------------------------------------------------------
def init_params(key, vgg_cfg, num_classes=100):
    params = {"features": [], "classifier": []}
    in_c = 3
    for v in vgg_cfg:
        if v == 'M':
            params["features"].append(('M', None))
        else:
            key, sub = jax.random.split(key)
            fan_out = v * 3 * 3  # kaiming_normal_, mode='fan_out', relu
            w = (jax.random.normal(sub, (3, 3, in_c, v), jnp.float32)
                 * jnp.sqrt(2.0 / fan_out)).astype(jnp.bfloat16)
            b = jnp.zeros((v,), jnp.float32)
            params["features"].append(('C', (w, b)))
            in_c = v
    dims = [512 * 7 * 7, 4096, 4096, num_classes]
    for i in range(3):
        key, sub = jax.random.split(key)
        w = (jax.random.normal(sub, (dims[i], dims[i + 1]), jnp.float32)
             * 0.01).astype(jnp.bfloat16)
        b = jnp.zeros((dims[i + 1],), jnp.float32)
        params["classifier"].append((w, b))
    return params


# ----------------------------------------------------------------------------
# Forward pass (VGG.forward)
# ----------------------------------------------------------------------------
def vgg_forward(params, x_nchw):
    x = jnp.transpose(x_nchw, (0, 2, 3, 1)).astype(jnp.bfloat16)  # NCHW->NHWC
    true_c = x.shape[-1]
    for kind, p in params["features"]:
        if kind == 'M':
            x = maxpool2x2(x)
        else:
            w, b = p
            x, true_c = conv3x3_relu(x, w, b)
    x = adaptive_avg_pool(x, (7, 7))
    if x.shape[-1] != true_c:            # drop zero-padded channels
        x = x[..., :true_c]
    # torch.flatten(x, 1) on NCHW => flatten in (C, H, W) order
    x = jnp.transpose(x, (0, 3, 1, 2)).reshape(x.shape[0], -1)
    assert x.shape[1] == 512 * 7 * 7, x.shape

    (w1, b1), (w2, b2), (w3, b3) = params["classifier"]
    x = matmul_bias_act(x, w1, b1, relu=True)
    # TODO(synk): Dropout(0.5) is stochastic in training mode; implemented as
    # inference-mode identity here.
    x = matmul_bias_act(x, w2, b2, relu=True)
    x = matmul_bias_act(x, w3, b3, relu=False)
    return x


if __name__ == "__main__":
    key = jax.random.PRNGKey(0)
    key_params, key_x = jax.random.split(key)

    # Small VGG-style config (must end in 512 channels: classifier expects
    # 512*7*7 features).  Input 28x28 -> two max-pools -> 7x7 feature map.
    vgg_cfg = [16, 'M', 32, 'M', 512]
    params = init_params(key_params, vgg_cfg, num_classes=100)

    x = jax.random.normal(key_x, (2, 3, 28, 28), jnp.float32)

    out = vgg_forward(params, x)
    out = jax.block_until_ready(out)

    assert out.shape == (2, 100), out.shape
    assert bool(jnp.all(jnp.isfinite(out)))
    print("KERNEL_OK")
</pallas_src>

<mosaic_0001>
module attributes {stable_mosaic.version = 11 : i64} {
  func.func @_conv3x3_kernel(%arg0: i32, %arg1: i32, %arg2: memref<1x30x30x3xbf16, #tpu.memory_space<vmem>>, %arg3: memref<3x3x3x128xbf16, #tpu.memory_space<vmem>>, %arg4: memref<1x128xf32, #tpu.memory_space<vmem>>, %arg5: memref<1x28x28x128xbf16, #tpu.memory_space<vmem>>, %arg6: memref<3x30x28x3xbf16, #tpu.memory_space<vmem>>) attributes {dimension_semantics = [#tpu.dimension_semantics<parallel>, #tpu.dimension_semantics<parallel>], iteration_bounds = array<i64: 1, 2>, scalar_prefetch = 0 : i64, scratch_operands = 1 : i64, tpu.core_type = #tpu.core_type<tc>, window_params = [{transform_indices = @transform_0, window_bounds = array<i64: 1, 30, 30, 3>}, {transform_indices = @transform_1, window_bounds = array<i64: 3, 3, 3, 128>}, {transform_indices = @transform_2, window_bounds = array<i64: 1, 128>}, {transform_indices = @transform_3, window_bounds = array<i64: 1, 28, 28, 128>}]} {
    %c0 = arith.constant 0 : index
    %c0_0 = arith.constant 0 : index
    %c0_1 = arith.constant 0 : index
    %c0_2 = arith.constant 0 : index
    %0 = vector.load %arg2[%c0, %c0_0, %c0_1, %c0_2] : memref<1x30x30x3xbf16, #tpu.memory_space<vmem>>, vector<1x30x28x3xbf16>
    %1 = vector.shape_cast %0 : vector<1x30x28x3xbf16> to vector<30x28x3xbf16>
    %c0_3 = arith.constant 0 : index
    %c0_4 = arith.constant 0 : index
    %c0_5 = arith.constant 0 : index
    %c0_6 = arith.constant 0 : index
    %2 = vector.load %arg6[%c0_3, %c0_4, %c0_5, %c0_6] : memref<3x30x28x3xbf16, #tpu.memory_space<vmem>>, vector<1x30x28x3xbf16>
    %3 = vector.shape_cast %2 : vector<1x30x28x3xbf16> to vector<30x28x3xbf16>
    %4 = vector.shape_cast %1 : vector<30x28x3xbf16> to vector<1x30x28x3xbf16>
    tpu.vector_store %arg6[%c0_3, %c0_4, %c0_5, %c0_6], %4 {strides = array<i32>} : memref<3x30x28x3xbf16, #tpu.memory_space<vmem>>, vector<1x30x28x3xbf16>,
    %c0_7 = arith.constant 0 : index
    %c0_8 = arith.constant 0 : index
    %c1 = arith.constant 1 : index
    %c0_9 = arith.constant 0 : index
    %5 = vector.load %arg2[%c0_7, %c0_8, %c1, %c0_9] : memref<1x30x30x3xbf16, #tpu.memory_space<vmem>>, vector<1x30x28x3xbf16>
    %6 = vector.shape_cast %5 : vector<1x30x28x3xbf16> to vector<30x28x3xbf16>
    %c1_10 = arith.constant 1 : index
    %c0_11 = arith.constant 0 : index
    %c0_12 = arith.constant 0 : index
    %c0_13 = arith.constant 0 : index
    %7 = vector.load %arg6[%c1_10, %c0_11, %c0_12, %c0_13] : memref<3x30x28x3xbf16, #tpu.memory_space<vmem>>, vector<1x30x28x3xbf16>
    %8 = vector.shape_cast %7 : vector<1x30x28x3xbf16> to vector<30x28x3xbf16>
    %9 = vector.shape_cast %6 : vector<30x28x3xbf16> to vector<1x30x28x3xbf16>
    tpu.vector_store %arg6[%c1_10, %c0_11, %c0_12, %c0_13], %9 {strides = array<i32>} : memref<3x30x28x3xbf16, #tpu.memory_space<vmem>>, vector<1x30x28x3xbf16>,
    %c0_14 = arith.constant 0 : index
    %c0_15 = arith.constant 0 : index
    %c2 = arith.constant 2 : index
    %c0_16 = arith.constant 0 : index
    %10 = vector.load %arg2[%c0_14, %c0_15, %c2, %c0_16] : memref<1x30x30x3xbf16, #tpu.memory_space<vmem>>, vector<1x30x28x3xbf16>
    %11 = vector.shape_cast %10 : vector<1x30x28x3xbf16> to vector<30x28x3xbf16>
    %c2_17 = arith.constant 2 : index
    %c0_18 = arith.constant 0 : index
    %c0_19 = arith.constant 0 : index
    %c0_20 = arith.constant 0 : index
    %12 = vector.load %arg6[%c2_17, %c0_18, %c0_19, %c0_20] : memref<3x30x28x3xbf16, #tpu.memory_space<vmem>>, vector<1x30x28x3xbf16>
    %13 = vector.shape_cast %12 : vector<1x30x28x3xbf16> to vector<30x28x3xbf16>
    %14 = vector.shape_cast %11 : vector<30x28x3xbf16> to vector<1x30x28x3xbf16>
    tpu.vector_store %arg6[%c2_17, %c0_18, %c0_19, %c0_20], %14 {strides = array<i32>} : memref<3x30x28x3xbf16, #tpu.memory_space<vmem>>, vector<1x30x28x3xbf16>,
    %c0_21 = arith.constant 0 : index
    %c0_22 = arith.constant 0 : index
    %15 = vector.load %arg4[%c0_21, %c0_22] : memref<1x128xf32, #tpu.memory_space<vmem>>, vector<1x128xf32>
    %c0_i32 = arith.constant 0 : i32
    %c28_i32 = arith.constant 28 : i32
    %16 = arith.addi %c0_i32, %c28_i32 : i32
    %c1_i32 = arith.constant 1 : i32
    scf.for %arg7 = %c0_i32 to %16 step %c1_i32  : i32 {
      %cst = arith.constant 0.000000e+00 : f32
      %17 = vector.broadcast %cst : f32 to vector<28x128xf32>
      %c0_i32_24 = arith.constant 0 : i32
      %18 = arith.addi %arg7, %c0_i32_24 : i32
      %c0_25 = arith.constant 0 : index
      %19 = arith.index_cast %18 : i32 to index
      %c0_26 = arith.constant 0 : index
      %c0_27 = arith.constant 0 : index
      %20 = vector.load %arg6[%c0_25, %19, %c0_26, %c0_27] : memref<3x30x28x3xbf16, #tpu.memory_space<vmem>>, vector<1x1x28x3xbf16>
      %21 = vector.shape_cast %20 : vector<1x1x28x3xbf16> to vector<28x3xbf16>
      %c0_28 = arith.constant 0 : index
      %c0_29 = arith.constant 0 : index
      %c0_30 = arith.constant 0 : index
      %c0_31 = arith.constant 0 : index
      %22 = vector.load %arg3[%c0_28, %c0_29, %c0_30, %c0_31] : memref<3x3x3x128xbf16, #tpu.memory_space<vmem>>, vector<1x1x3x128xbf16>
      %23 = vector.shape_cast %22 : vector<1x1x3x128xbf16> to vector<3x128xbf16>
      %cst_32 = arith.constant dense<0.000000e+00> : vector<28x128xf32>
      %24 = tpu.matmul %21, %23, %cst_32 {dimension_numbers = #tpu.dot_dimension_numbers<[1], [0], [0], [1], [0, 0, 1, 1], [], []>} : vector<28x3xbf16>, vector<3x128xbf16>, vector<28x128xf32> -> vector<28x128xf32>
      %25 = arith.addf %17, %24 : vector<28x128xf32>
      %c0_i32_33 = arith.constant 0 : i32
      %26 = arith.addi %arg7, %c0_i32_33 : i32
      %c1_34 = arith.constant 1 : index
      %27 = arith.index_cast %26 : i32 to index
      %c0_35 = arith.constant 0 : index
      %c0_36 = arith.constant 0 : index
      %28 = vector.load %arg6[%c1_34, %27, %c0_35, %c0_36] : memref<3x30x28x3xbf16, #tpu.memory_space<vmem>>, vector<1x1x28x3xbf16>
      %29 = vector.shape_cast %28 : vector<1x1x28x3xbf16> to vector<28x3xbf16>
      %c0_37 = arith.constant 0 : index
      %c1_38 = arith.constant 1 : index
      %c0_39 = arith.constant 0 : index
      %c0_40 = arith.constant 0 : index
      %30 = vector.load %arg3[%c0_37, %c1_38, %c0_39, %c0_40] : memref<3x3x3x128xbf16, #tpu.memory_space<vmem>>, vector<1x1x3x128xbf16>
      %31 = vector.shape_cast %30 : vector<1x1x3x128xbf16> to vector<3x128xbf16>
      %cst_41 = arith.constant dense<0.000000e+00> : vector<28x128xf32>
      %32 = tpu.matmul %29, %31, %cst_41 {dimension_numbers = #tpu.dot_dimension_numbers<[1], [0], [0], [1], [0, 0, 1, 1], [], []>} : vector<28x3xbf16>, vector<3x128xbf16>, vector<28x128xf32> -> vector<28x128xf32>
      %33 = arith.addf %25, %32 : vector<28x128xf32>
      %c0_i32_42 = arith.constant 0 : i32
      %34 = arith.addi %arg7, %c0_i32_42 : i32
      %c2_43 = arith.constant 2 : index
      %35 = arith.index_cast %34 : i32 to index
      %c0_44 = arith.constant 0 : index
      %c0_45 = arith.constant 0 : index
      %36 = vector.load %arg6[%c2_43, %35, %c0_44, %c0_45] : memref<3x30x28x3xbf16, #tpu.memory_space<vmem>>, vector<1x1x28x3xbf16>
      %37 = vector.shape_cast %36 : vector<1x1x28x3xbf16> to vector<28x3xbf16>
      %c0_46 = arith.constant 0 : index
      %c2_47 = arith.constant 2 : index
      %c0_48 = arith.constant 0 : index
      %c0_49 = arith.constant 0 : index
      %38 = vector.load %arg3[%c0_46, %c2_47, %c0_48, %c0_49] : memref<3x3x3x128xbf16, #tpu.memory_space<vmem>>, vector<1x1x3x128xbf16>
      %39 = vector.shape_cast %38 : vector<1x1x3x128xbf16> to vector<3x128xbf16>
      %cst_50 = arith.constant dense<0.000000e+00> : vector<28x128xf32>
      %40 = tpu.matmul %37, %39, %cst_50 {dimension_numbers = #tpu.dot_dimension_numbers<[1], [0], [0], [1], [0, 0, 1, 1], [], []>} : vector<28x3xbf16>, vector<3x128xbf16>, vector<28x128xf32> -> vector<28x128xf32>
      %41 = arith.addf %33, %40 : vector<28x128xf32>
      %c1_i32_51 = arith.constant 1 : i32
      %42 = arith.addi %arg7, %c1_i32_51 : i32
      %c0_52 = arith.constant 0 : index
      %43 = arith.index_cast %42 : i32 to index
      %c0_53 = arith.constant 0 : index
      %c0_54 = arith.constant 0 : index
      %44 = vector.load %arg6[%c0_52, %43, %c0_53, %c0_54] : memref<3x30x28x3xbf16, #tpu.memory_space<vmem>>, vector<1x1x28x3xbf16>
      %45 = vector.shape_cast %44 : vector<1x1x28x3xbf16> to vector<28x3xbf16>
      %c1_55 = arith.constant 1 : index
      %c0_56 = arith.constant 0 : index
      %c0_57 = arith.constant 0 : index
      %c0_58 = arith.constant 0 : index
      %46 = vector.load %arg3[%c1_55, %c0_56, %c0_57, %c0_58] : memref<3x3x3x128xbf16, #tpu.memory_space<vmem>>, vector<1x1x3x128xbf16>
      %47 = vector.shape_cast %46 : vector<1x1x3x128xbf16> to vector<3x128xbf16>
      %cst_59 = arith.constant dense<0.000000e+00> : vector<28x128xf32>
      %48 = tpu.matmul %45, %47, %cst_59 {dimension_numbers = #tpu.dot_dimension_numbers<[1], [0], [0], [1], [0, 0, 1, 1], [], []>} : vector<28x3xbf16>, vector<3x128xbf16>, vector<28x128xf32> -> vector<28x128xf32>
      %49 = arith.addf %41, %48 : vector<28x128xf32>
      %c1_i32_60 = arith.constant 1 : i32
      %50 = arith.addi %arg7, %c1_i32_60 : i32
      %c1_61 = arith.constant 1 : index
      %51 = arith.index_cast %50 : i32 to index
      %c0_62 = arith.constant 0 : index
      %c0_63 = arith.constant 0 : index
      %52 = vector.load %arg6[%c1_61, %51, %c0_62, %c0_63] : memref<3x30x28x3xbf16, #tpu.memory_space<vmem>>, vector<1x1x28x3xbf16>
      %53 = vector.shape_cast %52 : vector<1x1x28x3xbf16> to vector<28x3xbf16>
      %c1_64 = arith.constant 1 : index
      %c1_65 = arith.constant 1 : index
      %c0_66 = arith.constant 0 : index
      %c0_67 = arith.constant 0 : index
      %54 = vector.load %arg3[%c1_64, %c1_65, %c0_66, %c0_67] : memref<3x3x3x128xbf16, #tpu.memory_space<vmem>>, vector<1x1x3x128xbf16>
      %55 = vector.shape_cast %54 : vector<1x1x3x128xbf16> to vector<3x128xbf16>
      %cst_68 = arith.constant dense<0.000000e+00> : vector<28x128xf32>
      %56 = tpu.matmul %53, %55, %cst_68 {dimension_numbers = #tpu.dot_dimension_numbers<[1], [0], [0], [1], [0, 0, 1, 1], [], []>} : vector<28x3xbf16>, vector<3x128xbf16>, vector<28x128xf32> -> vector<28x128xf32>
      %57 = arith.addf %49, %56 : vector<28x128xf32>
      %c1_i32_69 = arith.constant 1 : i32
      %58 = arith.addi %arg7, %c1_i32_69 : i32
      %c2_70 = arith.constant 2 : index
      %59 = arith.index_cast %58 : i32 to index
      %c0_71 = arith.constant 0 : index
      %c0_72 = arith.constant 0 : index
      %60 = vector.load %arg6[%c2_70, %59, %c0_71, %c0_72] : memref<3x30x28x3xbf16, #tpu.memory_space<vmem>>, vector<1x1x28x3xbf16>
      %61 = vector.shape_cast %60 : vector<1x1x28x3xbf16> to vector<28x3xbf16>
      %c1_73 = arith.constant 1 : index
      %c2_74 = arith.constant 2 : index
      %c0_75 = arith.constant 0 : index
      %c0_76 = arith.constant 0 : index
      %62 = vector.load %arg3[%c1_73, %c2_74, %c0_75, %c0_76] : memref<3x3x3x128xbf16, #tpu.memory_space<vmem>>, vector<1x1x3x128xbf16>
      %63 = vector.shape_cast %62 : vector<1x1x3x128xbf16> to vector<3x128xbf16>
      %cst_77 = arith.constant dense<0.000000e+00> : vector<28x128xf32>
      %64 = tpu.matmul %61, %63, %cst_77 {dimension_numbers = #tpu.dot_dimension_numbers<[1], [0], [0], [1], [0, 0, 1, 1], [], []>} : vector<28x3xbf16>, vector<3x128xbf16>, vector<28x128xf32> -> vector<28x128xf32>
      %65 = arith.addf %57, %64 : vector<28x128xf32>
      %c2_i32 = arith.constant 2 : i32
      %66 = arith.addi %arg7, %c2_i32 : i32
      %c0_78 = arith.constant 0 : index
      %67 = arith.index_cast %66 : i32 to index
      %c0_79 = arith.constant 0 : index
      %c0_80 = arith.constant 0 : index
      %68 = vector.load %arg6[%c0_78, %67, %c0_79, %c0_80] : memref<3x30x28x3xbf16, #tpu.memory_space<vmem>>, vector<1x1x28x3xbf16>
      %69 = vector.shape_cast %68 : vector<1x1x28x3xbf16> to vector<28x3xbf16>
      %c2_81 = arith.constant 2 : index
      %c0_82 = arith.constant 0 : index
      %c0_83 = arith.constant 0 : index
      %c0_84 = arith.constant 0 : index
      %70 = vector.load %arg3[%c2_81, %c0_82, %c0_83, %c0_84] : memref<3x3x3x128xbf16, #tpu.memory_space<vmem>>, vector<1x1x3x128xbf16>
      %71 = vector.shape_cast %70 : vector<1x1x3x128xbf16> to vector<3x128xbf16>
      %cst_85 = arith.constant dense<0.000000e+00> : vector<28x128xf32>
      %72 = tpu.matmul %69, %71, %cst_85 {dimension_numbers = #tpu.dot_dimension_numbers<[1], [0], [0], [1], [0, 0, 1, 1], [], []>} : vector<28x3xbf16>, vector<3x128xbf16>, vector<28x128xf32> -> vector<28x128xf32>
      %73 = arith.addf %65, %72 : vector<28x128xf32>
      %c2_i32_86 = arith.constant 2 : i32
      %74 = arith.addi %arg7, %c2_i32_86 : i32
      %c1_87 = arith.constant 1 : index
      %75 = arith.index_cast %74 : i32 to index
      %c0_88 = arith.constant 0 : index
      %c0_89 = arith.constant 0 : index
      %76 = vector.load %arg6[%c1_87, %75, %c0_88, %c0_89] : memref<3x30x28x3xbf16, #tpu.memory_space<vmem>>, vector<1x1x28x3xbf16>
      %77 = vector.shape_cast %76 : vector<1x1x28x3xbf16> to vector<28x3xbf16>
      %c2_90 = arith.constant 2 : index
      %c1_91 = arith.constant 1 : index
      %c0_92 = arith.constant 0 : index
      %c0_93 = arith.constant 0 : index
      %78 = vector.load %arg3[%c2_90, %c1_91, %c0_92, %c0_93] : memref<3x3x3x128xbf16, #tpu.memory_space<vmem>>, vector<1x1x3x128xbf16>
      %79 = vector.shape_cast %78 : vector<1x1x3x128xbf16> to vector<3x128xbf16>
      %cst_94 = arith.constant dense<0.000000e+00> : vector<28x128xf32>
      %80 = tpu.matmul %77, %79, %cst_94 {dimension_numbers = #tpu.dot_dimension_numbers<[1], [0], [0], [1], [0, 0, 1, 1], [], []>} : vector<28x3xbf16>, vector<3x128xbf16>, vector<28x128xf32> -> vector<28x128xf32>
      %81 = arith.addf %73, %80 : vector<28x128xf32>
      %c2_i32_95 = arith.constant 2 : i32
      %82 = arith.addi %arg7, %c2_i32_95 : i32
      %c2_96 = arith.constant 2 : index
      %83 = arith.index_cast %82 : i32 to index
      %c0_97 = arith.constant 0 : index
      %c0_98 = arith.constant 0 : index
      %84 = vector.load %arg6[%c2_96, %83, %c0_97, %c0_98] : memref<3x30x28x3xbf16, #tpu.memory_space<vmem>>, vector<1x1x28x3xbf16>
      %85 = vector.shape_cast %84 : vector<1x1x28x3xbf16> to vector<28x3xbf16>
      %c2_99 = arith.constant 2 : index
      %c2_100 = arith.constant 2 : index
      %c0_101 = arith.constant 0 : index
      %c0_102 = arith.constant 0 : index
      %86 = vector.load %arg3[%c2_99, %c2_100, %c0_101, %c0_102] : memref<3x3x3x128xbf16, #tpu.memory_space<vmem>>, vector<1x1x3x128xbf16>
      %87 = vector.shape_cast %86 : vector<1x1x3x128xbf16> to vector<3x128xbf16>
      %cst_103 = arith.constant dense<0.000000e+00> : vector<28x128xf32>
      %88 = tpu.matmul %85, %87, %cst_103 {dimension_numbers = #tpu.dot_dimension_numbers<[1], [0], [0], [1], [0, 0, 1, 1], [], []>} : vector<28x3xbf16>, vector<3x128xbf16>, vector<28x128xf32> -> vector<28x128xf32>
      %89 = arith.addf %81, %88 : vector<28x128xf32>
      %90 = vector.broadcast %15 : vector<1x128xf32> to vector<28x128xf32>
      %91 = arith.addf %89, %90 : vector<28x128xf32>
      %cst_104 = arith.constant 0.000000e+00 : f32
      %92 = vector.broadcast %cst_104 : f32 to vector<28x128xf32>
      %93 = arith.maximumf %91, %92 : vector<28x128xf32>
      %94 = arith.truncf %93 : vector<28x128xf32> to vector<28x128xbf16>
      %c0_105 = arith.constant 0 : index
      %95 = arith.index_cast %arg7 : i32 to index
      %c0_106 = arith.constant 0 : index
      %c0_107 = arith.constant 0 : index
      %96 = vector.load %arg5[%c0_105, %95, %c0_106, %c0_107] : memref<1x28x28x128xbf16, #tpu.memory_space<vmem>>, vector<1x1x28x128xbf16>
      %97 = vector.shape_cast %96 : vector<1x1x28x128xbf16> to vector<28x128xbf16>
      %98 = vector.shape_cast %94 : vector<28x128xbf16> to vector<1x1x28x128xbf16>
      tpu.vector_store %arg5[%c0_105, %95, %c0_106, %c0_107], %98 {strides = array<i32>} : memref<1x28x28x128xbf16, #tpu.memory_space<vmem>>, vector<1x1x28x128xbf16>,
    }
    %c28_i32_23 = arith.constant 28 : i32
    return
  }
  func.func @transform_0(%arg0: i32, %arg1: i32) -> (i32, i32, i32, i32) {
    %c0_i32 = arith.constant 0 : i32
    %c0_i32_0 = arith.constant 0 : i32
    %c0_i32_1 = arith.constant 0 : i32
    %c0_i32_2 = arith.constant 0 : i32
    return %arg1, %c0_i32, %c0_i32_0, %c0_i32_1 : i32, i32, i32, i32
  }
  func.func @transform_1(%arg0: i32, %arg1: i32) -> (i32, i32, i32, i32) {
    %c0_i32 = arith.constant 0 : i32
    %c0_i32_0 = arith.constant 0 : i32
    %c0_i32_1 = arith.constant 0 : i32
    %c0_i32_2 = arith.constant 0 : i32
    return %c0_i32, %c0_i32_0, %c0_i32_1, %arg0 : i32, i32, i32, i32
  }
  func.func @transform_2(%arg0: i32, %arg1: i32) -> (i32, i32) {
    %c0_i32 = arith.constant 0 : i32
    %c0_i32_0 = arith.constant 0 : i32
    return %c0_i32, %arg0 : i32, i32
  }
  func.func @transform_3(%arg0: i32, %arg1: i32) -> (i32, i32, i32, i32) {
    %c0_i32 = arith.constant 0 : i32
    %c0_i32_0 = arith.constant 0 : i32
    %c0_i32_1 = arith.constant 0 : i32
    return %arg1, %c0_i32, %c0_i32_0, %arg0 : i32, i32, i32, i32
  }
}

</mosaic_0001>

<bundles_post_ra>
// kernel: tpu_custom_call.1
= control target key start
LH: loop header
LB: loop body
LE: loop exit
PB: predicated region body
PF: predicated region fallthrough
CT: control target
= control target key end

     0   :  { %s4102_s12 = smov 0   ;;  %s4104_s13 = smov 0   ;;  %s5317_s0 = inlined_call_operand.vmem [shape: bf16[2,30,30,3], index: 0, kind: input, shape index: {}]   ;;  %s5318_s1 = inlined_call_operand.vmem [shape: bf16[3,3,3,128], index: 1, kind: input, shape index: {}]   ;;  %s5319_s2 = inlined_call_operand.vmem [shape: f32[1,128], index: 2, kind: input, shape index: {}]   ;;  %s5320_s3 = inlined_call_operand.vmem [shape: bf16[2,28,28,128], index: 3, kind: output, shape index: {}]  }
   0x1   :  { %s4106_s14 = smov 0  }
   0x2 LB: > { %s22_s15 = sadd.s32 1, %s4071_s13  ;;  %p3733_p0 = scmp.ge.s32.totalorder %s4075_s14, 1  ;;  %s4075_s14 = sphi %s4106_s14, %s13_s14   ;;  %s4071_s13 = sphi %s4104_s13, %s5326_s13   ;;  %s4067_s12 = sphi %s4102_s12, %s5325_s12  }
   0x3   : > { %p23_p1 = scmp.ge.s32.totalorder %s22_s15, 2  ;;  %p168_p2 = scmp.lt.s32.totalorder %s4075_s14, 3 }
   0x5   : > { %s5328_s15 = smov (%p23_p1, %s22_s15), 0  ;;  %p169_p3 = pnand %p3733_p0, %p168_p2 }
   0x6   : > { %p202_p4 = scmp.lt.s32.totalorder (!%p169_p3), %s4067_s12, 1  ;;  %vm343_vm0 = vcmask (!%p169_p3), 19456   ;;  %vm347_vm1 = vcmask (!%p169_p3), 17408   ;;  %vm585_vm2 = vsmask.f32 (!%p169_p3), 3328  ;;  %vm2239_vm5 = vcmask (!%p169_p3), 1042432  }
   0x7   : > { %172 = sbr.rel (%p169_p3) target bundleno = 701 (0x2bd), region = 32  ;;  %vm586_vm3 = vsmask.f32 (!%p169_p3), 7440  ;;  %vm2240_vm6 = vcmask (!%p169_p3), 1046532   ;;  %s5225_s26 = smov (!%p169_p3), 0  }
   0x8   : > { %vm4378_vm4 = vmor (!%p169_p3), %vm585_vm2, %vm586_vm3 }
   0x9   : > { %vm4799_vm7 = vmor (!%p169_p3), %vm2239_vm5, %vm2240_vm6 }
   0xe   : > { %s5330_s12 = smov (!%p202_p4, %s4067_s12), 1 }
   0xf   : > { %s3996_s16 = smul.u32 480, %s5330_s12 }
  0x10   : > { %s3997_s17 = smul.u32 448, %s5330_s12 }
  0x11   : > { %s4123_s20 = scalar_lea.vmem %s5317_s0, %s3996_s16 }
  0x12   : > { %s4128_s23 = scalar_lea.vmem %s5320_s3, %s3997_s17  ;;  %v223_v0 = vld [vmem:[%s4123_s20] sm:$0xf]  ;;  %v224_v1 = vld [vmem:[%s4123_s20 + $0x4] sm:$0xf]  ;;  %v225_v2 = vld [vmem:[%s4123_s20 + $0x8] sm:$0xf] }
  0x13   : > { %344 = vst.msk [vmem:[#allocation2] sm:$0xf] %vm343_vm0, %v223_v0  ;;  %345 = vst.msk [vmem:[#allocation2 + $0x4] sm:$0xf] %vm343_vm0, %v224_v1  ;;  %v226_v3 = vld [vmem:[%s4123_s20 + $0xc] sm:$0x3] }
  0x14   : > { %346 = vst.msk [vmem:[#allocation2 + $0x8] sm:$0xf] %vm343_vm0, %v225_v2  ;;  %v227_v4 = vld [vmem:[%s4123_s20 + $0x10] sm:$0xf]  ;;  %v228_v5 = vld [vmem:[%s4123_s20 + $0x14] sm:$0xf] }
  0x15   : > { %348 = vst.msk [vmem:[#allocation2 + $0xc] sm:$0x3] %vm347_vm1, %v226_v3  ;;  %v229_v6 = vld [vmem:[%s4123_s20 + $0x18] sm:$0xf]  ;;  %v230_v7 = vld [vmem:[%s4123_s20 + $0x1c] sm:$0x3] }
  0x16   : > { %349 = vst.msk [vmem:[#allocation2 + $0x10] sm:$0xf] %vm343_vm0, %v227_v4  ;;  %350 = vst.msk [vmem:[#allocation2 + $0x14] sm:$0xf] %vm343_vm0, %v228_v5  ;;  %v231_v8 = vld [vmem:[%s4123_s20 + $0x20] sm:$0xf] }
  0x17   : > { %351 = vst.msk [vmem:[#allocation2 + $0x18] sm:$0xf] %vm343_vm0, %v229_v6  ;;  %353 = vst.msk [vmem:[#allocation2 + $0x20] sm:$0xf] %vm343_vm0, %v231_v8  ;;  %v232_v9 = vld [vmem:[%s4123_s20 + $0x24] sm:$0xf] }
  0x18   : > { %352 = vst.msk [vmem:[#allocation2 + $0x1c] sm:$0x3] %vm347_vm1, %v230_v7  ;;  %v233_v10 = vld [vmem:[%s4123_s20 + $0x28] sm:$0xf]  ;;  %v234_v11 = vld [vmem:[%s4123_s20 + $0x2c] sm:$0x3] }
  0x19   : > { %354 = vst.msk [vmem:[#allocation2 + $0x24] sm:$0xf] %vm343_vm0, %v232_v9  ;;  %355 = vst.msk [vmem:[#allocation2 + $0x28] sm:$0xf] %vm343_vm0, %v233_v10  ;;  %v235_v12 = vld [vmem:[%s4123_s20 + $0x30] sm:$0xf] }
  0x1a   : > { %356 = vst.msk [vmem:[#allocation2 + $0x2c] sm:$0x3] %vm347_vm1, %v234_v11  ;;  %v236_v13 = vld [vmem:[%s4123_s20 + $0x34] sm:$0xf]  ;;  %v237_v14 = vld [vmem:[%s4123_s20 + $0x38] sm:$0xf] }
  0x1b   : > { %357 = vst.msk [vmem:[#allocation2 + $0x30] sm:$0xf] %vm343_vm0, %v235_v12  ;;  %358 = vst.msk [vmem:[#allocation2 + $0x34] sm:$0xf] %vm343_vm0, %v236_v13  ;;  %v238_v15 = vld [vmem:[%s4123_s20 + $0x3c] sm:$0x3] }
  0x1c   : > { %359 = vst.msk [vmem:[#allocation2 + $0x38] sm:$0xf] %vm343_vm0, %v237_v14  ;;  %v239_v16 = vld [vmem:[%s4123_s20 + $0x40] sm:$0xf]  ;;  %v240_v17 = vld [vmem:[%s4123_s20 + $0x44] sm:$0xf] }
  0x1d   : > { %360 = vst.msk [vmem:[#allocation2 + $0x3c] sm:$0x3] %vm347_vm1, %v238_v15  ;;  %v241_v18 = vld [vmem:[%s4123_s20 + $0x48] sm:$0xf]  ;;  %v242_v19 = vld [vmem:[%s4123_s20 + $0x4c] sm:$0x3] }
  0x1e   : > { %361 = vst.msk [vmem:[#allocation2 + $0x40] sm:$0xf] %vm343_vm0, %v239_v16  ;;  %362 = vst.msk [vmem:[#allocation2 + $0x44] sm:$0xf] %vm343_vm0, %v240_v17  ;;  %v243_v20 = vld [vmem:[%s4123_s20 + $0x50] sm:$0xf] }
  0x1f   : > { %363 = vst.msk [vmem:[#allocation2 + $0x48] sm:$0xf] %vm343_vm0, %v241_v18  ;;  %365 = vst.msk [vmem:[#allocation2 + $0x50] sm:$0xf] %vm343_vm0, %v243_v20  ;;  %v244_v21 = vld [vmem:[%s4123_s20 + $0x54] sm:$0xf] }
  0x20   : > { %364 = vst.msk [vmem:[#allocation2 + $0x4c] sm:$0x3] %vm347_vm1, %v242_v19  ;;  %v245_v22 = vld [vmem:[%s4123_s20 + $0x58] sm:$0xf]  ;;  %v246_v23 = vld [vmem:[%s4123_s20 + $0x5c] sm:$0x3] }
  0x21   : > { %366 = vst.msk [vmem:[#allocation2 + $0x54] sm:$0xf] %vm343_vm0, %v244_v21  ;;  %367 = vst.msk [vmem:[#allocation2 + $0x58] sm:$0xf] %vm343_vm0, %v245_v22  ;;  %v247_v24 = vld [vmem:[%s4123_s20 + $0x60] sm:$0xf] }
  0x22   : > { %368 = vst.msk [vmem:[#allocation2 + $0x5c] sm:$0x3] %vm347_vm1, %v246_v23  ;;  %v248_v25 = vld [vmem:[%s4123_s20 + $0x64] sm:$0xf]  ;;  %v249_v26 = vld [vmem:[%s4123_s20 + $0x68] sm:$0xf] }
  0x23   : > { %369 = vst.msk [vmem:[#allocation2 + $0x60] sm:$0xf] %vm343_vm0, %v247_v24  ;;  %370 = vst.msk [vmem:[#allocation2 + $0x64] sm:$0xf] %vm343_vm0, %v248_v25  ;;  %v250_v27 = vld [vmem:[%s4123_s20 + $0x6c] sm:$0x3] }
  0x24   : > { %371 = vst.msk [vmem:[#allocation2 + $0x68] sm:$0xf] %vm343_vm0, %v249_v26  ;;  %v251_v28 = vld [vmem:[%s4123_s20 + $0x70] sm:$0xf]  ;;  %v252_v29 = vld [vmem:[%s4123_s20 + $0x74] sm:$0xf] }
  0x25   : > { %372 = vst.msk [vmem:[#allocation2 + $0x6c] sm:$0x3] %vm347_vm1, %v250_v27  ;;  %v253_v30 = vld [vmem:[%s4123_s20 + $0x78] sm:$0xf]  ;;  %v254_v31 = vld [vmem:[%s4123_s20 + $0x7c] sm:$0x3] }
  0x26   : > { %373 = vst.msk [vmem:[#allocation2 + $0x70] sm:$0xf] %vm343_vm0, %v251_v28  ;;  %374 = vst.msk [vmem:[#allocation2 + $0x74] sm:$0xf] %vm343_vm0, %v252_v29  ;;  %v255_v32 = vld [vmem:[%s4123_s20 + $0x80] sm:$0xf] }
  0x27   : > { %375 = vst.msk [vmem:[#allocation2 + $0x78] sm:$0xf] %vm343_vm0, %v253_v30  ;;  %377 = vst.msk [vmem:[#allocation2 + $0x80] sm:$0xf] %vm343_vm0, %v255_v32  ;;  %v256_v33 = vld [vmem:[%s4123_s20 + $0x84] sm:$0xf] }
  0x28   : > { %376 = vst.msk [vmem:[#allocation2 + $0x7c] sm:$0x3] %vm347_vm1, %v254_v31  ;;  %v257_v34 = vld [vmem:[%s4123_s20 + $0x88] sm:$0xf]  ;;  %v258_v35 = vld [vmem:[%s4123_s20 + $0x8c] sm:$0x3] }
  0x29   : > { %378 = vst.msk [vmem:[#allocation2 + $0x84] sm:$0xf] %vm343_vm0, %v256_v33  ;;  %379 = vst.msk [vmem:[#allocation2 + $0x88] sm:$0xf] %vm343_vm0, %v257_v34  ;;  %v259_v36 = vld [vmem:[%s4123_s20 + $0x90] sm:$0xf] }
  0x2a   : > { %380 = vst.msk [vmem:[#allocation2 + $0x8c] sm:$0x3] %vm347_vm1, %v258_v35  ;;  %v260_v37 = vld [vmem:[%s4123_s20 + $0x94] sm:$0xf]  ;;  %v261_v38 = vld [vmem:[%s4123_s20 + $0x98] sm:$0xf] }
  0x2b   : > { %381 = vst.msk [vmem:[#allocation2 + $0x90] sm:$0xf] %vm343_vm0, %v259_v36  ;;  %382 = vst.msk [vmem:[#allocation2 + $0x94] sm:$0xf] %vm343_vm0, %v260_v37  ;;  %v262_v39 = vld [vmem:[%s4123_s20 + $0x9c] sm:$0x3] }
  0x2c   : > { %383 = vst.msk [vmem:[#allocation2 + $0x98] sm:$0xf] %vm343_vm0, %v261_v38  ;;  %v263_v40 = vld [vmem:[%s4123_s20 + $0xa0] sm:$0xf]  ;;  %v264_v41 = vld [vmem:[%s4123_s20 + $0xa4] sm:$0xf] }
  0x2d   : > { %384 = vst.msk [vmem:[#allocation2 + $0x9c] sm:$0x3] %vm347_vm1, %v262_v39  ;;  %v265_v42 = vld [vmem:[%s4123_s20 + $0xa8] sm:$0xf]  ;;  %v266_v43 = vld [vmem:[%s4123_s20 + $0xac] sm:$0x3] }
  0x2e   : > { %385 = vst.msk [vmem:[#allocation2 + $0xa0] sm:$0xf] %vm343_vm0, %v263_v40  ;;  %386 = vst.msk [vmem:[#allocation2 + $0xa4] sm:$0xf] %vm343_vm0, %v264_v41  ;;  %v267_v44 = vld [vmem:[%s4123_s20 + $0xb0] sm:$0xf] }
  0x2f   : > { %387 = vst.msk [vmem:[#allocation2 + $0xa8] sm:$0xf] %vm343_vm0, %v265_v42  ;;  %389 = vst.msk [vmem:[#allocation2 + $0xb0] sm:$0xf] %vm343_vm0, %v267_v44  ;;  %v268_v45 = vld [vmem:[%s4123_s20 + $0xb4] sm:$0xf] }
  0x30   : > { %388 = vst.msk [vmem:[#allocation2 + $0xac] sm:$0x3] %vm347_vm1, %v266_v43  ;;  %v269_v46 = vld [vmem:[%s4123_s20 + $0xb8] sm:$0xf]  ;;  %v270_v47 = vld [vmem:[%s4123_s20 + $0xbc] sm:$0x3] }
  0x31   : > { %390 = vst.msk [vmem:[#allocation2 + $0xb4] sm:$0xf] %vm343_vm0, %v268_v45  ;;  %391 = vst.msk [vmem:[#allocation2 + $0xb8] sm:$0xf] %vm343_vm0, %v269_v46  ;;  %v271_v48 = vld [vmem:[%s4123_s20 + $0xc0] sm:$0xf] }
  0x32   : > { %392 = vst.msk [vmem:[#allocation2 + $0xbc] sm:$0x3] %vm347_vm1, %v270_v47  ;;  %v272_v49 = vld [vmem:[%s4123_s20 + $0xc4] sm:$0xf]  ;;  %v273_v50 = vld [vmem:[%s4123_s20 + $0xc8] sm:$0xf] }
  0x33   : > { %393 = vst.msk [vmem:[#allocation2 + $0xc0] sm:$0xf] %vm343_vm0, %v271_v48  ;;  %394 = vst.msk [vmem:[#allocation2 + $0xc4] sm:$0xf] %vm343_vm0, %v272_v49  ;;  %v274_v51 = vld [vmem:[%s4123_s20 + $0xcc] sm:$0x3] }
  0x34   : > { %395 = vst.msk [vmem:[#allocation2 + $0xc8] sm:$0xf] %vm343_vm0, %v273_v50  ;;  %v275_v52 = vld [vmem:[%s4123_s20 + $0xd0] sm:$0xf]  ;;  %v276_v53 = vld [vmem:[%s4123_s20 + $0xd4] sm:$0xf] }
  0x35   : > { %396 = vst.msk [vmem:[#allocation2 + $0xcc] sm:$0x3] %vm347_vm1, %v274_v51  ;;  %v277_v54 = vld [vmem:[%s4123_s20 + $0xd8] sm:$0xf]  ;;  %v278_v55 = vld [vmem:[%s4123_s20 + $0xdc] sm:$0x3] }
  0x36   : > { %397 = vst.msk [vmem:[#allocation2 + $0xd0] sm:$0xf] %vm343_vm0, %v275_v52  ;;  %398 = vst.msk [vmem:[#allocation2 + $0xd4] sm:$0xf] %vm343_vm0, %v276_v53  ;;  %v279_v56 = vld [vmem:[%s4123_s20 + $0xe0] sm:$0xf] }
  0x37   : > { %399 = vst.msk [vmem:[#allocation2 + $0xd8] sm:$0xf] %vm343_vm0, %v277_v54  ;;  %401 = vst.msk [vmem:[#allocation2 + $0xe0] sm:$0xf] %vm343_vm0, %v279_v56  ;;  %v280_v57 = vld [vmem:[%s4123_s20 + $0xe4] sm:$0xf] }
  0x38   : > { %400 = vst.msk [vmem:[#allocation2 + $0xdc] sm:$0x3] %vm347_vm1, %v278_v55  ;;  %v281_v58 = vld [vmem:[%s4123_s20 + $0xe8] sm:$0xf]  ;;  %v282_v59 = vld [vmem:[%s4123_s20 + $0xec] sm:$0x3] }
  0x39   : > { %402 = vst.msk [vmem:[#allocation2 + $0xe4] sm:$0xf] %vm343_vm0, %v280_v57  ;;  %403 = vst.msk [vmem:[#allocation2 + $0xe8] sm:$0xf] %vm343_vm0, %v281_v58  ;;  %v283_v60 = vld [vmem:[%s4123_s20 + $0xf0] sm:$0xf] }
  0x3a   : > { %404 = vst.msk [vmem:[#allocation2 + $0xec] sm:$0x3] %vm347_vm1, %v282_v59  ;;  %v284_v61 = vld [vmem:[%s4123_s20 + $0xf4] sm:$0xf]  ;;  %v285_v62 = vld [vmem:[%s4123_s20 + $0xf8] sm:$0xf] }
  0x3b   : > { %405 = vst.msk [vmem:[#allocation2 + $0xf0] sm:$0xf] %vm343_vm0, %v283_v60  ;;  %406 = vst.msk [vmem:[#allocation2 + $0xf4] sm:$0xf] %vm343_vm0, %v284_v61  ;;  %v286_v63 = vld [vmem:[%s4123_s20 + $0xfc] sm:$0x3] }
  0x3c   : > { %407 = vst.msk [vmem:[#allocation2 + $0xf8] sm:$0xf] %vm343_vm0, %v285_v62  ;;  %v287_v0 = vld [vmem:[%s4123_s20 + $0x100] sm:$0xf]  ;;  %v288_v1 = vld [vmem:[%s4123_s20 + $0x104] sm:$0xf] }
  0x3d   : > { %408 = vst.msk [vmem:[#allocation2 + $0xfc] sm:$0x3] %vm347_vm1, %v286_v63  ;;  %v289_v2 = vld [vmem:[%s4123_s20 + $0x108] sm:$0xf]  ;;  %v290_v3 = vld [vmem:[%s4123_s20 + $0x10c] sm:$0x3] }
  0x3e   : > { %409 = vst.msk [vmem:[#allocation2 + $0x100] sm:$0xf] %vm343_vm0, %v287_v0  ;;  %410 = vst.msk [vmem:[#allocation2 + $0x104] sm:$0xf] %vm343_vm0, %v288_v1  ;;  %v291_v4 = vld [vmem:[%s4123_s20 + $0x110] sm:$0xf] }
  0x3f   : > { %411 = vst.msk [vmem:[#allocation2 + $0x108] sm:$0xf] %vm343_vm0, %v289_v2  ;;  %413 = vst.msk [vmem:[#allocation2 + $0x110] sm:$0xf] %vm343_vm0, %v291_v4  ;;  %v292_v5 = vld [vmem:[%s4123_s20 + $0x114] sm:$0xf] }
  0x40   : > { %412 = vst.msk [vmem:[#allocation2 + $0x10c] sm:$0x3] %vm347_vm1, %v290_v3  ;;  %v293_v6 = vld [vmem:[%s4123_s20 + $0x118] sm:$0xf]  ;;  %v294_v7 = vld [vmem:[%s4123_s20 + $0x11c] sm:$0x3] }
  0x41   : > { %414 = vst.msk [vmem:[#allocation2 + $0x114] sm:$0xf] %vm343_vm0, %v292_v5  ;;  %415 = vst.msk [vmem:[#allocation2 + $0x118] sm:$0xf] %vm343_vm0, %v293_v6  ;;  %v295_v8 = vld [vmem:[%s4123_s20 + $0x120] sm:$0xf] }
  0x42   : > { %416 = vst.msk [vmem:[#allocation2 + $0x11c] sm:$0x3] %vm347_vm1, %v294_v7  ;;  %v296_v9 = vld [vmem:[%s4123_s20 + $0x124] sm:$0xf]  ;;  %v297_v10 = vld [vmem:[%s4123_s20 + $0x128] sm:$0xf] }
  0x43   : > { %417 = vst.msk [vmem:[#allocation2 + $0x120] sm:$0xf] %vm343_vm0, %v295_v8  ;;  %418 = vst.msk [vmem:[#allocation2 + $0x124] sm:$0xf] %vm343_vm0, %v296_v9  ;;  %v298_v11 = vld [vmem:[%s4123_s20 + $0x12c] sm:$0x3] }
  0x44   : > { %419 = vst.msk [vmem:[#allocation2 + $0x128] sm:$0xf] %vm343_vm0, %v297_v10  ;;  %v299_v12 = vld [vmem:[%s4123_s20 + $0x130] sm:$0xf]  ;;  %v300_v13 = vld [vmem:[%s4123_s20 + $0x134] sm:$0xf] }
  0x45   : > { %420 = vst.msk [vmem:[#allocation2 + $0x12c] sm:$0x3] %vm347_vm1, %v298_v11  ;;  %v301_v14 = vld [vmem:[%s4123_s20 + $0x138] sm:$0xf]  ;;  %v302_v15 = vld [vmem:[%s4123_s20 + $0x13c] sm:$0x3] }
  0x46   : > { %421 = vst.msk [vmem:[#allocation2 + $0x130] sm:$0xf] %vm343_vm0, %v299_v12  ;;  %422 = vst.msk [vmem:[#allocation2 + $0x134] sm:$0xf] %vm343_vm0, %v300_v13  ;;  %v303_v16 = vld [vmem:[%s4123_s20 + $0x140] sm:$0xf] }
  0x47   : > { %423 = vst.msk [vmem:[#allocation2 + $0x138] sm:$0xf] %vm343_vm0, %v301_v14  ;;  %425 = vst.msk [vmem:[#allocation2 + $0x140] sm:$0xf] %vm343_vm0, %v303_v16  ;;  %v304_v17 = vld [vmem:[%s4123_s20 + $0x144] sm:$0xf] }
  0x48   : > { %424 = vst.msk [vmem:[#allocation2 + $0x13c] sm:$0x3] %vm347_vm1, %v302_v15  ;;  %v305_v18 = vld [vmem:[%s4123_s20 + $0x148] sm:$0xf]  ;;  %v306_v19 = vld [vmem:[%s4123_s20 + $0x14c] sm:$0x3] }
  0x49   : > { %426 = vst.msk [vmem:[#allocation2 + $0x144] sm:$0xf] %vm343_vm0, %v304_v17  ;;  %427 = vst.msk [vmem:[#allocation2 + $0x148] sm:$0xf] %vm343_vm0, %v305_v18  ;;  %v307_v20 = vld [vmem:[%s4123_s20 + $0x150] sm:$0xf] }
  0x4a   : > { %428 = vst.msk [vmem:[#allocation2 + $0x14c] sm:$0x3] %vm347_vm1, %v306_v19  ;;  %v308_v21 = vld [vmem:[%s4123_s20 + $0x154] sm:$0xf]  ;;  %v309_v22 = vld [vmem:[%s4123_s20 + $0x158] sm:$0xf] }
  0x4b   : > { %429 = vst.msk [vmem:[#allocation2 + $0x150] sm:$0xf] %vm343_vm0, %v307_v20  ;;  %430 = vst.msk [vmem:[#allocation2 + $0x154] sm:$0xf] %vm343_vm0, %v308_v21  ;;  %v310_v23 = vld [vmem:[%s4123_s20 + $0x15c] sm:$0x3] }
  0x4c   : > { %431 = vst.msk [vmem:[#allocation2 + $0x158] sm:$0xf] %vm343_vm0, %v309_v22  ;;  %v311_v24 = vld [vmem:[%s4123_s20 + $0x160] sm:$0xf]  ;;  %v312_v25 = vld [vmem:[%s4123_s20 + $0x164] sm:$0xf] }
  0x4d   : > { %432 = vst.msk [vmem:[#allocation2 + $0x15c] sm:$0x3] %vm347_vm1, %v310_v23  ;;  %v313_v26 = vld [vmem:[%s4123_s20 + $0x168] sm:$0xf]  ;;  %v314_v27 = vld [vmem:[%s4123_s20 + $0x16c] sm:$0x3] }
  0x4e   : > { %433 = vst.msk [vmem:[#allocation2 + $0x160] sm:$0xf] %vm343_vm0, %v311_v24  ;;  %434 = vst.msk [vmem:[#allocation2 + $0x164] sm:$0xf] %vm343_vm0, %v312_v25  ;;  %v315_v28 = vld [vmem:[%s4123_s20 + $0x170] sm:$0xf] }
  0x4f   : > { %435 = vst.msk [vmem:[#allocation2 + $0x168] sm:$0xf] %vm343_vm0, %v313_v26  ;;  %437 = vst.msk [vmem:[#allocation2 + $0x170] sm:$0xf] %vm343_vm0, %v315_v28  ;;  %v316_v29 = vld [vmem:[%s4123_s20 + $0x174] sm:$0xf] }
  0x50   : > { %436 = vst.msk [vmem:[#allocation2 + $0x16c] sm:$0x3] %vm347_vm1, %v314_v27  ;;  %v317_v30 = vld [vmem:[%s4123_s20 + $0x178] sm:$0xf]  ;;  %v318_v31 = vld [vmem:[%s4123_s20 + $0x17c] sm:$0x3] }
  0x51   : > { %438 = vst.msk [vmem:[#allocation2 + $0x174] sm:$0xf] %vm343_vm0, %v316_v29  ;;  %439 = vst.msk [vmem:[#allocation2 + $0x178] sm:$0xf] %vm343_vm0, %v317_v30  ;;  %v319_v32 = vld [vmem:[%s4123_s20 + $0x180] sm:$0xf] }
  0x52   : > { %440 = vst.msk [vmem:[#allocation2 + $0x17c] sm:$0x3] %vm347_vm1, %v318_v31  ;;  %v320_v33 = vld [vmem:[%s4123_s20 + $0x184] sm:$0xf]  ;;  %v321_v34 = vld [vmem:[%s4123_s20 + $0x188] sm:$0xf] }
  0x53   : > { %441 = vst.msk [vmem:[#allocation2 + $0x180] sm:$0xf] %vm343_vm0, %v319_v32  ;;  %442 = vst.msk [vmem:[#allocation2 + $0x184] sm:$0xf] %vm343_vm0, %v320_v33  ;;  %v322_v35 = vld [vmem:[%s4123_s20 + $0x18c] sm:$0x3] }
  0x54   : > { %443 = vst.msk [vmem:[#allocation2 + $0x188] sm:$0xf] %vm343_vm0, %v321_v34  ;;  %v323_v36 = vld [vmem:[%s4123_s20 + $0x190] sm:$0xf]  ;;  %v324_v37 = vld [vmem:[%s4123_s20 + $0x194] sm:$0xf] }
  0x55   : > { %444 = vst.msk [vmem:[#allocation2 + $0x18c] sm:$0x3] %vm347_vm1, %v322_v35  ;;  %v325_v38 = vld [vmem:[%s4123_s20 + $0x198] sm:$0xf]  ;;  %v326_v39 = vld [vmem:[%s4123_s20 + $0x19c] sm:$0x3] }
  0x56   : > { %445 = vst.msk [vmem:[#allocation2 + $0x190] sm:$0xf] %vm343_vm0, %v323_v36  ;;  %446 = vst.msk [vmem:[#allocation2 + $0x194] sm:$0xf] %vm343_vm0, %v324_v37  ;;  %v327_v40 = vld [vmem:[%s4123_s20 + $0x1a0] sm:$0xf] }
  0x57   : > { %447 = vst.msk [vmem:[#allocation2 + $0x198] sm:$0xf] %vm343_vm0, %v325_v38  ;;  %449 = vst.msk [vmem:[#allocation2 + $0x1a0] sm:$0xf] %vm343_vm0, %v327_v40  ;;  %v328_v41 = vld [vmem:[%s4123_s20 + $0x1a4] sm:$0xf] }
  0x58   : > { %448 = vst.msk [vmem:[#allocation2 + $0x19c] sm:$0x3] %vm347_vm1, %v326_v39  ;;  %v329_v42 = vld [vmem:[%s4123_s20 + $0x1a8] sm:$0xf]  ;;  %v330_v43 = vld [vmem:[%s4123_s20 + $0x1ac] sm:$0x3] }
  0x59   : > { %450 = vst.msk [vmem:[#allocation2 + $0x1a4] sm:$0xf] %vm343_vm0, %v328_v41  ;;  %451 = vst.msk [vmem:[#allocation2 + $0x1a8] sm:$0xf] %vm343_vm0, %v329_v42  ;;  %v331_v44 = vld [vmem:[%s4123_s20 + $0x1b0] sm:$0xf] }
  0x5a   : > { %452 = vst.msk [vmem:[#allocation2 + $0x1ac] sm:$0x3] %vm347_vm1, %v330_v43  ;;  %v332_v45 = vld [vmem:[%s4123_s20 + $0x1b4] sm:$0xf]  ;;  %v333_v46 = vld [vmem:[%s4123_s20 + $0x1b8] sm:$0xf] }
  0x5b   : > { %453 = vst.msk [vmem:[#allocation2 + $0x1b0] sm:$0xf] %vm343_vm0, %v331_v44  ;;  %454 = vst.msk [vmem:[#allocation2 + $0x1b4] sm:$0xf] %vm343_vm0, %v332_v45  ;;  %v334_v47 = vld [vmem:[%s4123_s20 + $0x1bc] sm:$0x3] }
  0x5c   : > { %455 = vst.msk [vmem:[#allocation2 + $0x1b8] sm:$0xf] %vm343_vm0, %v333_v46  ;;  %v335_v48 = vld [vmem:[%s4123_s20 + $0x1c0] sm:$0xf]  ;;  %v336_v49 = vld [vmem:[%s4123_s20 + $0x1c4] sm:$0xf] }
  0x5d   : > { %456 = vst.msk [vmem:[#allocation2 + $0x1bc] sm:$0x3] %vm347_vm1, %v334_v47  ;;  %v337_v50 = vld [vmem:[%s4123_s20 + $0x1c8] sm:$0xf]  ;;  %v338_v51 = vld [vmem:[%s4123_s20 + $0x1cc] sm:$0x3] }
  0x5e   : > { %457 = vst.msk [vmem:[#allocation2 + $0x1c0] sm:$0xf] %vm343_vm0, %v335_v48  ;;  %458 = vst.msk [vmem:[#allocation2 + $0x1c4] sm:$0xf] %vm343_vm0, %v336_v49  ;;  %v339_v52 = vld [vmem:[%s4123_s20 + $0x1d0] sm:$0xf] }
  0x5f   : > { %459 = vst.msk [vmem:[#allocation2 + $0x1c8] sm:$0xf] %vm343_vm0, %v337_v50  ;;  %461 = vst.msk [vmem:[#allocation2 + $0x1d0] sm:$0xf] %vm343_vm0, %v339_v52  ;;  %v340_v53 = vld [vmem:[%s4123_s20 + $0x1d4] sm:$0xf] }
  0x60   : > { %460 = vst.msk [vmem:[#allocation2 + $0x1cc] sm:$0x3] %vm347_vm1, %v338_v51  ;;  %v341_v54 = vld [vmem:[%s4123_s20 + $0x1d8] sm:$0xf]  ;;  %v342_v55 = vld [vmem:[%s4123_s20 + $0x1dc] sm:$0x3] }
  0x61   : > { %462 = vst.msk [vmem:[#allocation2 + $0x1d4] sm:$0xf] %vm343_vm0, %v340_v53  ;;  %463 = vst.msk [vmem:[#allocation2 + $0x1d8] sm:$0xf] %vm343_vm0, %v341_v54  ;;  %v465_v56 = vld [vmem:[%s4123_s20] sm:$0xf] }
  0x62   : > { %464 = vst.msk [vmem:[#allocation2 + $0x1dc] sm:$0x3] %vm347_vm1, %v342_v55  ;;  %v466_v57 = vld [vmem:[%s4123_s20 + $0x4] sm:$0xf]  ;;  %v467_v58 = vld [vmem:[%s4123_s20 + $0x8] sm:$0xf] }
  0x63   : > { %v589_v59 = vshrl.u32 %v465_v56, 16  ;;  %v592_v60 = vshll.u32 %v465_v56, 16  ;;  %v598_v61 = vshll.u32 %v466_v57, 16  ;;  %v602_v62 = vshrl.u32 %v466_v57, 16  ;;  %v468_v63 = vld [vmem:[%s4123_s20 + $0xc] sm:$0x7] }
  0x64   : > { %v608_v0 = vshll.u32 %v467_v58, 16  ;;  %v612_v1 = vshrl.u32 %v467_v58, 16  ;;  %v618_v2 = vshll.u32 %v468_v63, 16  ;;  %v622_v3 = vshrl.u32 %v468_v63, 16  ;;  %v469_v4 = vld [vmem:[%s4123_s20 + $0x10] sm:$0xf] }
  0x65   : > { %v591_v5 = vrot.slane %v589_v59, 4  ;;  %v594_v6 = vrot.slane %v592_v60, 5  ;;  %v600_v7 = vrot.slane %v598_v61, 5  ;;  %v604_v8 = vrot.slane %v602_v62, 4  ;;  %v470_v9 = vld [vmem:[%s4123_s20 + $0x14] sm:$0xf] }
  0x66   : > { %v610_v10 = vrot.slane %v608_v0, 5  ;;  %v614_v11 = vrot.slane %v612_v1, 4  ;;  %v620_v12 = vrot.slane %v618_v2, 5  ;;  %v624_v13 = vrot.slane %v622_v3, 4  ;;  %v471_v23 = vld [vmem:[%s4123_s20 + $0x18] sm:$0xf] }
  0x67   : > { %v595_v14 = vor.u32 %v594_v6, %v591_v5  ;;  %v605_v15 = vor.u32 %v604_v8, %v600_v7  ;;  %v628_v16 = vshrl.u32 %v469_v4, 16  ;;  %v631_v17 = vshll.u32 %v469_v4, 16  ;;  %v472_v28 = vld [vmem:[%s4123_s20 + $0x1c] sm:$0x7]  ;;  %v473_v33 = vld [vmem:[%s4123_s20 + $0x20] sm:$0xf] }
  0x68   : > { %v615_v19 = vor.u32 %v614_v11, %v610_v10  ;;  %v625_v20 = vor.u32 %v624_v13, %v620_v12  ;;  %v637_v21 = vshll.u32 %v470_v9, 16  ;;  %v641_v22 = vshrl.u32 %v470_v9, 16  ;;  %v474_v42 = vld [vmem:[%s4123_s20 + $0x24] sm:$0xf]  ;;  %v475_v51 = vld [vmem:[%s4123_s20 + $0x28] sm:$0xf] }
  0x69   : > { %v596_v24 = vrot.slane %v595_v14, 4  ;;  %v606_v25 = vrot.slane %v605_v15, 4  ;;  %v630_v26 = vrot.slane %v628_v16, 4  ;;  %v633_v27 = vrot.slane %v631_v17, 5  ;;  %v476_v56 = vld [vmem:[%s4123_s20 + $0x2c] sm:$0x7] }
  0x6a   : > { %v616_v29 = vrot.slane %v615_v19, 4  ;;  %v626_v30 = vrot.slane %v625_v20, 4  ;;  %v639_v31 = vrot.slane %v637_v21, 5  ;;  %v643_v32 = vrot.slane %v641_v22, 4  ;;  %v477_v5 = vld [vmem:[%s4123_s20 + $0x30] sm:$0xf] }
  0x6b   : > { %v601_v34 = vsel %vm4378_vm4, %v596_v24, %v600_v7  ;;  %v611_v35 = vsel %vm4378_vm4, %v606_v25, %v610_v10  ;;  %v634_v36 = vor.u32 %v633_v27, %v630_v26  ;;  %v647_v37 = vshll.u32 %v471_v23, 16  ;;  %v478_v10 = vld [vmem:[%s4123_s20 + $0x34] sm:$0xf]  ;;  %v479_v20 = vld [vmem:[%s4123_s20 + $0x38] sm:$0xf] }
  0x6c   : > { %1879 = vst.msk [vmem:[#allocation2 + $0x1e0] sm:$0xf] %vm343_vm0, %v601_v34  ;;  %1880 = vst.msk [vmem:[#allocation2 + $0x1e4] sm:$0xf] %vm343_vm0, %v611_v35  ;;  %v621_v38 = vsel %vm4378_vm4, %v616_v29, %v620_v12  ;;  %v644_v39 = vor.u32 %v643_v32, %v639_v31  ;;  %v651_v40 = vshrl.u32 %v471_v23, 16  ;;  %v657_v41 = vshll.u32 %v472_v28, 16 }
  0x6d   : > { %1882 = vst.msk [vmem:[#allocation2 + $0x1ec] sm:$0x3] %vm347_vm1, %v626_v30  ;;  %v635_v43 = vrot.slane %v634_v36, 4  ;;  %v649_v44 = vrot.slane %v647_v37, 5  ;;  %v661_v45 = vshrl.u32 %v472_v28, 16  ;;  %v667_v46 = vshrl.u32 %v473_v33, 16 }
  0x6e   : > { %1881 = vst.msk [vmem:[#allocation2 + $0x1e8] sm:$0xf] %vm343_vm0, %v621_v38  ;;  %v645_v47 = vrot.slane %v644_v39, 4  ;;  %v653_v48 = vrot.slane %v651_v40, 4  ;;  %v659_v49 = vrot.slane %v657_v41, 5  ;;  %v670_v50 = vshll.u32 %v473_v33, 16 }
  0x6f   : > { %v640_v52 = vsel %vm4378_vm4, %v635_v43, %v639_v31  ;;  %v663_v53 = vrot.slane %v661_v45, 4  ;;  %v669_v54 = vrot.slane %v667_v46, 4  ;;  %v676_v55 = vshll.u32 %v474_v42, 16  ;;  %v480_v29 = vld [vmem:[%s4123_s20 + $0x3c] sm:$0x7] }
  0x70   : > { %1883 = vst.msk [vmem:[#allocation2 + $0x1f0] sm:$0xf] %vm343_vm0, %v640_v52  ;;  %v650_v57 = vsel %vm4378_vm4, %v645_v47, %v649_v44  ;;  %v654_v58 = vor.u32 %v653_v48, %v649_v44  ;;  %v672_v59 = vrot.slane %v670_v50, 5  ;;  %v680_v60 = vshrl.u32 %v474_v42, 16  ;;  %v481_v34 = vld [vmem:[%s4123_s20 + $0x40] sm:$0xf] }
  0x71   : > { %1884 = vst.msk [vmem:[#allocation2 + $0x1f4] sm:$0xf] %vm343_vm0, %v650_v57  ;;  %v664_v61 = vor.u32 %v663_v53, %v659_v49  ;;  %v678_v62 = vrot.slane %v676_v55, 5  ;;  %v686_v63 = vshll.u32 %v475_v51, 16  ;;  %v690_v0 = vshrl.u32 %v475_v51, 16 }
  0x72   : > { %v655_v1 = vrot.slane %v654_v58, 4  ;;  %v673_v2 = vor.u32 %v672_v59, %v669_v54  ;;  %v682_v3 = vrot.slane %v680_v60, 4  ;;  %v696_v4 = vshll.u32 %v476_v56, 16  ;;  %v482_v39 = vld [vmem:[%s4123_s20 + $0x44] sm:$0xf] }
  0x73   : > { %v665_v6 = vrot.slane %v664_v61, 4  ;;  %v688_v7 = vrot.slane %v686_v63, 5  ;;  %v692_v8 = vrot.slane %v690_v0, 4  ;;  %v700_v9 = vshrl.u32 %v476_v56, 16  ;;  %v483_v52 = vld [vmem:[%s4123_s20 + $0x48] sm:$0xf] }
  0x74   : > { %v660_v11 = vsel %vm4378_vm4, %v655_v1, %v659_v49  ;;  %v674_v12 = vrot.slane %v673_v2, 4  ;;  %v683_v13 = vor.u32 %v682_v3, %v678_v62  ;;  %v698_v14 = vrot.slane %v696_v4, 5  ;;  %v484_v57 = vld [vmem:[%s4123_s20 + $0x4c] sm:$0x7]  ;;  %v485_v2 = vld [vmem:[%s4123_s20 + $0x50] sm:$0xf] }
  0x75   : > { %1885 = vst.msk [vmem:[#allocation2 + $0x1f8] sm:$0xf] %vm343_vm0, %v660_v11  ;;  %v693_v15 = vor.u32 %v692_v8, %v688_v7  ;;  %v702_v16 = vrot.slane %v700_v9, 4  ;;  %v706_v17 = vshrl.u32 %v477_v5, 16  ;;  %v709_v19 = vshll.u32 %v477_v5, 16 }
  0x76   : > { %1886 = vst.msk [vmem:[#allocation2 + $0x1fc] sm:$0x3] %vm347_vm1, %v665_v6  ;;  %v679_v21 = vsel %vm4378_vm4, %v674_v12, %v678_v62  ;;  %v684_v22 = vrot.slane %v683_v13, 4  ;;  %v715_v23 = vshll.u32 %v478_v10, 16  ;;  %v719_v24 = vshrl.u32 %v478_v10, 16 }
  0x77   : > { %1887 = vst.msk [vmem:[#allocation2 + $0x200] sm:$0xf] %vm343_vm0, %v679_v21  ;;  %v694_v25 = vrot.slane %v693_v15, 4  ;;  %v703_v26 = vor.u32 %v702_v16, %v698_v14  ;;  %v708_v27 = vrot.slane %v706_v17, 4  ;;  %v711_v28 = vrot.slane %v709_v19, 5 }
  0x78   : > { %v689_v30 = vsel %vm4378_vm4, %v684_v22, %v688_v7  ;;  %v717_v31 = vrot.slane %v715_v23, 5  ;;  %v721_v32 = vrot.slane %v719_v24, 4  ;;  %v725_v33 = vshll.u32 %v479_v20, 16  ;;  %v486_v7 = vld [vmem:[%s4123_s20 + $0x54] sm:$0xf] }
  0x79   : > { %1888 = vst.msk [vmem:[#allocation2 + $0x204] sm:$0xf] %vm343_vm0, %v689_v30  ;;  %v699_v35 = vsel %vm4378_vm4, %v694_v25, %v698_v14  ;;  %v704_v36 = vrot.slane %v703_v26, 4  ;;  %v712_v37 = vor.u32 %v711_v28, %v708_v27  ;;  %v729_v38 = vshrl.u32 %v479_v20, 16  ;;  %v487_v16 = vld [vmem:[%s4123_s20 + $0x58] sm:$0xf] }
  0x7a   : > { %1889 = vst.msk [vmem:[#allocation2 + $0x208] sm:$0xf] %vm343_vm0, %v699_v35  ;;  %v722_v40 = vor.u32 %v721_v32, %v717_v31  ;;  %v727_v41 = vrot.slane %v725_v33, 5  ;;  %v735_v42 = vshll.u32 %v480_v29, 16  ;;  %v739_v43 = vshrl.u32 %v480_v29, 16 }
  0x7b   : > { %1890 = vst.msk [vmem:[#allocation2 + $0x20c] sm:$0x3] %vm347_vm1, %v704_v36  ;;  %v713_v44 = vrot.slane %v712_v37, 4  ;;  %v731_v45 = vrot.slane %v729_v38, 4  ;;  %v745_v46 = vshrl.u32 %v481_v34, 16  ;;  %v748_v47 = vshll.u32 %v481_v34, 16 }
  0x7c   : > { %v723_v48 = vrot.slane %v722_v40, 4  ;;  %v737_v49 = vrot.slane %v735_v42, 5  ;;  %v741_v50 = vrot.slane %v739_v43, 4  ;;  %v754_v51 = vshll.u32 %v482_v39, 16  ;;  %v488_v26 = vld [vmem:[%s4123_s20 + $0x5c] sm:$0x7] }
  0x7d   : > { %v718_v53 = vsel %vm4378_vm4, %v713_v44, %v717_v31  ;;  %v732_v54 = vor.u32 %v731_v45, %v727_v41  ;;  %v747_v55 = vrot.slane %v745_v46, 4  ;;  %v750_v56 = vrot.slane %v748_v47, 5  ;;  %v489_v31 = vld [vmem:[%s4123_s20 + $0x60] sm:$0xf]  ;;  %v490_v36 = vld [vmem:[%s4123_s20 + $0x64] sm:$0xf] }
  0x7e   : > { %1891 = vst.msk [vmem:[#allocation2 + $0x210] sm:$0xf] %vm343_vm0, %v718_v53  ;;  %v728_v58 = vsel %vm4378_vm4, %v723_v48, %v727_v41  ;;  %v742_v59 = vor.u32 %v741_v50, %v737_v49  ;;  %v756_v60 = vrot.slane %v754_v51, 5  ;;  %v758_v61 = vshrl.u32 %v482_v39, 16 }
  0x7f   : > { %1892 = vst.msk [vmem:[#allocation2 + $0x214] sm:$0xf] %vm343_vm0, %v728_v58  ;;  %v733_v62 = vrot.slane %v732_v54, 4  ;;  %v751_v63 = vor.u32 %v750_v56, %v747_v55  ;;  %v764_v0 = vshll.u32 %v483_v52, 16  ;;  %v768_v1 = vshrl.u32 %v483_v52, 16 }
  0x80   : > { %v743_v3 = vrot.slane %v742_v59, 4  ;;  %v760_v4 = vrot.slane %v758_v61, 4  ;;  %v774_v5 = vshll.u32 %v484_v57, 16  ;;  %v778_v6 = vshrl.u32 %v484_v57, 16  ;;  %v492_v54 = vld [vmem:[%s4123_s20 + $0x6c] sm:$0x7] }
  0x81   : > { %v738_v8 = vsel %vm4378_vm4, %v733_v62, %v737_v49  ;;  %v752_v9 = vrot.slane %v751_v63, 4  ;;  %v766_v10 = vrot.slane %v764_v0, 5  ;;  %v770_v11 = vrot.slane %v768_v1, 4  ;;  %v491_v49 = vld [vmem:[%s4123_s20 + $0x68] sm:$0xf] }
  0x82   : > { %1893 = vst.msk [vmem:[#allocation2 + $0x218] sm:$0xf] %vm343_vm0, %v738_v8  ;;  %v761_v12 = vor.u32 %v760_v4, %v756_v60  ;;  %v776_v13 = vrot.slane %v774_v5, 5  ;;  %v780_v14 = vrot.slane %v778_v6, 4  ;;  %v784_v15 = vshrl.u32 %v485_v2, 16 }
  0x83   : > { %1894 = vst.msk [vmem:[#allocation2 + $0x21c] sm:$0x3] %vm347_vm1, %v743_v3  ;;  %v757_v17 = vsel %vm4378_vm4, %v752_v9, %v756_v60  ;;  %v771_v19 = vor.u32 %v770_v11, %v766_v10  ;;  %v787_v20 = vshll.u32 %v485_v2, 16  ;;  %v793_v21 = vshll.u32 %v486_v7, 16  ;;  %v493_v63 = vld [vmem:[%s4123_s20 + $0x70] sm:$0xf] }
  0x84   : > { %1895 = vst.msk [vmem:[#allocation2 + $0x220] sm:$0xf] %vm343_vm0, %v757_v17  ;;  %v762_v22 = vrot.slane %v761_v12, 4  ;;  %v781_v23 = vor.u32 %v780_v14, %v776_v13  ;;  %v786_v24 = vrot.slane %v784_v15, 4  ;;  %v797_v25 = vshrl.u32 %v486_v7, 16 }
  0x85   : > { %v772_v27 = vrot.slane %v771_v19, 4  ;;  %v789_v28 = vrot.slane %v787_v20, 5  ;;  %v795_v29 = vrot.slane %v793_v21, 5  ;;  %v803_v30 = vshll.u32 %v487_v16, 16  ;;  %v494_v4 = vld [vmem:[%s4123_s20 + $0x74] sm:$0xf] }
  0x86   : > { %v767_v32 = vsel %vm4378_vm4, %v762_v22, %v766_v10  ;;  %v782_v33 = vrot.slane %v781_v23, 4  ;;  %v799_v34 = vrot.slane %v797_v25, 4  ;;  %v807_v35 = vshrl.u32 %v487_v16, 16  ;;  %v495_v17 = vld [vmem:[%s4123_s20 + $0x78] sm:$0xf] }
  0x87   : > { %1896 = vst.msk [vmem:[#allocation2 + $0x224] sm:$0xf] %vm343_vm0, %v767_v32  ;;  %v777_v37 = vsel %vm4378_vm4, %v772_v27, %v776_v13  ;;  %v790_v38 = vor.u32 %v789_v28, %v786_v24  ;;  %v805_v39 = vrot.slane %v803_v30, 5  ;;  %v813_v40 = vshll.u32 %v488_v26, 16  ;;  %v496_v23 = vld [vmem:[%s4123_s20 + $0x7c] sm:$0x7] }
  0x88   : > { %1897 = vst.msk [vmem:[#allocation2 + $0x228] sm:$0xf] %vm343_vm0, %v777_v37  ;;  %v800_v41 = vor.u32 %v799_v34, %v795_v29  ;;  %v809_v42 = vrot.slane %v807_v35, 4  ;;  %v817_v43 = vshrl.u32 %v488_v26, 16  ;;  %v823_v44 = vshrl.u32 %v489_v31, 16 }
  0x89   : > { %1898 = vst.msk [vmem:[#allocation2 + $0x22c] sm:$0x3] %vm347_vm1, %v782_v33  ;;  %v791_v45 = vrot.slane %v790_v38, 4  ;;  %v815_v46 = vrot.slane %v813_v40, 5  ;;  %v826_v47 = vshll.u32 %v489_v31, 16  ;;  %v832_v48 = vshll.u32 %v490_v36, 16 }
  0x8a   : > { %v801_v50 = vrot.slane %v800_v41, 4  ;;  %v810_v51 = vor.u32 %v809_v42, %v805_v39  ;;  %v819_v52 = vrot.slane %v817_v43, 4  ;;  %v825_v53 = vrot.slane %v823_v44, 4  ;;  %v497_v32 = vld [vmem:[%s4123_s20 + $0x80] sm:$0xf] }
  0x8b   : > { %v796_v55 = vsel %vm4378_vm4, %v791_v45, %v795_v29  ;;  %v828_v56 = vrot.slane %v826_v47, 5  ;;  %v834_v57 = vrot.slane %v832_v48, 5  ;;  %v836_v58 = vshrl.u32 %v490_v36, 16  ;;  %v498_v37 = vld [vmem:[%s4123_s20 + $0x84] sm:$0xf] }
  0x8c   : > { %1899 = vst.msk [vmem:[#allocation2 + $0x230] sm:$0xf] %vm343_vm0, %v796_v55  ;;  %v806_v59 = vsel %vm4378_vm4, %v801_v50, %v805_v39  ;;  %v811_v60 = vrot.slane %v810_v51, 4  ;;  %v820_v61 = vor.u32 %v819_v52, %v815_v46  ;;  %v842_v62 = vshll.u32 %v491_v49, 16  ;;  %v499_v50 = vld [vmem:[%s4123_s20 + $0x88] sm:$0xf] }
  0x8d   : > { %1900 = vst.msk [vmem:[#allocation2 + $0x234] sm:$0xf] %vm343_vm0, %v806_v59  ;;  %v829_v0 = vor.u32 %v828_v56, %v825_v53  ;;  %v838_v1 = vrot.slane %v836_v58, 4  ;;  %v846_v2 = vshrl.u32 %v491_v49, 16  ;;  %v852_v3 = vshll.u32 %v492_v54, 16 }
  0x8e   : > { %v816_v5 = vsel %vm4378_vm4, %v811_v60, %v815_v46  ;;  %v821_v6 = vrot.slane %v820_v61, 4  ;;  %v844_v7 = vrot.slane %v842_v62, 5  ;;  %v856_v8 = vshrl.u32 %v492_v54, 16  ;;  %v500_v55 = vld [vmem:[%s4123_s20 + $0x8c] sm:$0x7] }
  0x8f   : > { %1901 = vst.msk [vmem:[#allocation2 + $0x238] sm:$0xf] %vm343_vm0, %v816_v5  ;;  %v830_v9 = vrot.slane %v829_v0, 4  ;;  %v839_v10 = vor.u32 %v838_v1, %v834_v57  ;;  %v848_v11 = vrot.slane %v846_v2, 4  ;;  %v854_v12 = vrot.slane %v852_v3, 5 }
  0x90   : > { %1902 = vst.msk [vmem:[#allocation2 + $0x23c] sm:$0x3] %vm347_vm1, %v821_v6  ;;  %v858_v13 = vrot.slane %v856_v8, 4  ;;  %v862_v14 = vshrl.u32 %v493_v63, 16  ;;  %v865_v15 = vshll.u32 %v493_v63, 16  ;;  %v871_v16 = vshll.u32 %v494_v4, 16 }
  0x91   : > { %v835_v19 = vsel %vm4378_vm4, %v830_v9, %v834_v57  ;;  %v840_v20 = vrot.slane %v839_v10, 4  ;;  %v849_v21 = vor.u32 %v848_v11, %v844_v7  ;;  %v875_v22 = vshrl.u32 %v494_v4, 16  ;;  %v501_v0 = vld [vmem:[%s4123_s20 + $0x90] sm:$0xf]  ;;  %v502_v5 = vld [vmem:[%s4123_s20 + $0x94] sm:$0xf] }
  0x92   : > { %1903 = vst.msk [vmem:[#allocation2 + $0x240] sm:$0xf] %vm343_vm0, %v835_v19  ;;  %v859_v24 = vor.u32 %v858_v13, %v854_v12  ;;  %v864_v25 = vrot.slane %v862_v14, 4  ;;  %v867_v26 = vrot.slane %v865_v15, 5  ;;  %v873_v27 = vrot.slane %v871_v16, 5 }
  0x93   : > { %v845_v28 = vsel %vm4378_vm4, %v840_v20, %v844_v7  ;;  %v850_v29 = vrot.slane %v849_v21, 4  ;;  %v877_v30 = vrot.slane %v875_v22, 4  ;;  %v881_v31 = vshll.u32 %v495_v17, 16  ;;  %v503_v19 = vld [vmem:[%s4123_s20 + $0x98] sm:$0xf] }
  0x94   : > { %1904 = vst.msk [vmem:[#allocation2 + $0x244] sm:$0xf] %vm343_vm0, %v845_v28  ;;  %v860_v33 = vrot.slane %v859_v24, 4  ;;  %v868_v34 = vor.u32 %v867_v26, %v864_v25  ;;  %v885_v35 = vshrl.u32 %v495_v17, 16  ;;  %v891_v36 = vshll.u32 %v496_v23, 16 }
  0x95   : > { %v855_v38 = vsel %vm4378_vm4, %v850_v29, %v854_v12  ;;  %v878_v39 = vor.u32 %v877_v30, %v873_v27  ;;  %v883_v40 = vrot.slane %v881_v31, 5  ;;  %v895_v41 = vshrl.u32 %v496_v23, 16  ;;  %v504_v24 = vld [vmem:[%s4123_s20 + $0x9c] sm:$0x7]  ;;  %v505_v29 = vld [vmem:[%s4123_s20 + $0xa0] sm:$0xf] }
  0x96   : > { %1905 = vst.msk [vmem:[#allocation2 + $0x248] sm:$0xf] %vm343_vm0, %v855_v38  ;;  %v869_v42 = vrot.slane %v868_v34, 4  ;;  %v887_v43 = vrot.slane %v885_v35, 4  ;;  %v893_v44 = vrot.slane %v891_v36, 5  ;;  %v901_v45 = vshrl.u32 %v497_v32, 16 }
  0x97   : > { %1906 = vst.msk [vmem:[#allocation2 + $0x24c] sm:$0x3] %vm347_vm1, %v860_v33  ;;  %v879_v46 = vrot.slane %v878_v39, 4  ;;  %v897_v47 = vrot.slane %v895_v41, 4  ;;  %v904_v48 = vshll.u32 %v497_v32, 16  ;;  %v910_v49 = vshll.u32 %v498_v37, 16 }
  0x98   : > { %v874_v51 = vsel %vm4378_vm4, %v869_v42, %v873_v27  ;;  %v888_v52 = vor.u32 %v887_v43, %v883_v40  ;;  %v903_v53 = vrot.slane %v901_v45, 4  ;;  %v914_v54 = vshrl.u32 %v498_v37, 16  ;;  %v506_v38 = vld [vmem:[%s4123_s20 + $0xa4] sm:$0xf] }
  0x99   : > { %1907 = vst.msk [vmem:[#allocation2 + $0x250] sm:$0xf] %vm343_vm0, %v874_v51  ;;  %v884_v56 = vsel %vm4378_vm4, %v879_v46, %v883_v40  ;;  %v898_v57 = vor.u32 %v897_v47, %v893_v44  ;;  %v906_v58 = vrot.slane %v904_v48, 5  ;;  %v912_v59 = vrot.slane %v910_v49, 5  ;;  %v507_v47 = vld [vmem:[%s4123_s20 + $0xa8] sm:$0xf] }
  0x9a   : > { %1908 = vst.msk [vmem:[#allocation2 + $0x254] sm:$0xf] %vm343_vm0, %v884_v56  ;;  %v889_v60 = vrot.slane %v888_v52, 4  ;;  %v916_v61 = vrot.slane %v914_v54, 4  ;;  %v920_v62 = vshll.u32 %v499_v50, 16  ;;  %v924_v63 = vshrl.u32 %v499_v50, 16 }
  0x9b   : > { %v899_v1 = vrot.slane %v898_v57, 4  ;;  %v907_v2 = vor.u32 %v906_v58, %v903_v53  ;;  %v930_v3 = vshll.u32 %v500_v55, 16  ;;  %v934_v4 = vshrl.u32 %v500_v55, 16  ;;  %v508_v56 = vld [vmem:[%s4123_s20 + $0xac] sm:$0x7] }
  0x9c   : > { %v894_v6 = vsel %vm4378_vm4, %v889_v60, %v893_v44  ;;  %v917_v7 = vor.u32 %v916_v61, %v912_v59  ;;  %v922_v8 = vrot.slane %v920_v62, 5  ;;  %v926_v9 = vrot.slane %v924_v63, 4  ;;  %v509_v61 = vld [vmem:[%s4123_s20 + $0xb0] sm:$0xf] }
  0x9d   : > { %1909 = vst.msk [vmem:[#allocation2 + $0x258] sm:$0xf] %vm343_vm0, %v894_v6  ;;  %v908_v10 = vrot.slane %v907_v2, 4  ;;  %v932_v11 = vrot.slane %v930_v3, 5  ;;  %v936_v12 = vrot.slane %v934_v4, 4  ;;  %v940_v13 = vshrl.u32 %v501_v0, 16 }
  0x9e   : > { %1910 = vst.msk [vmem:[#allocation2 + $0x25c] sm:$0x3] %vm347_vm1, %v899_v1  ;;  %v918_v14 = vrot.slane %v917_v7, 4  ;;  %v927_v15 = vor.u32 %v926_v9, %v922_v8  ;;  %v943_v16 = vshll.u32 %v501_v0, 16  ;;  %v949_v17 = vshll.u32 %v502_v5, 16 }
  0x9f   : > { %v913_v20 = vsel %vm4378_vm4, %v908_v10, %v912_v59  ;;  %v937_v21 = vor.u32 %v936_v12, %v932_v11  ;;  %v942_v22 = vrot.slane %v940_v13, 4  ;;  %v953_v23 = vshrl.u32 %v502_v5, 16  ;;  %v510_v2 = vld [vmem:[%s4123_s20 + $0xb4] sm:$0xf] }
  0xa0   : > { %1911 = vst.msk [vmem:[#allocation2 + $0x260] sm:$0xf] %vm343_vm0, %v913_v20  ;;  %v923_v25 = vsel %vm4378_vm4, %v918_v14, %v922_v8  ;;  %v928_v26 = vrot.slane %v927_v15, 4  ;;  %v945_v27 = vrot.slane %v943_v16, 5  ;;  %v951_v28 = vrot.slane %v949_v17, 5 }
  0xa1   : > { %1912 = vst.msk [vmem:[#allocation2 + $0x264] sm:$0xf] %vm343_vm0, %v923_v25  ;;  %v938_v30 = vrot.slane %v937_v21, 4  ;;  %v955_v31 = vrot.slane %v953_v23, 4  ;;  %v959_v32 = vshll.u32 %v503_v19, 16  ;;  %v963_v33 = vshrl.u32 %v503_v19, 16 }
  0xa2   : > { %v933_v34 = vsel %vm4378_vm4, %v928_v26, %v932_v11  ;;  %v946_v35 = vor.u32 %v945_v27, %v942_v22  ;;  %v969_v36 = vshll.u32 %v504_v24, 16  ;;  %v973_v37 = vshrl.u32 %v504_v24, 16  ;;  %v511_v15 = vld [vmem:[%s4123_s20 + $0xb8] sm:$0xf]  ;;  %v512_v21 = vld [vmem:[%s4123_s20 + $0xbc] sm:$0x7] }
  0xa3   : > { %1913 = vst.msk [vmem:[#allocation2 + $0x268] sm:$0xf] %vm343_vm0, %v933_v34  ;;  %v956_v39 = vor.u32 %v955_v31, %v951_v28  ;;  %v961_v40 = vrot.slane %v959_v32, 5  ;;  %v965_v41 = vrot.slane %v963_v33, 4  ;;  %v979_v42 = vshrl.u32 %v505_v29, 16 }
  0xa4   : > { %1914 = vst.msk [vmem:[#allocation2 + $0x26c] sm:$0x3] %vm347_vm1, %v938_v30  ;;  %v947_v43 = vrot.slane %v946_v35, 4  ;;  %v971_v44 = vrot.slane %v969_v36, 5  ;;  %v975_v45 = vrot.slane %v973_v37, 4  ;;  %v982_v46 = vshll.u32 %v505_v29, 16 }
  0xa5   : > { %v957_v48 = vrot.slane %v956_v39, 4  ;;  %v966_v49 = vor.u32 %v965_v41, %v961_v40  ;;  %v981_v50 = vrot.slane %v979_v42, 4  ;;  %v988_v51 = vshll.u32 %v506_v38, 16  ;;  %v513_v30 = vld [vmem:[%s4123_s20 + $0xc0] sm:$0xf] }
  0xa6   : > { %v952_v52 = vsel %vm4378_vm4, %v947_v43, %v951_v28  ;;  %v976_v53 = vor.u32 %v975_v45, %v971_v44  ;;  %v984_v54 = vrot.slane %v982_v46, 5  ;;  %v992_v55 = vshrl.u32 %v506_v38, 16  ;;  %v514_v35 = vld [vmem:[%s4123_s20 + $0xc4] sm:$0xf] }
  0xa7   : > { %1915 = vst.msk [vmem:[#allocation2 + $0x270] sm:$0xf] %vm343_vm0, %v952_v52  ;;  %v962_v57 = vsel %vm4378_vm4, %v957_v48, %v961_v40  ;;  %v967_v58 = vrot.slane %v966_v49, 4  ;;  %v990_v59 = vrot.slane %v988_v51, 5  ;;  %v998_v60 = vshll.u32 %v507_v47, 16 }
  0xa8   : > { %1916 = vst.msk [vmem:[#allocation2 + $0x274] sm:$0xf] %vm343_vm0, %v962_v57  ;;  %v977_v62 = vrot.slane %v976_v53, 4  ;;  %v985_v63 = vor.u32 %v984_v54, %v981_v50  ;;  %v994_v0 = vrot.slane %v992_v55, 4  ;;  %v1002_v1 = vshrl.u32 %v507_v47, 16 }
  0xa9   : > { %v972_v3 = vsel %vm4378_vm4, %v967_v58, %v971_v44  ;;  %v1000_v4 = vrot.slane %v998_v60, 5  ;;  %v1008_v5 = vshll.u32 %v508_v56, 16  ;;  %v1012_v6 = vshrl.u32 %v508_v56, 16  ;;  %v515_v48 = vld [vmem:[%s4123_s20 + $0xc8] sm:$0xf] }
  0xaa   : > { %1917 = vst.msk [vmem:[#allocation2 + $0x278] sm:$0xf] %vm343_vm0, %v972_v3  ;;  %v986_v7 = vrot.slane %v985_v63, 4  ;;  %v995_v8 = vor.u32 %v994_v0, %v990_v59  ;;  %v1004_v9 = vrot.slane %v1002_v1, 4  ;;  %v1018_v10 = vshrl.u32 %v509_v61, 16 }
  0xab   : > { %1918 = vst.msk [vmem:[#allocation2 + $0x27c] sm:$0x3] %vm347_vm1, %v977_v62  ;;  %v1010_v11 = vrot.slane %v1008_v5, 5  ;;  %v1014_v12 = vrot.slane %v1012_v6, 4  ;;  %v1021_v13 = vshll.u32 %v509_v61, 16  ;;  %v1027_v14 = vshll.u32 %v510_v2, 16 }
  0xac   : > { %v991_v16 = vsel %vm4378_vm4, %v986_v7, %v990_v59  ;;  %v996_v17 = vrot.slane %v995_v8, 4  ;;  %v1005_v19 = vor.u32 %v1004_v9, %v1000_v4  ;;  %v1020_v20 = vrot.slane %v1018_v10, 4  ;;  %v516_v53 = vld [vmem:[%s4123_s20 + $0xcc] sm:$0x7]  ;;  %v517_v62 = vld [vmem:[%s4123_s20 + $0xd0] sm:$0xf] }
  0xad   : > { %1919 = vst.msk [vmem:[#allocation2 + $0x280] sm:$0xf] %vm343_vm0, %v991_v16  ;;  %v1015_v22 = vor.u32 %v1014_v12, %v1010_v11  ;;  %v1023_v23 = vrot.slane %v1021_v13, 5  ;;  %v1029_v24 = vrot.slane %v1027_v14, 5  ;;  %v1031_v25 = vshrl.u32 %v510_v2, 16 }
  0xae   : > { %v1001_v26 = vsel %vm4378_vm4, %v996_v17, %v1000_v4  ;;  %v1006_v27 = vrot.slane %v1005_v19, 4  ;;  %v1037_v28 = vshll.u32 %v511_v15, 16  ;;  %v1041_v29 = vshrl.u32 %v511_v15, 16  ;;  %v518_v3 = vld [vmem:[%s4123_s20 + $0xd4] sm:$0xf] }
  0xaf   : > { %1920 = vst.msk [vmem:[#allocation2 + $0x284] sm:$0xf] %vm343_vm0, %v1001_v26  ;;  %v1016_v31 = vrot.slane %v1015_v22, 4  ;;  %v1024_v32 = vor.u32 %v1023_v23, %v1020_v20  ;;  %v1033_v33 = vrot.slane %v1031_v25, 4  ;;  %v1047_v34 = vshll.u32 %v512_v21, 16 }
  0xb0   : > { %v1011_v36 = vsel %vm4378_vm4, %v1006_v27, %v1010_v11  ;;  %v1039_v37 = vrot.slane %v1037_v28, 5  ;;  %v1043_v38 = vrot.slane %v1041_v29, 4  ;;  %v1051_v39 = vshrl.u32 %v512_v21, 16  ;;  %v519_v16 = vld [vmem:[%s4123_s20 + $0xd8] sm:$0xf] }
  0xb1   : > { %1921 = vst.msk [vmem:[#allocation2 + $0x288] sm:$0xf] %vm343_vm0, %v1011_v36  ;;  %v1025_v40 = vrot.slane %v1024_v32, 4  ;;  %v1034_v41 = vor.u32 %v1033_v33, %v1029_v24  ;;  %v1049_v42 = vrot.slane %v1047_v34, 5  ;;  %v1057_v43 = vshrl.u32 %v513_v30, 16 }
  0xb2   : > { %1922 = vst.msk [vmem:[#allocation2 + $0x28c] sm:$0x3] %vm347_vm1, %v1016_v31  ;;  %v1044_v44 = vor.u32 %v1043_v38, %v1039_v37  ;;  %v1053_v45 = vrot.slane %v1051_v39, 4  ;;  %v1060_v46 = vshll.u32 %v513_v30, 16  ;;  %v1066_v47 = vshll.u32 %v514_v35, 16 }
  0xb3   : > { %v1030_v49 = vsel %vm4378_vm4, %v1025_v40, %v1029_v24  ;;  %v1035_v50 = vrot.slane %v1034_v41, 4  ;;  %v1059_v51 = vrot.slane %v1057_v43, 4  ;;  %v1070_v52 = vshrl.u32 %v514_v35, 16  ;;  %v520_v22 = vld [vmem:[%s4123_s20 + $0xdc] sm:$0x7] }
  0xb4   : > { %1923 = vst.msk [vmem:[#allocation2 + $0x290] sm:$0xf] %vm343_vm0, %v1030_v49  ;;  %v1045_v54 = vrot.slane %v1044_v44, 4  ;;  %v1054_v55 = vor.u32 %v1053_v45, %v1049_v42  ;;  %v1062_v56 = vrot.slane %v1060_v46, 5  ;;  %v1068_v57 = vrot.slane %v1066_v47, 5 }
  0xb5   : > { %v1040_v58 = vsel %vm4378_vm4, %v1035_v50, %v1039_v37  ;;  %v1072_v59 = vrot.slane %v1070_v52, 4  ;;  %v1076_v60 = vshll.u32 %v515_v48, 16  ;;  %v1080_v61 = vshrl.u32 %v515_v48, 16  ;;  %v521_v31 = vld [vmem:[%s4123_s20 + $0xe0] sm:$0xf] }
  0xb6   : > { %1924 = vst.msk [vmem:[#allocation2 + $0x294] sm:$0xf] %vm343_vm0, %v1040_v58  ;;  %v1050_v63 = vsel %vm4378_vm4, %v1045_v54, %v1049_v42  ;;  %v1055_v0 = vrot.slane %v1054_v55, 4  ;;  %v1063_v1 = vor.u32 %v1062_v56, %v1059_v51  ;;  %v1086_v2 = vshll.u32 %v516_v53, 16  ;;  %v522_v36 = vld [vmem:[%s4123_s20 + $0xe4] sm:$0xf] }
  0xb7   : > { %1925 = vst.msk [vmem:[#allocation2 + $0x298] sm:$0xf] %vm343_vm0, %v1050_v63  ;;  %v1073_v4 = vor.u32 %v1072_v59, %v1068_v57  ;;  %v1078_v5 = vrot.slane %v1076_v60, 5  ;;  %v1082_v6 = vrot.slane %v1080_v61, 4  ;;  %v1090_v7 = vshrl.u32 %v516_v53, 16 }
  0xb8   : > { %1926 = vst.msk [vmem:[#allocation2 + $0x29c] sm:$0x3] %vm347_vm1, %v1055_v0  ;;  %v1064_v8 = vrot.slane %v1063_v1, 4  ;;  %v1088_v9 = vrot.slane %v1086_v2, 5  ;;  %v1096_v10 = vshrl.u32 %v517_v62, 16  ;;  %v1099_v11 = vshll.u32 %v517_v62, 16 }
  0xb9   : > { %v1074_v12 = vrot.slane %v1073_v4, 4  ;;  %v1083_v13 = vor.u32 %v1082_v6, %v1078_v5  ;;  %v1092_v14 = vrot.slane %v1090_v7, 4  ;;  %v1105_v15 = vshll.u32 %v518_v3, 16  ;;  %v523_v45 = vld [vmem:[%s4123_s20 + $0xe8] sm:$0xf] }
  0xba   : > { %v1069_v17 = vsel %vm4378_vm4, %v1064_v8, %v1068_v57  ;;  %v1098_v19 = vrot.slane %v1096_v10, 4  ;;  %v1101_v20 = vrot.slane %v1099_v11, 5  ;;  %v1109_v21 = vshrl.u32 %v518_v3, 16  ;;  %v524_v54 = vld [vmem:[%s4123_s20 + $0xec] sm:$0x7] }
  0xbb   : > { %1927 = vst.msk [vmem:[#allocation2 + $0x2a0] sm:$0xf] %vm343_vm0, %v1069_v17  ;;  %v1079_v23 = vsel %vm4378_vm4, %v1074_v12, %v1078_v5  ;;  %v1084_v24 = vrot.slane %v1083_v13, 4  ;;  %v1093_v25 = vor.u32 %v1092_v14, %v1088_v9  ;;  %v1107_v26 = vrot.slane %v1105_v15, 5  ;;  %v525_v59 = vld [vmem:[%s4123_s20 + $0xf0] sm:$0xf] }
  0xbc   : > { %1928 = vst.msk [vmem:[#allocation2 + $0x2a4] sm:$0xf] %vm343_vm0, %v1079_v23  ;;  %v1102_v27 = vor.u32 %v1101_v20, %v1098_v19  ;;  %v1111_v28 = vrot.slane %v1109_v21, 4  ;;  %v1115_v29 = vshll.u32 %v519_v16, 16  ;;  %v1119_v30 = vshrl.u32 %v519_v16, 16 }
  0xbd   : > { %v1089_v32 = vsel %vm4378_vm4, %v1084_v24, %v1088_v9  ;;  %v1094_v33 = vrot.slane %v1093_v25, 4  ;;  %v1125_v34 = vshll.u32 %v520_v22, 16  ;;  %v1129_v35 = vshrl.u32 %v520_v22, 16  ;;  %v526_v0 = vld [vmem:[%s4123_s20 + $0xf4] sm:$0xf] }
  0xbe   : > { %1929 = vst.msk [vmem:[#allocation2 + $0x2a8] sm:$0xf] %vm343_vm0, %v1089_v32  ;;  %v1103_v37 = vrot.slane %v1102_v27, 4  ;;  %v1112_v38 = vor.u32 %v1111_v28, %v1107_v26  ;;  %v1117_v39 = vrot.slane %v1115_v29, 5  ;;  %v1121_v40 = vrot.slane %v1119_v30, 4 }
  0xbf   : > { %1930 = vst.msk [vmem:[#allocation2 + $0x2ac] sm:$0x3] %vm347_vm1, %v1094_v33  ;;  %v1127_v41 = vrot.slane %v1125_v34, 5  ;;  %v1131_v42 = vrot.slane %v1129_v35, 4  ;;  %v1135_v43 = vshrl.u32 %v521_v31, 16  ;;  %v1138_v44 = vshll.u32 %v521_v31, 16 }
  0xc0   : > { %v1108_v46 = vsel %vm4378_vm4, %v1103_v37, %v1107_v26  ;;  %v1113_v47 = vrot.slane %v1112_v38, 4  ;;  %v1122_v48 = vor.u32 %v1121_v40, %v1117_v39  ;;  %v1144_v49 = vshll.u32 %v522_v36, 16  ;;  %v527_v13 = vld [vmem:[%s4123_s20 + $0xf8] sm:$0xf]  ;;  %v528_v19 = vld [vmem:[%s4123_s20 + $0xfc] sm:$0x7] }
  0xc1   : > { %1931 = vst.msk [vmem:[#allocation2 + $0x2b0] sm:$0xf] %vm343_vm0, %v1108_v46  ;;  %v1132_v50 = vor.u32 %v1131_v42, %v1127_v41  ;;  %v1137_v51 = vrot.slane %v1135_v43, 4  ;;  %v1140_v52 = vrot.slane %v1138_v44, 5  ;;  %v1148_v53 = vshrl.u32 %v522_v36, 16 }
  0xc2   : > { %v1118_v55 = vsel %vm4378_vm4, %v1113_v47, %v1117_v39  ;;  %v1123_v56 = vrot.slane %v1122_v48, 4  ;;  %v1146_v57 = vrot.slane %v1144_v49, 5  ;;  %v1154_v58 = vshll.u32 %v523_v45, 16  ;;  %v529_v28 = vld [vmem:[%s4123_s20 + $0x100] sm:$0xf] }
  0xc3   : > { %1932 = vst.msk [vmem:[#allocation2 + $0x2b4] sm:$0xf] %vm343_vm0, %v1118_v55  ;;  %v1133_v60 = vrot.slane %v1132_v50, 4  ;;  %v1141_v61 = vor.u32 %v1140_v52, %v1137_v51  ;;  %v1150_v62 = vrot.slane %v1148_v53, 4  ;;  %v1158_v63 = vshrl.u32 %v523_v45, 16 }
  0xc4   : > { %v1128_v1 = vsel %vm4378_vm4, %v1123_v56, %v1127_v41  ;;  %v1156_v2 = vrot.slane %v1154_v58, 5  ;;  %v1164_v3 = vshll.u32 %v524_v54, 16  ;;  %v1168_v4 = vshrl.u32 %v524_v54, 16  ;;  %v530_v33 = vld [vmem:[%s4123_s20 + $0x104] sm:$0xf] }
  0xc5   : > { %1933 = vst.msk [vmem:[#allocation2 + $0x2b8] sm:$0xf] %vm343_vm0, %v1128_v1  ;;  %v1142_v5 = vrot.slane %v1141_v61, 4  ;;  %v1151_v6 = vor.u32 %v1150_v62, %v1146_v57  ;;  %v1160_v7 = vrot.slane %v1158_v63, 4  ;;  %v1174_v8 = vshrl.u32 %v525_v59, 16 }
  0xc6   : > { %1934 = vst.msk [vmem:[#allocation2 + $0x2bc] sm:$0x3] %vm347_vm1, %v1133_v60  ;;  %v1166_v9 = vrot.slane %v1164_v3, 5  ;;  %v1170_v10 = vrot.slane %v1168_v4, 4  ;;  %v1177_v11 = vshll.u32 %v525_v59, 16  ;;  %v1183_v12 = vshll.u32 %v526_v0, 16 }
  0xc7   : > { %v1147_v14 = vsel %vm4378_vm4, %v1142_v5, %v1146_v57  ;;  %v1152_v15 = vrot.slane %v1151_v6, 4  ;;  %v1161_v16 = vor.u32 %v1160_v7, %v1156_v2  ;;  %v1176_v17 = vrot.slane %v1174_v8, 4  ;;  %v531_v46 = vld [vmem:[%s4123_s20 + $0x108] sm:$0xf]  ;;  %v532_v51 = vld [vmem:[%s4123_s20 + $0x10c] sm:$0x7] }
  0xc8   : > { %1935 = vst.msk [vmem:[#allocation2 + $0x2c0] sm:$0xf] %vm343_vm0, %v1147_v14  ;;  %v1171_v20 = vor.u32 %v1170_v10, %v1166_v9  ;;  %v1179_v21 = vrot.slane %v1177_v11, 5  ;;  %v1185_v22 = vrot.slane %v1183_v12, 5  ;;  %v1187_v23 = vshrl.u32 %v526_v0, 16 }
  0xc9   : > { %v1157_v24 = vsel %vm4378_vm4, %v1152_v15, %v1156_v2  ;;  %v1162_v25 = vrot.slane %v1161_v16, 4  ;;  %v1193_v26 = vshll.u32 %v527_v13, 16  ;;  %v1197_v27 = vshrl.u32 %v527_v13, 16  ;;  %v533_v60 = vld [vmem:[%s4123_s20 + $0x110] sm:$0xf] }
  0xca   : > { %1936 = vst.msk [vmem:[#allocation2 + $0x2c4] sm:$0xf] %vm343_vm0, %v1157_v24  ;;  %v1172_v29 = vrot.slane %v1171_v20, 4  ;;  %v1180_v30 = vor.u32 %v1179_v21, %v1176_v17  ;;  %v1189_v31 = vrot.slane %v1187_v23, 4  ;;  %v1203_v32 = vshll.u32 %v528_v19, 16 }
  0xcb   : > { %v1167_v34 = vsel %vm4378_vm4, %v1162_v25, %v1166_v9  ;;  %v1195_v35 = vrot.slane %v1193_v26, 5  ;;  %v1199_v36 = vrot.slane %v1197_v27, 4  ;;  %v1207_v37 = vshrl.u32 %v528_v19, 16  ;;  %v534_v1 = vld [vmem:[%s4123_s20 + $0x114] sm:$0xf] }
  0xcc   : > { %1937 = vst.msk [vmem:[#allocation2 + $0x2c8] sm:$0xf] %vm343_vm0, %v1167_v34  ;;  %v1181_v38 = vrot.slane %v1180_v30, 4  ;;  %v1190_v39 = vor.u32 %v1189_v31, %v1185_v22  ;;  %v1205_v40 = vrot.slane %v1203_v32, 5  ;;  %v1213_v41 = vshrl.u32 %v529_v28, 16 }
  0xcd   : > { %1938 = vst.msk [vmem:[#allocation2 + $0x2cc] sm:$0x3] %vm347_vm1, %v1172_v29  ;;  %v1200_v42 = vor.u32 %v1199_v36, %v1195_v35  ;;  %v1209_v43 = vrot.slane %v1207_v37, 4  ;;  %v1216_v44 = vshll.u32 %v529_v28, 16  ;;  %v1222_v45 = vshll.u32 %v530_v33, 16 }
  0xce   : > { %v1186_v47 = vsel %vm4378_vm4, %v1181_v38, %v1185_v22  ;;  %v1191_v48 = vrot.slane %v1190_v39, 4  ;;  %v1215_v49 = vrot.slane %v1213_v41, 4  ;;  %v1226_v50 = vshrl.u32 %v530_v33, 16  ;;  %v535_v14 = vld [vmem:[%s4123_s20 + $0x118] sm:$0xf] }
  0xcf   : > { %1939 = vst.msk [vmem:[#allocation2 + $0x2d0] sm:$0xf] %vm343_vm0, %v1186_v47  ;;  %v1201_v52 = vrot.slane %v1200_v42, 4  ;;  %v1210_v53 = vor.u32 %v1209_v43, %v1205_v40  ;;  %v1218_v54 = vrot.slane %v1216_v44, 5  ;;  %v1224_v55 = vrot.slane %v1222_v45, 5 }
  0xd0   : > { %v1196_v56 = vsel %vm4378_vm4, %v1191_v48, %v1195_v35  ;;  %v1228_v57 = vrot.slane %v1226_v50, 4  ;;  %v1232_v58 = vshll.u32 %v531_v46, 16  ;;  %v1236_v59 = vshrl.u32 %v531_v46, 16  ;;  %v536_v20 = vld [vmem:[%s4123_s20 + $0x11c] sm:$0x7] }
  0xd1   : > { %1940 = vst.msk [vmem:[#allocation2 + $0x2d4] sm:$0xf] %vm343_vm0, %v1196_v56  ;;  %v1206_v61 = vsel %vm4378_vm4, %v1201_v52, %v1205_v40  ;;  %v1211_v62 = vrot.slane %v1210_v53, 4  ;;  %v1219_v63 = vor.u32 %v1218_v54, %v1215_v49  ;;  %v1242_v0 = vshll.u32 %v532_v51, 16  ;;  %v537_v29 = vld [vmem:[%s4123_s20 + $0x120] sm:$0xf] }
  0xd2   : > { %1941 = vst.msk [vmem:[#allocation2 + $0x2d8] sm:$0xf] %vm343_vm0, %v1206_v61  ;;  %v1229_v2 = vor.u32 %v1228_v57, %v1224_v55  ;;  %v1234_v3 = vrot.slane %v1232_v58, 5  ;;  %v1238_v4 = vrot.slane %v1236_v59, 4  ;;  %v1246_v5 = vshrl.u32 %v532_v51, 16 }
  0xd3   : > { %1942 = vst.msk [vmem:[#allocation2 + $0x2dc] sm:$0x3] %vm347_vm1, %v1211_v62  ;;  %v1220_v6 = vrot.slane %v1219_v63, 4  ;;  %v1244_v7 = vrot.slane %v1242_v0, 5  ;;  %v1252_v8 = vshrl.u32 %v533_v60, 16  ;;  %v1255_v9 = vshll.u32 %v533_v60, 16 }
  0xd4   : > { %v1230_v10 = vrot.slane %v1229_v2, 4  ;;  %v1239_v11 = vor.u32 %v1238_v4, %v1234_v3  ;;  %v1248_v12 = vrot.slane %v1246_v5, 4  ;;  %v1261_v13 = vshll.u32 %v534_v1, 16  ;;  %v538_v34 = vld [vmem:[%s4123_s20 + $0x124] sm:$0xf] }
  0xd5   : > { %v1225_v15 = vsel %vm4378_vm4, %v1220_v6, %v1224_v55  ;;  %v1254_v16 = vrot.slane %v1252_v8, 4  ;;  %v1257_v17 = vrot.slane %v1255_v9, 5  ;;  %v1265_v19 = vshrl.u32 %v534_v1, 16  ;;  %v539_v43 = vld [vmem:[%s4123_s20 + $0x128] sm:$0xf] }
  0xd6   : > { %1943 = vst.msk [vmem:[#allocation2 + $0x2e0] sm:$0xf] %vm343_vm0, %v1225_v15  ;;  %v1235_v21 = vsel %vm4378_vm4, %v1230_v10, %v1234_v3  ;;  %v1240_v22 = vrot.slane %v1239_v11, 4  ;;  %v1249_v23 = vor.u32 %v1248_v12, %v1244_v7  ;;  %v1263_v24 = vrot.slane %v1261_v13, 5  ;;  %v540_v52 = vld [vmem:[%s4123_s20 + $0x12c] sm:$0x7] }
  0xd7   : > { %1944 = vst.msk [vmem:[#allocation2 + $0x2e4] sm:$0xf] %vm343_vm0, %v1235_v21  ;;  %v1258_v25 = vor.u32 %v1257_v17, %v1254_v16  ;;  %v1267_v26 = vrot.slane %v1265_v19, 4  ;;  %v1271_v27 = vshll.u32 %v535_v14, 16  ;;  %v1275_v28 = vshrl.u32 %v535_v14, 16 }
  0xd8   : > { %v1245_v30 = vsel %vm4378_vm4, %v1240_v22, %v1244_v7  ;;  %v1250_v31 = vrot.slane %v1249_v23, 4  ;;  %v1281_v32 = vshll.u32 %v536_v20, 16  ;;  %v1285_v33 = vshrl.u32 %v536_v20, 16  ;;  %v541_v57 = vld [vmem:[%s4123_s20 + $0x130] sm:$0xf] }
  0xd9   : > { %1945 = vst.msk [vmem:[#allocation2 + $0x2e8] sm:$0xf] %vm343_vm0, %v1245_v30  ;;  %v1259_v35 = vrot.slane %v1258_v25, 4  ;;  %v1268_v36 = vor.u32 %v1267_v26, %v1263_v24  ;;  %v1273_v37 = vrot.slane %v1271_v27, 5  ;;  %v1277_v38 = vrot.slane %v1275_v28, 4 }
  0xda   : > { %1946 = vst.msk [vmem:[#allocation2 + $0x2ec] sm:$0x3] %vm347_vm1, %v1250_v31  ;;  %v1283_v39 = vrot.slane %v1281_v32, 5  ;;  %v1287_v40 = vrot.slane %v1285_v33, 4  ;;  %v1291_v41 = vshrl.u32 %v537_v29, 16  ;;  %v1294_v42 = vshll.u32 %v537_v29, 16 }
  0xdb   : > { %v1264_v44 = vsel %vm4378_vm4, %v1259_v35, %v1263_v24  ;;  %v1269_v45 = vrot.slane %v1268_v36, 4  ;;  %v1278_v46 = vor.u32 %v1277_v38, %v1273_v37  ;;  %v1300_v47 = vshll.u32 %v538_v34, 16  ;;  %v542_v62 = vld [vmem:[%s4123_s20 + $0x134] sm:$0xf]  ;;  %v543_v11 = vld [vmem:[%s4123_s20 + $0x138] sm:$0xf] }
  0xdc   : > { %1947 = vst.msk [vmem:[#allocation2 + $0x2f0] sm:$0xf] %vm343_vm0, %v1264_v44  ;;  %v1288_v48 = vor.u32 %v1287_v40, %v1283_v39  ;;  %v1293_v49 = vrot.slane %v1291_v41, 4  ;;  %v1296_v50 = vrot.slane %v1294_v42, 5  ;;  %v1304_v51 = vshrl.u32 %v538_v34, 16 }
  0xdd   : > { %v1274_v53 = vsel %vm4378_vm4, %v1269_v45, %v1273_v37  ;;  %v1279_v54 = vrot.slane %v1278_v46, 4  ;;  %v1302_v55 = vrot.slane %v1300_v47, 5  ;;  %v1310_v56 = vshll.u32 %v539_v43, 16  ;;  %v544_v16 = vld [vmem:[%s4123_s20 + $0x13c] sm:$0x7] }
  0xde   : > { %1948 = vst.msk [vmem:[#allocation2 + $0x2f4] sm:$0xf] %vm343_vm0, %v1274_v53  ;;  %v1289_v58 = vrot.slane %v1288_v48, 4  ;;  %v1297_v59 = vor.u32 %v1296_v50, %v1293_v49  ;;  %v1306_v60 = vrot.slane %v1304_v51, 4  ;;  %v1314_v61 = vshrl.u32 %v539_v43, 16 }
  0xdf   : > { %v1284_v63 = vsel %vm4378_vm4, %v1279_v54, %v1283_v39  ;;  %v1312_v0 = vrot.slane %v1310_v56, 5  ;;  %v1320_v1 = vshll.u32 %v540_v52, 16  ;;  %v1324_v2 = vshrl.u32 %v540_v52, 16  ;;  %v545_v26 = vld [vmem:[%s4123_s20 + $0x140] sm:$0xf] }
  0xe0   : > { %1949 = vst.msk [vmem:[#allocation2 + $0x2f8] sm:$0xf] %vm343_vm0, %v1284_v63  ;;  %v1298_v3 = vrot.slane %v1297_v59, 4  ;;  %v1307_v4 = vor.u32 %v1306_v60, %v1302_v55  ;;  %v1316_v5 = vrot.slane %v1314_v61, 4  ;;  %v1330_v6 = vshrl.u32 %v541_v57, 16 }
  0xe1   : > { %1950 = vst.msk [vmem:[#allocation2 + $0x2fc] sm:$0x3] %vm347_vm1, %v1289_v58  ;;  %v1322_v7 = vrot.slane %v1320_v1, 5  ;;  %v1326_v8 = vrot.slane %v1324_v2, 4  ;;  %v1333_v9 = vshll.u32 %v541_v57, 16  ;;  %v1339_v10 = vshll.u32 %v542_v62, 16 }
  0xe2   : > { %v1303_v12 = vsel %vm4378_vm4, %v1298_v3, %v1302_v55  ;;  %v1308_v13 = vrot.slane %v1307_v4, 4  ;;  %v1317_v14 = vor.u32 %v1316_v5, %v1312_v0  ;;  %v1332_v15 = vrot.slane %v1330_v6, 4  ;;  %v546_v31 = vld [vmem:[%s4123_s20 + $0x144] sm:$0xf]  ;;  %v547_v44 = vld [vmem:[%s4123_s20 + $0x148] sm:$0xf] }
  0xe3   : > { %1951 = vst.msk [vmem:[#allocation2 + $0x300] sm:$0xf] %vm343_vm0, %v1303_v12  ;;  %v1327_v17 = vor.u32 %v1326_v8, %v1322_v7  ;;  %v1335_v19 = vrot.slane %v1333_v9, 5  ;;  %v1341_v20 = vrot.slane %v1339_v10, 5  ;;  %v1343_v21 = vshrl.u32 %v542_v62, 16 }
  0xe4   : > { %v1313_v22 = vsel %vm4378_vm4, %v1308_v13, %v1312_v0  ;;  %v1318_v23 = vrot.slane %v1317_v14, 4  ;;  %v1349_v24 = vshll.u32 %v543_v11, 16  ;;  %v1353_v25 = vshrl.u32 %v543_v11, 16  ;;  %v548_v49 = vld [vmem:[%s4123_s20 + $0x14c] sm:$0x7] }
  0xe5   : > { %1952 = vst.msk [vmem:[#allocation2 + $0x304] sm:$0xf] %vm343_vm0, %v1313_v22  ;;  %v1328_v27 = vrot.slane %v1327_v17, 4  ;;  %v1336_v28 = vor.u32 %v1335_v19, %v1332_v15  ;;  %v1345_v29 = vrot.slane %v1343_v21, 4  ;;  %v1359_v30 = vshll.u32 %v544_v16, 16 }
  0xe6   : > { %v1323_v32 = vsel %vm4378_vm4, %v1318_v23, %v1322_v7  ;;  %v1351_v33 = vrot.slane %v1349_v24, 5  ;;  %v1355_v34 = vrot.slane %v1353_v25, 4  ;;  %v1363_v35 = vshrl.u32 %v544_v16, 16  ;;  %v549_v58 = vld [vmem:[%s4123_s20 + $0x150] sm:$0xf] }
  0xe7   : > { %1953 = vst.msk [vmem:[#allocation2 + $0x308] sm:$0xf] %vm343_vm0, %v1323_v32  ;;  %v1337_v36 = vrot.slane %v1336_v28, 4  ;;  %v1346_v37 = vor.u32 %v1345_v29, %v1341_v20  ;;  %v1361_v38 = vrot.slane %v1359_v30, 5  ;;  %v1369_v39 = vshrl.u32 %v545_v26, 16 }
  0xe8   : > { %1954 = vst.msk [vmem:[#allocation2 + $0x30c] sm:$0x3] %vm347_vm1, %v1328_v27  ;;  %v1356_v40 = vor.u32 %v1355_v34, %v1351_v33  ;;  %v1365_v41 = vrot.slane %v1363_v35, 4  ;;  %v1372_v42 = vshll.u32 %v545_v26, 16  ;;  %v1378_v43 = vshll.u32 %v546_v31, 16 }
  0xe9   : > { %v1342_v45 = vsel %vm4378_vm4, %v1337_v36, %v1341_v20  ;;  %v1347_v46 = vrot.slane %v1346_v37, 4  ;;  %v1371_v47 = vrot.slane %v1369_v39, 4  ;;  %v1382_v48 = vshrl.u32 %v546_v31, 16  ;;  %v550_v63 = vld [vmem:[%s4123_s20 + $0x154] sm:$0xf] }
  0xea   : > { %1955 = vst.msk [vmem:[#allocation2 + $0x310] sm:$0xf] %vm343_vm0, %v1342_v45  ;;  %v1357_v50 = vrot.slane %v1356_v40, 4  ;;  %v1366_v51 = vor.u32 %v1365_v41, %v1361_v38  ;;  %v1374_v52 = vrot.slane %v1372_v42, 5  ;;  %v1380_v53 = vrot.slane %v1378_v43, 5 }
  0xeb   : > { %v1352_v54 = vsel %vm4378_vm4, %v1347_v46, %v1351_v33  ;;  %v1384_v55 = vrot.slane %v1382_v48, 4  ;;  %v1388_v56 = vshll.u32 %v547_v44, 16  ;;  %v1392_v57 = vshrl.u32 %v547_v44, 16  ;;  %v551_v12 = vld [vmem:[%s4123_s20 + $0x158] sm:$0xf] }
  0xec   : > { %1956 = vst.msk [vmem:[#allocation2 + $0x314] sm:$0xf] %vm343_vm0, %v1352_v54  ;;  %v1362_v59 = vsel %vm4378_vm4, %v1357_v50, %v1361_v38  ;;  %v1367_v60 = vrot.slane %v1366_v51, 4  ;;  %v1375_v61 = vor.u32 %v1374_v52, %v1371_v47  ;;  %v1398_v62 = vshll.u32 %v548_v49, 16  ;;  %v552_v17 = vld [vmem:[%s4123_s20 + $0x15c] sm:$0x7] }
  0xed   : > { %1957 = vst.msk [vmem:[#allocation2 + $0x318] sm:$0xf] %vm343_vm0, %v1362_v59  ;;  %v1385_v0 = vor.u32 %v1384_v55, %v1380_v53  ;;  %v1390_v1 = vrot.slane %v1388_v56, 5  ;;  %v1394_v2 = vrot.slane %v1392_v57, 4  ;;  %v1402_v3 = vshrl.u32 %v548_v49, 16 }
  0xee   : > { %1958 = vst.msk [vmem:[#allocation2 + $0x31c] sm:$0x3] %vm347_vm1, %v1367_v60  ;;  %v1376_v4 = vrot.slane %v1375_v61, 4  ;;  %v1400_v5 = vrot.slane %v1398_v62, 5  ;;  %v1408_v6 = vshrl.u32 %v549_v58, 16  ;;  %v1411_v7 = vshll.u32 %v549_v58, 16 }
  0xef   : > { %v1386_v8 = vrot.slane %v1385_v0, 4  ;;  %v1395_v9 = vor.u32 %v1394_v2, %v1390_v1  ;;  %v1404_v10 = vrot.slane %v1402_v3, 4  ;;  %v1417_v11 = vshll.u32 %v550_v63, 16  ;;  %v553_v27 = vld [vmem:[%s4123_s20 + $0x160] sm:$0xf] }
  0xf0   : > { %v1381_v13 = vsel %vm4378_vm4, %v1376_v4, %v1380_v53  ;;  %v1410_v14 = vrot.slane %v1408_v6, 4  ;;  %v1413_v15 = vrot.slane %v1411_v7, 5  ;;  %v1421_v16 = vshrl.u32 %v550_v63, 16  ;;  %v554_v32 = vld [vmem:[%s4123_s20 + $0x164] sm:$0xf] }
  0xf1   : > { %1959 = vst.msk [vmem:[#allocation2 + $0x320] sm:$0xf] %vm343_vm0, %v1381_v13  ;;  %v1391_v19 = vsel %vm4378_vm4, %v1386_v8, %v1390_v1  ;;  %v1396_v20 = vrot.slane %v1395_v9, 4  ;;  %v1405_v21 = vor.u32 %v1404_v10, %v1400_v5  ;;  %v1419_v22 = vrot.slane %v1417_v11, 5  ;;  %v555_v41 = vld [vmem:[%s4123_s20 + $0x168] sm:$0xf] }
  0xf2   : > { %1960 = vst.msk [vmem:[#allocation2 + $0x324] sm:$0xf] %vm343_vm0, %v1391_v19  ;;  %v1414_v23 = vor.u32 %v1413_v15, %v1410_v14  ;;  %v1423_v24 = vrot.slane %v1421_v16, 4  ;;  %v1427_v25 = vshll.u32 %v551_v12, 16  ;;  %v1431_v26 = vshrl.u32 %v551_v12, 16 }
  0xf3   : > { %v1401_v28 = vsel %vm4378_vm4, %v1396_v20, %v1400_v5  ;;  %v1406_v29 = vrot.slane %v1405_v21, 4  ;;  %v1437_v30 = vshll.u32 %v552_v17, 16  ;;  %v1441_v31 = vshrl.u32 %v552_v17, 16  ;;  %v556_v50 = vld [vmem:[%s4123_s20 + $0x16c] sm:$0x7] }
  0xf4   : > { %1961 = vst.msk [vmem:[#allocation2 + $0x328] sm:$0xf] %vm343_vm0, %v1401_v28  ;;  %v1415_v33 = vrot.slane %v1414_v23, 4  ;;  %v1424_v34 = vor.u32 %v1423_v24, %v1419_v22  ;;  %v1429_v35 = vrot.slane %v1427_v25, 5  ;;  %v1433_v36 = vrot.slane %v1431_v26, 4 }
  0xf5   : > { %1962 = vst.msk [vmem:[#allocation2 + $0x32c] sm:$0x3] %vm347_vm1, %v1406_v29  ;;  %v1439_v37 = vrot.slane %v1437_v30, 5  ;;  %v1443_v38 = vrot.slane %v1441_v31, 4  ;;  %v1447_v39 = vshrl.u32 %v553_v27, 16  ;;  %v1450_v40 = vshll.u32 %v553_v27, 16 }
  0xf6   : > { %v1420_v42 = vsel %vm4378_vm4, %v1415_v33, %v1419_v22  ;;  %v1425_v43 = vrot.slane %v1424_v34, 4  ;;  %v1434_v44 = vor.u32 %v1433_v36, %v1429_v35  ;;  %v1456_v45 = vshll.u32 %v554_v32, 16  ;;  %v557_v55 = vld [vmem:[%s4123_s20 + $0x170] sm:$0xf]  ;;  %v558_v60 = vld [vmem:[%s4123_s20 + $0x174] sm:$0xf] }
  0xf7   : > { %1963 = vst.msk [vmem:[#allocation2 + $0x330] sm:$0xf] %vm343_vm0, %v1420_v42  ;;  %v1444_v46 = vor.u32 %v1443_v38, %v1439_v37  ;;  %v1449_v47 = vrot.slane %v1447_v39, 4  ;;  %v1452_v48 = vrot.slane %v1450_v40, 5  ;;  %v1460_v49 = vshrl.u32 %v554_v32, 16 }
  0xf8   : > { %v1430_v51 = vsel %vm4378_vm4, %v1425_v43, %v1429_v35  ;;  %v1435_v52 = vrot.slane %v1434_v44, 4  ;;  %v1458_v53 = vrot.slane %v1456_v45, 5  ;;  %v1466_v54 = vshll.u32 %v555_v41, 16  ;;  %v559_v9 = vld [vmem:[%s4123_s20 + $0x178] sm:$0xf] }
  0xf9   : > { %1964 = vst.msk [vmem:[#allocation2 + $0x334] sm:$0xf] %vm343_vm0, %v1430_v51  ;;  %v1445_v56 = vrot.slane %v1444_v46, 4  ;;  %v1453_v57 = vor.u32 %v1452_v48, %v1449_v47  ;;  %v1462_v58 = vrot.slane %v1460_v49, 4  ;;  %v1470_v59 = vshrl.u32 %v555_v41, 16 }
  0xfa   : > { %v1440_v61 = vsel %vm4378_vm4, %v1435_v52, %v1439_v37  ;;  %v1468_v62 = vrot.slane %v1466_v54, 5  ;;  %v1476_v63 = vshll.u32 %v556_v50, 16  ;;  %v1480_v0 = vshrl.u32 %v556_v50, 16  ;;  %v560_v14 = vld [vmem:[%s4123_s20 + $0x17c] sm:$0x7] }
  0xfb   : > { %1965 = vst.msk [vmem:[#allocation2 + $0x338] sm:$0xf] %vm343_vm0, %v1440_v61  ;;  %v1454_v1 = vrot.slane %v1453_v57, 4  ;;  %v1463_v2 = vor.u32 %v1462_v58, %v1458_v53  ;;  %v1472_v3 = vrot.slane %v1470_v59, 4  ;;  %v1486_v4 = vshrl.u32 %v557_v55, 16 }
  0xfc   : > { %1966 = vst.msk [vmem:[#allocation2 + $0x33c] sm:$0x3] %vm347_vm1, %v1445_v56  ;;  %v1478_v5 = vrot.slane %v1476_v63, 5  ;;  %v1482_v6 = vrot.slane %v1480_v0, 4  ;;  %v1489_v7 = vshll.u32 %v557_v55, 16  ;;  %v1495_v8 = vshll.u32 %v558_v60, 16 }
  0xfd   : > { %v1459_v10 = vsel %vm4378_vm4, %v1454_v1, %v1458_v53  ;;  %v1464_v11 = vrot.slane %v1463_v2, 4  ;;  %v1473_v12 = vor.u32 %v1472_v3, %v1468_v62  ;;  %v1488_v13 = vrot.slane %v1486_v4, 4  ;;  %v561_v24 = vld [vmem:[%s4123_s20 + $0x180] sm:$0xf]  ;;  %v562_v29 = vld [vmem:[%s4123_s20 + $0x184] sm:$0xf] }
  0xfe   : > { %1967 = vst.msk [vmem:[#allocation2 + $0x340] sm:$0xf] %vm343_vm0, %v1459_v10  ;;  %v1483_v15 = vor.u32 %v1482_v6, %v1478_v5  ;;  %v1491_v16 = vrot.slane %v1489_v7, 5  ;;  %v1497_v17 = vrot.slane %v1495_v8, 5  ;;  %v1499_v19 = vshrl.u32 %v558_v60, 16 }
  0xff   : > { %v1469_v20 = vsel %vm4378_vm4, %v1464_v11, %v1468_v62  ;;  %v1474_v21 = vrot.slane %v1473_v12, 4  ;;  %v1505_v22 = vshll.u32 %v559_v9, 16  ;;  %v1509_v23 = vshrl.u32 %v559_v9, 16  ;;  %v563_v42 = vld [vmem:[%s4123_s20 + $0x188] sm:$0xf] }
 0x100   : > { %1968 = vst.msk [vmem:[#allocation2 + $0x344] sm:$0xf] %vm343_vm0, %v1469_v20  ;;  %v1484_v25 = vrot.slane %v1483_v15, 4  ;;  %v1492_v26 = vor.u32 %v1491_v16, %v1488_v13  ;;  %v1501_v27 = vrot.slane %v1499_v19, 4  ;;  %v1515_v28 = vshll.u32 %v560_v14, 16 }
 0x101   : > { %v1479_v30 = vsel %vm4378_vm4, %v1474_v21, %v1478_v5  ;;  %v1507_v31 = vrot.slane %v1505_v22, 5  ;;  %v1511_v32 = vrot.slane %v1509_v23, 4  ;;  %v1519_v33 = vshrl.u32 %v560_v14, 16  ;;  %v564_v47 = vld [vmem:[%s4123_s20 + $0x18c] sm:$0x7] }
 0x102   : > { %1969 = vst.msk [vmem:[#allocation2 + $0x348] sm:$0xf] %vm343_vm0, %v1479_v30  ;;  %v1493_v34 = vrot.slane %v1492_v26, 4  ;;  %v1502_v35 = vor.u32 %v1501_v27, %v1497_v17  ;;  %v1517_v36 = vrot.slane %v1515_v28, 5  ;;  %v1525_v37 = vshrl.u32 %v561_v24, 16 }
 0x103   : > { %1970 = vst.msk [vmem:[#allocation2 + $0x34c] sm:$0x3] %vm347_vm1, %v1484_v25  ;;  %v1512_v38 = vor.u32 %v1511_v32, %v1507_v31  ;;  %v1521_v39 = vrot.slane %v1519_v33, 4  ;;  %v1528_v40 = vshll.u32 %v561_v24, 16  ;;  %v1534_v41 = vshll.u32 %v562_v29, 16 }
 0x104   : > { %v1498_v43 = vsel %vm4378_vm4, %v1493_v34, %v1497_v17  ;;  %v1503_v44 = vrot.slane %v1502_v35, 4  ;;  %v1527_v45 = vrot.slane %v1525_v37, 4  ;;  %v1538_v46 = vshrl.u32 %v562_v29, 16  ;;  %v565_v56 = vld [vmem:[%s4123_s20 + $0x190] sm:$0xf] }
 0x105   : > { %1971 = vst.msk [vmem:[#allocation2 + $0x350] sm:$0xf] %vm343_vm0, %v1498_v43  ;;  %v1513_v48 = vrot.slane %v1512_v38, 4  ;;  %v1522_v49 = vor.u32 %v1521_v39, %v1517_v36  ;;  %v1530_v50 = vrot.slane %v1528_v40, 5  ;;  %v1536_v51 = vrot.slane %v1534_v41, 5 }
 0x106   : > { %v1508_v52 = vsel %vm4378_vm4, %v1503_v44, %v1507_v31  ;;  %v1540_v53 = vrot.slane %v1538_v46, 4  ;;  %v1544_v54 = vshll.u32 %v563_v42, 16  ;;  %v1548_v55 = vshrl.u32 %v563_v42, 16  ;;  %v566_v61 = vld [vmem:[%s4123_s20 + $0x194] sm:$0xf] }
 0x107   : > { %1972 = vst.msk [vmem:[#allocation2 + $0x354] sm:$0xf] %vm343_vm0, %v1508_v52  ;;  %v1518_v57 = vsel %vm4378_vm4, %v1513_v48, %v1517_v36  ;;  %v1523_v58 = vrot.slane %v1522_v49, 4  ;;  %v1531_v59 = vor.u32 %v1530_v50, %v1527_v45  ;;  %v1554_v60 = vshll.u32 %v564_v47, 16  ;;  %v567_v10 = vld [vmem:[%s4123_s20 + $0x198] sm:$0xf] }
 0x108   : > { %1973 = vst.msk [vmem:[#allocation2 + $0x358] sm:$0xf] %vm343_vm0, %v1518_v57  ;;  %v1541_v62 = vor.u32 %v1540_v53, %v1536_v51  ;;  %v1546_v63 = vrot.slane %v1544_v54, 5  ;;  %v1550_v0 = vrot.slane %v1548_v55, 4  ;;  %v1558_v1 = vshrl.u32 %v564_v47, 16 }
 0x109   : > { %1974 = vst.msk [vmem:[#allocation2 + $0x35c] sm:$0x3] %vm347_vm1, %v1523_v58  ;;  %v1532_v2 = vrot.slane %v1531_v59, 4  ;;  %v1556_v3 = vrot.slane %v1554_v60, 5  ;;  %v1564_v4 = vshrl.u32 %v565_v56, 16  ;;  %v1567_v5 = vshll.u32 %v565_v56, 16 }
 0x10a   : > { %v1542_v6 = vrot.slane %v1541_v62, 4  ;;  %v1551_v7 = vor.u32 %v1550_v0, %v1546_v63  ;;  %v1560_v8 = vrot.slane %v1558_v1, 4  ;;  %v1573_v9 = vshll.u32 %v566_v61, 16  ;;  %v568_v15 = vld [vmem:[%s4123_s20 + $0x19c] sm:$0x7] }
 0x10b   : > { %v1537_v11 = vsel %vm4378_vm4, %v1532_v2, %v1536_v51  ;;  %v1566_v12 = vrot.slane %v1564_v4, 4  ;;  %v1569_v13 = vrot.slane %v1567_v5, 5  ;;  %v1577_v14 = vshrl.u32 %v566_v61, 16  ;;  %v569_v25 = vld [vmem:[%s4123_s20 + $0x1a0] sm:$0xf] }
 0x10c   : > { %1975 = vst.msk [vmem:[#allocation2 + $0x360] sm:$0xf] %vm343_vm0, %v1537_v11  ;;  %v1547_v16 = vsel %vm4378_vm4, %v1542_v6, %v1546_v63  ;;  %v1552_v17 = vrot.slane %v1551_v7, 4  ;;  %v1561_v19 = vor.u32 %v1560_v8, %v1556_v3  ;;  %v1575_v20 = vrot.slane %v1573_v9, 5  ;;  %v570_v30 = vld [vmem:[%s4123_s20 + $0x1a4] sm:$0xf] }
 0x10d   : > { %1976 = vst.msk [vmem:[#allocation2 + $0x364] sm:$0xf] %vm343_vm0, %v1547_v16  ;;  %v1570_v21 = vor.u32 %v1569_v13, %v1566_v12  ;;  %v1579_v22 = vrot.slane %v1577_v14, 4  ;;  %v1583_v23 = vshll.u32 %v567_v10, 16  ;;  %v1587_v24 = vshrl.u32 %v567_v10, 16 }
 0x10e   : > { %v1557_v26 = vsel %vm4378_vm4, %v1552_v17, %v1556_v3  ;;  %v1562_v27 = vrot.slane %v1561_v19, 4  ;;  %v1593_v28 = vshll.u32 %v568_v15, 16  ;;  %v1597_v29 = vshrl.u32 %v568_v15, 16  ;;  %v571_v39 = vld [vmem:[%s4123_s20 + $0x1a8] sm:$0xf] }
 0x10f   : > { %1977 = vst.msk [vmem:[#allocation2 + $0x368] sm:$0xf] %vm343_vm0, %v1557_v26  ;;  %v1571_v31 = vrot.slane %v1570_v21, 4  ;;  %v1580_v32 = vor.u32 %v1579_v22, %v1575_v20  ;;  %v1585_v33 = vrot.slane %v1583_v23, 5  ;;  %v1589_v34 = vrot.slane %v1587_v24, 4 }
 0x110   : > { %1978 = vst.msk [vmem:[#allocation2 + $0x36c] sm:$0x3] %vm347_vm1, %v1562_v27  ;;  %v1595_v35 = vrot.slane %v1593_v28, 5  ;;  %v1599_v36 = vrot.slane %v1597_v29, 4  ;;  %v1603_v37 = vshrl.u32 %v569_v25, 16  ;;  %v1606_v38 = vshll.u32 %v569_v25, 16 }
 0x111   : > { %v1576_v40 = vsel %vm4378_vm4, %v1571_v31, %v1575_v20  ;;  %v1581_v41 = vrot.slane %v1580_v32, 4  ;;  %v1590_v42 = vor.u32 %v1589_v34, %v1585_v33  ;;  %v1612_v43 = vshll.u32 %v570_v30, 16  ;;  %v572_v48 = vld [vmem:[%s4123_s20 + $0x1ac] sm:$0x7]  ;;  %v573_v53 = vld [vmem:[%s4123_s20 + $0x1b0] sm:$0xf] }
 0x112   : > { %1979 = vst.msk [vmem:[#allocation2 + $0x370] sm:$0xf] %vm343_vm0, %v1576_v40  ;;  %v1600_v44 = vor.u32 %v1599_v36, %v1595_v35  ;;  %v1605_v45 = vrot.slane %v1603_v37, 4  ;;  %v1608_v46 = vrot.slane %v1606_v38, 5  ;;  %v1616_v47 = vshrl.u32 %v570_v30, 16 }
 0x113   : > { %v1586_v49 = vsel %vm4378_vm4, %v1581_v41, %v1585_v33  ;;  %v1591_v50 = vrot.slane %v1590_v42, 4  ;;  %v1614_v51 = vrot.slane %v1612_v43, 5  ;;  %v1622_v52 = vshll.u32 %v571_v39, 16  ;;  %v574_v58 = vld [vmem:[%s4123_s20 + $0x1b4] sm:$0xf] }
 0x114   : > { %1980 = vst.msk [vmem:[#allocation2 + $0x374] sm:$0xf] %vm343_vm0, %v1586_v49  ;;  %v1601_v54 = vrot.slane %v1600_v44, 4  ;;  %v1609_v55 = vor.u32 %v1608_v46, %v1605_v45  ;;  %v1618_v56 = vrot.slane %v1616_v47, 4  ;;  %v1626_v57 = vshrl.u32 %v571_v39, 16 }
 0x115   : > { %v1596_v59 = vsel %vm4378_vm4, %v1591_v50, %v1595_v35  ;;  %v1624_v60 = vrot.slane %v1622_v52, 5  ;;  %v1632_v61 = vshll.u32 %v572_v48, 16  ;;  %v1636_v62 = vshrl.u32 %v572_v48, 16  ;;  %v575_v7 = vld [vmem:[%s4123_s20 + $0x1b8] sm:$0xf] }
 0x116   : > { %1981 = vst.msk [vmem:[#allocation2 + $0x378] sm:$0xf] %vm343_vm0, %v1596_v59  ;;  %v1610_v63 = vrot.slane %v1609_v55, 4  ;;  %v1619_v0 = vor.u32 %v1618_v56, %v1614_v51  ;;  %v1628_v1 = vrot.slane %v1626_v57, 4  ;;  %v1642_v2 = vshrl.u32 %v573_v53, 16 }
 0x117   : > { %1982 = vst.msk [vmem:[#allocation2 + $0x37c] sm:$0x3] %vm347_vm1, %v1601_v54  ;;  %v1634_v3 = vrot.slane %v1632_v61, 5  ;;  %v1638_v4 = vrot.slane %v1636_v62, 4  ;;  %v1645_v5 = vshll.u32 %v573_v53, 16  ;;  %v1651_v6 = vshll.u32 %v574_v58, 16 }
 0x118   : > { %v1615_v8 = vsel %vm4378_vm4, %v1610_v63, %v1614_v51  ;;  %v1620_v9 = vrot.slane %v1619_v0, 4  ;;  %v1629_v10 = vor.u32 %v1628_v1, %v1624_v60  ;;  %v1644_v11 = vrot.slane %v1642_v2, 4  ;;  %v576_v12 = vld [vmem:[%s4123_s20 + $0x1bc] sm:$0x7]  ;;  %v577_v22 = vld [vmem:[%s4123_s20 + $0x1c0] sm:$0xf] }
 0x119   : > { %1983 = vst.msk [vmem:[#allocation2 + $0x380] sm:$0xf] %vm343_vm0, %v1615_v8  ;;  %v1639_v13 = vor.u32 %v1638_v4, %v1634_v3  ;;  %v1647_v14 = vrot.slane %v1645_v5, 5  ;;  %v1653_v15 = vrot.slane %v1651_v6, 5  ;;  %v1655_v16 = vshrl.u32 %v574_v58, 16 }
 0x11a   : > { %v1625_v17 = vsel %vm4378_vm4, %v1620_v9, %v1624_v60  ;;  %v1630_v19 = vrot.slane %v1629_v10, 4  ;;  %v1661_v20 = vshll.u32 %v575_v7, 16  ;;  %v1665_v21 = vshrl.u32 %v575_v7, 16  ;;  %v578_v27 = vld [vmem:[%s4123_s20 + $0x1c4] sm:$0xf] }
 0x11b   : > { %1984 = vst.msk [vmem:[#allocation2 + $0x384] sm:$0xf] %vm343_vm0, %v1625_v17  ;;  %v1640_v23 = vrot.slane %v1639_v13, 4  ;;  %v1648_v24 = vor.u32 %v1647_v14, %v1644_v11  ;;  %v1657_v25 = vrot.slane %v1655_v16, 4  ;;  %v1671_v26 = vshll.u32 %v576_v12, 16 }
 0x11c   : > { %v1635_v28 = vsel %vm4378_vm4, %v1630_v19, %v1634_v3  ;;  %v1663_v29 = vrot.slane %v1661_v20, 5  ;;  %v1667_v30 = vrot.slane %v1665_v21, 4  ;;  %v1675_v31 = vshrl.u32 %v576_v12, 16  ;;  %v579_v40 = vld [vmem:[%s4123_s20 + $0x1c8] sm:$0xf] }
 0x11d   : > { %1985 = vst.msk [vmem:[#allocation2 + $0x388] sm:$0xf] %vm343_vm0, %v1635_v28  ;;  %v1649_v32 = vrot.slane %v1648_v24, 4  ;;  %v1658_v33 = vor.u32 %v1657_v25, %v1653_v15  ;;  %v1673_v34 = vrot.slane %v1671_v26, 5  ;;  %v1681_v35 = vshrl.u32 %v577_v22, 16 }
 0x11e   : > { %1986 = vst.msk [vmem:[#allocation2 + $0x38c] sm:$0x3] %vm347_vm1, %v1640_v23  ;;  %v1668_v36 = vor.u32 %v1667_v30, %v1663_v29  ;;  %v1677_v37 = vrot.slane %v1675_v31, 4  ;;  %v1684_v38 = vshll.u32 %v577_v22, 16  ;;  %v1690_v39 = vshll.u32 %v578_v27, 16 }
 0x11f   : > { %v1654_v41 = vsel %vm4378_vm4, %v1649_v32, %v1653_v15  ;;  %v1659_v42 = vrot.slane %v1658_v33, 4  ;;  %v1683_v43 = vrot.slane %v1681_v35, 4  ;;  %v1694_v44 = vshrl.u32 %v578_v27, 16  ;;  %v580_v45 = vld [vmem:[%s4123_s20 + $0x1cc] sm:$0x7] }
 0x120   : > { %1987 = vst.msk [vmem:[#allocation2 + $0x390] sm:$0xf] %vm343_vm0, %v1654_v41  ;;  %v1669_v46 = vrot.slane %v1668_v36, 4  ;;  %v1678_v47 = vor.u32 %v1677_v37, %v1673_v34  ;;  %v1686_v48 = vrot.slane %v1684_v38, 5  ;;  %v1692_v49 = vrot.slane %v1690_v39, 5 }
 0x121   : > { %v1664_v50 = vsel %vm4378_vm4, %v1659_v42, %v1663_v29  ;;  %v1696_v51 = vrot.slane %v1694_v44, 4  ;;  %v1700_v52 = vshll.u32 %v579_v40, 16  ;;  %v1704_v53 = vshrl.u32 %v579_v40, 16  ;;  %v581_v54 = vld [vmem:[%s4123_s20 + $0x1d0] sm:$0xf] }
 0x122   : > { %1988 = vst.msk [vmem:[#allocation2 + $0x394] sm:$0xf] %vm343_vm0, %v1664_v50  ;;  %v1674_v55 = vsel %vm4378_vm4, %v1669_v46, %v1673_v34  ;;  %v1679_v56 = vrot.slane %v1678_v47, 4  ;;  %v1687_v57 = vor.u32 %v1686_v48, %v1683_v43  ;;  %v1710_v58 = vshll.u32 %v580_v45, 16  ;;  %v582_v59 = vld [vmem:[%s4123_s20 + $0x1d4] sm:$0xf] }
 0x123   : > { %1989 = vst.msk [vmem:[#allocation2 + $0x398] sm:$0xf] %vm343_vm0, %v1674_v55  ;;  %v1697_v60 = vor.u32 %v1696_v51, %v1692_v49  ;;  %v1702_v61 = vrot.slane %v1700_v52, 5  ;;  %v1706_v62 = vrot.slane %v1704_v53, 4  ;;  %v1714_v63 = vshrl.u32 %v580_v45, 16 }
 0x124   : > { %1990 = vst.msk [vmem:[#allocation2 + $0x39c] sm:$0x3] %vm347_vm1, %v1679_v56  ;;  %v1688_v0 = vrot.slane %v1687_v57, 4  ;;  %v1712_v1 = vrot.slane %v1710_v58, 5  ;;  %v1720_v2 = vshrl.u32 %v581_v54, 16  ;;  %v1723_v3 = vshll.u32 %v581_v54, 16 }
 0x125   : > { %v1698_v4 = vrot.slane %v1697_v60, 4  ;;  %v1707_v5 = vor.u32 %v1706_v62, %v1702_v61  ;;  %v1716_v6 = vrot.slane %v1714_v63, 4  ;;  %v1729_v7 = vshll.u32 %v582_v59, 16  ;;  %v583_v8 = vld [vmem:[%s4123_s20 + $0x1d8] sm:$0xf] }
 0x126   : > { %v1693_v9 = vsel %vm4378_vm4, %v1688_v0, %v1692_v49  ;;  %v1722_v10 = vrot.slane %v1720_v2, 4  ;;  %v1725_v11 = vrot.slane %v1723_v3, 5  ;;  %v1733_v12 = vshrl.u32 %v582_v59, 16  ;;  %v584_v13 = vld [vmem:[%s4123_s20 + $0x1dc] sm:$0x7] }
 0x127   : > { %1991 = vst.msk [vmem:[#allocation2 + $0x3a0] sm:$0xf] %vm343_vm0, %v1693_v9  ;;  %v1703_v14 = vsel %vm4378_vm4, %v1698_v4, %v1702_v61  ;;  %v1708_v15 = vrot.slane %v1707_v5, 4  ;;  %v1717_v16 = vor.u32 %v1716_v6, %v1712_v1  ;;  %v1731_v17 = vrot.slane %v1729_v7, 5  ;;  %v1999_v19 = vld [vmem:[%s4123_s20] sm:$0xe] }
 0x128   : > { %1992 = vst.msk [vmem:[#allocation2 + $0x3a4] sm:$0xf] %vm343_vm0, %v1703_v14  ;;  %v1726_v20 = vor.u32 %v1725_v11, %v1722_v10  ;;  %v1735_v21 = vrot.slane %v1733_v12, 4  ;;  %v1739_v22 = vshll.u32 %v583_v8, 16  ;;  %v1743_v23 = vshrl.u32 %v583_v8, 16 }
 0x129   : > { %v2000_v24 = vld [vmem:[%s4123_s20 + $0x4] sm:$0xf]  ;;  %v2001_v25 = vld [vmem:[%s4123_s20 + $0x8] sm:$0xf]  ;;  %v2002_v26 = vld [vmem:[%s4123_s20 + $0xc] sm:$0x7]  ;;  %v1713_v27 = vsel %vm4378_vm4, %v1708_v15, %v1712_v1 }
 0x12a   : > { %v1718_v28 = vrot.slane %v1717_v16, 4  ;;  %v1749_v29 = vshll.u32 %v584_v13, 16  ;;  %v1753_v30 = vshrl.u32 %v584_v13, 16  ;;  %v4791_v31 = vld [vmem:[%s5319_s2] ss:$0 sm:$0xff]  ;;  %v1727_v32 = vrot.slane %v1726_v20, 4 }
 0x12b   : > { %1993 = vst.msk [vmem:[#allocation2 + $0x3a8] sm:$0xf] %vm343_vm0, %v1713_v27  ;;  %v1736_v33 = vor.u32 %v1735_v21, %v1731_v17  ;;  %v1741_v34 = vrot.slane %v1739_v22, 5  ;;  %v1745_v35 = vrot.slane %v1743_v23, 4  ;;  %v2003_v36 = vld [vmem:[%s4123_s20 + $0x10] sm:$0xe] }
 0x12c   : > { %1994 = vst.msk [vmem:[#allocation2 + $0x3ac] sm:$0x3] %vm347_vm1, %v1718_v28  ;;  %v1751_v37 = vrot.slane %v1749_v29, 5  ;;  %v1755_v38 = vrot.slane %v1753_v30, 4  ;;  %v2004_v39 = vld [vmem:[%s4123_s20 + $0x14] sm:$0xf]  ;;  %v1732_v40 = vsel %vm4378_vm4, %v1727_v32, %v1731_v17 }
 0x12d   : > { %v1737_v41 = vrot.slane %v1736_v33, 4  ;;  %v1746_v42 = vor.u32 %v1745_v35, %v1741_v34  ;;  %v3736_v44 = vrot.slane %v1999_v19, 9  ;;  %v2005_v45 = vld [vmem:[%s4123_s20 + $0x18] sm:$0xf]  ;;  %v2006_v46 = vld [vmem:[%s4123_s20 + $0x1c] sm:$0x7] }
 0x12e   : > { %1995 = vst.msk [vmem:[#allocation2 + $0x3b0] sm:$0xf] %vm343_vm0, %v1732_v40  ;;  %v1756_v47 = vor.u32 %v1755_v38, %v1751_v37  ;;  %v2244_v48 = vrot.slane %v2000_v24, 5  ;;  %v2247_v49 = vrot.slane %v2001_v25, 5  ;;  %v2250_v50 = vrot.slane %v2002_v26, 5 }
 0x12f   : > { %v2007_v51 = vld [vmem:[%s4123_s20 + $0x20] sm:$0xe]  ;;  %v2008_v52 = vld [vmem:[%s4123_s20 + $0x24] sm:$0xf]  ;;  %v2009_v53 = vld [vmem:[%s4123_s20 + $0x28] sm:$0xf]  ;;  %v1742_v54 = vsel %vm4378_vm4, %v1737_v41, %v1741_v34 }
 0x130   : > { %v1747_v55 = vrot.slane %v1746_v42, 4  ;;  %v3737_v56 = vrot.slane %v2003_v36, 9  ;;  %v2255_v57 = vrot.slane %v2004_v39, 5  ;;  %v2010_v58 = vld [vmem:[%s4123_s20 + $0x2c] sm:$0x7]  ;;  %v1757_v59 = vrot.slane %v1756_v47, 4 }
 0x131   : > { %1996 = vst.msk [vmem:[#allocation2 + $0x3b4] sm:$0xf] %vm343_vm0, %v1742_v54  ;;  %v2245_v60 = vsel %vm4799_vm7, %v3736_v44, %v2244_v48  ;;  %v2246_v61 = vrot.slane %v2244_v48, 4  ;;  %v2249_v62 = vrot.slane %v2247_v49, 4  ;;  %v2011_v63 = vld [vmem:[%s4123_s20 + $0x30] sm:$0xe] }
 0x132   : > { %v1752_v0 = vsel %vm4378_vm4, %v1747_v55, %v1751_v37  ;;  %2693 = vst.msk [vmem:[#allocation2 + $0x3c0] sm:$0xf] %vm343_vm0, %v2245_v60  ;;  %v2252_v1 = vrot.slane %v2250_v50, 4  ;;  %v2256_v2 = vsel %vm4799_vm7, %v3737_v56, %v2255_v57  ;;  %v2257_v3 = vrot.slane %v2255_v57, 4  ;;  %v2012_v4 = vld [vmem:[%s4123_s20 + $0x34] sm:$0xf] }
 0x133   : > { %v2013_v5 = vld [vmem:[%s4123_s20 + $0x38] sm:$0xf]  ;;  %1997 = vst.msk [vmem:[#allocation2 + $0x3b8] sm:$0xf] %vm343_vm0, %v1752_v0  ;;  %v2248_v6 = vsel %vm4799_vm7, %v2246_v61, %v2247_v49  ;;  %v2251_v18 = vsel %vm4799_vm7, %v2249_v62, %v2250_v50  ;;  %2697 = vst.msk [vmem:[#allocation2 + $0x3d0] sm:$0xf] %vm343_vm0, %v2256_v2 }
 0x134   : > { %1998 = vst.msk [vmem:[#allocation2 + $0x3bc] sm:$0x3] %vm347_vm1, %v1757_v59  ;;  %v2258_v7 = vrot.slane %v2005_v45, 5  ;;  %v2261_v8 = vrot.slane %v2006_v46, 5  ;;  %v2014_v9 = vld [vmem:[%s4123_s20 + $0x3c] sm:$0x7] }
 0x135   : > { %v2015_v10 = vld [vmem:[%s4123_s20 + $0x40] sm:$0xe]  ;;  %2694 = vst.msk [vmem:[#allocation2 + $0x3c4] sm:$0xf] %vm343_vm0, %v2248_v6  ;;  %2695 = vst.msk [vmem:[#allocation2 + $0x3c8] sm:$0xf] %vm343_vm0, %v2251_v18 }
 0x136   : > { %2696 = vst.msk [vmem:[#allocation2 + $0x3cc] sm:$0x3] %vm347_vm1, %v2252_v1  ;;  %v3738_v11 = vrot.slane %v2007_v51, 9  ;;  %v2266_v12 = vrot.slane %v2008_v52, 5  ;;  %v2269_v13 = vrot.slane %v2009_v53, 5  ;;  %v2272_v14 = vrot.slane %v2010_v58, 5 }
 0x137   : > { %v2016_v15 = vld [vmem:[%s4123_s20 + $0x44] sm:$0xf]  ;;  %v2259_v16 = vsel %vm4799_vm7, %v2257_v3, %v2258_v7  ;;  %v2260_v17 = vrot.slane %v2258_v7, 4  ;;  %v2263_v19 = vrot.slane %v2261_v8, 4  ;;  %v3739_v20 = vrot.slane %v2011_v63, 9 }
 0x138   : > { %v2017_v21 = vld [vmem:[%s4123_s20 + $0x48] sm:$0xf]  ;;  %v2018_v22 = vld [vmem:[%s4123_s20 + $0x4c] sm:$0x7]  ;;  %2698 = vst.msk [vmem:[#allocation2 + $0x3d4] sm:$0xf] %vm343_vm0, %v2259_v16  ;;  %v2267_v23 = vsel %vm4799_vm7, %v3738_v11, %v2266_v12 }
 0x139   : > { %v2268_v24 = vrot.slane %v2266_v12, 4  ;;  %v2271_v25 = vrot.slane %v2269_v13, 4  ;;  %v2274_v26 = vrot.slane %v2272_v14, 4  ;;  %v2019_v27 = vld [vmem:[%s4123_s20 + $0x50] sm:$0xe]  ;;  %v2262_v29 = vsel %vm4799_vm7, %v2260_v17, %v2261_v8 }
 0x13a   : > { %v2020_v28 = vld [vmem:[%s4123_s20 + $0x54] sm:$0xf]  ;;  %2700 = vst.msk [vmem:[#allocation2 + $0x3dc] sm:$0x3] %vm347_vm1, %v2263_v19  ;;  %v2277_v30 = vrot.slane %v2012_v4, 5  ;;  %v2280_v32 = vrot.slane %v2013_v5, 5 }
 0x13b   : > { %2701 = vst.msk [vmem:[#allocation2 + $0x3e0] sm:$0xf] %vm343_vm0, %v2267_v23  ;;  %v2283_v33 = vrot.slane %v2014_v9, 5  ;;  %v2021_v34 = vld [vmem:[%s4123_s20 + $0x58] sm:$0xf]  ;;  %v2270_v35 = vsel %vm4799_vm7, %v2268_v24, %v2269_v13  ;;  %v2273_v36 = vsel %vm4799_vm7, %v2271_v25, %v2272_v14  ;;  %v3740_v37 = vrot.slane %v2015_v10, 9 }
 0x13c   : > { %2699 = vst.msk [vmem:[#allocation2 + $0x3d8] sm:$0xf] %vm343_vm0, %v2262_v29  ;;  %v2288_v38 = vrot.slane %v2016_v15, 5  ;;  %v2022_v39 = vld [vmem:[%s4123_s20 + $0x5c] sm:$0x7]  ;;  %v2278_v41 = vsel %vm4799_vm7, %v3739_v20, %v2277_v30  ;;  %v2279_v42 = vrot.slane %v2277_v30, 4 }
 0x13d   : > { %2704 = vst.msk [vmem:[#allocation2 + $0x3ec] sm:$0x3] %vm347_vm1, %v2274_v26  ;;  %v2023_v40 = vld [vmem:[%s4123_s20 + $0x60] sm:$0xe]  ;;  %v2282_v44 = vrot.slane %v2280_v32, 4  ;;  %v2285_v45 = vrot.slane %v2283_v33, 4 }
 0x13e   : > { %2702 = vst.msk [vmem:[#allocation2 + $0x3e4] sm:$0xf] %vm343_vm0, %v2270_v35  ;;  %2703 = vst.msk [vmem:[#allocation2 + $0x3e8] sm:$0xf] %vm343_vm0, %v2273_v36  ;;  %v2024_v46 = vld [vmem:[%s4123_s20 + $0x64] sm:$0xf]  ;;  %v2289_v47 = vsel %vm4799_vm7, %v3740_v37, %v2288_v38  ;;  %v2281_v52 = vsel %vm4799_vm7, %v2279_v42, %v2280_v32 }
 0x13f   : > { %2705 = vst.msk [vmem:[#allocation2 + $0x3f0] sm:$0xf] %vm343_vm0, %v2278_v41  ;;  %v2290_v48 = vrot.slane %v2288_v38, 4  ;;  %v2291_v49 = vrot.slane %v2017_v21, 5  ;;  %v2294_v50 = vrot.slane %v2018_v22, 5  ;;  %v2284_v53 = vsel %vm4799_vm7, %v2282_v44, %v2283_v33 }
 0x140   : > { %v2025_v51 = vld [vmem:[%s4123_s20 + $0x68] sm:$0xf]  ;;  %2708 = vst.msk [vmem:[#allocation2 + $0x3fc] sm:$0x3] %vm347_vm1, %v2285_v45  ;;  %v3741_v54 = vrot.slane %v2019_v27, 9  ;;  %v2299_v55 = vrot.slane %v2020_v28, 5 }
 0x141   : > { %2709 = vst.msk [vmem:[#allocation2 + $0x400] sm:$0xf] %vm343_vm0, %v2289_v47  ;;  %v2026_v56 = vld [vmem:[%s4123_s20 + $0x6c] sm:$0x7]  ;;  %v2027_v57 = vld [vmem:[%s4123_s20 + $0x70] sm:$0xe]  ;;  %v2292_v58 = vsel %vm4799_vm7, %v2290_v48, %v2291_v49 }
 0x142   : > { %2706 = vst.msk [vmem:[#allocation2 + $0x3f4] sm:$0xf] %vm343_vm0, %v2281_v52  ;;  %2707 = vst.msk [vmem:[#allocation2 + $0x3f8] sm:$0xf] %vm343_vm0, %v2284_v53  ;;  %v2293_v59 = vrot.slane %v2291_v49, 4  ;;  %v2296_v60 = vrot.slane %v2294_v50, 4  ;;  %v2300_v1 = vsel %vm4799_vm7, %v3741_v54, %v2299_v55 }
 0x143   : > { %v2302_v61 = vrot.slane %v2021_v34, 5  ;;  %v2028_v62 = vld [vmem:[%s4123_s20 + $0x74] sm:$0xf]  ;;  %v2029_v63 = vld [vmem:[%s4123_s20 + $0x78] sm:$0xf]  ;;  %v2301_v2 = vrot.slane %v2299_v55, 4 }
 0x144   : > { %v2030_v0 = vld [vmem:[%s4123_s20 + $0x7c] sm:$0x7]  ;;  %2710 = vst.msk [vmem:[#allocation2 + $0x404] sm:$0xf] %vm343_vm0, %v2292_v58  ;;  %v2305_v3 = vrot.slane %v2022_v39, 5  ;;  %v3742_v4 = vrot.slane %v2023_v40, 9  ;;  %v2295_v6 = vsel %vm4799_vm7, %v2293_v59, %v2294_v50 }
 0x145   : > { %v2031_v5 = vld [vmem:[%s4123_s20 + $0x80] sm:$0xe]  ;;  %2712 = vst.msk [vmem:[#allocation2 + $0x40c] sm:$0x3] %vm347_vm1, %v2296_v60  ;;  %v2304_v18 = vrot.slane %v2302_v61, 4  ;;  %v2310_v7 = vrot.slane %v2024_v46, 5  ;;  %v2303_v10 = vsel %vm4799_vm7, %v2301_v2, %v2302_v61 }
 0x146   : > { %2713 = vst.msk [vmem:[#allocation2 + $0x410] sm:$0xf] %vm343_vm0, %v2300_v1  ;;  %v2313_v8 = vrot.slane %v2025_v51, 5  ;;  %v2032_v9 = vld [vmem:[%s4123_s20 + $0x84] sm:$0xf]  ;;  %v2307_v11 = vrot.slane %v2305_v3, 4 }
 0x147   : > { %2711 = vst.msk [vmem:[#allocation2 + $0x408] sm:$0xf] %vm343_vm0, %v2295_v6  ;;  %v2316_v12 = vrot.slane %v2026_v56, 5  ;;  %v3743_v13 = vrot.slane %v2027_v57, 9  ;;  %v2033_v14 = vld [vmem:[%s4123_s20 + $0x88] sm:$0xf]  ;;  %v2306_v16 = vsel %vm4799_vm7, %v2304_v18, %v2305_v3  ;;  %v2311_v17 = vsel %vm4799_vm7, %v3742_v4, %v2310_v7 }
 0x148   : > { %v2034_v15 = vld [vmem:[%s4123_s20 + $0x8c] sm:$0x7]  ;;  %2714 = vst.msk [vmem:[#allocation2 + $0x414] sm:$0xf] %vm343_vm0, %v2303_v10  ;;  %v2312_v19 = vrot.slane %v2310_v7, 4  ;;  %v2315_v20 = vrot.slane %v2313_v8, 4 }
 0x149   : > { %v2035_v21 = vld [vmem:[%s4123_s20 + $0x90] sm:$0xe]  ;;  %v2036_v22 = vld [vmem:[%s4123_s20 + $0x94] sm:$0xf]  ;;  %2715 = vst.msk [vmem:[#allocation2 + $0x418] sm:$0xf] %vm343_vm0, %v2306_v16 }
 0x14a   : > { %2716 = vst.msk [vmem:[#allocation2 + $0x41c] sm:$0x3] %vm347_vm1, %v2307_v11  ;;  %v2318_v23 = vrot.slane %v2316_v12, 4  ;;  %v2321_v24 = vrot.slane %v2028_v62, 5  ;;  %v2324_v25 = vrot.slane %v2029_v63, 5  ;;  %v2327_v26 = vrot.slane %v2030_v0, 5 }
 0x14b   : > { %2717 = vst.msk [vmem:[#allocation2 + $0x420] sm:$0xf] %vm343_vm0, %v2311_v17  ;;  %v2037_v27 = vld [vmem:[%s4123_s20 + $0x98] sm:$0xf]  ;;  %v2314_v28 = vsel %vm4799_vm7, %v2312_v19, %v2313_v8  ;;  %v2317_v29 = vsel %vm4799_vm7, %v2315_v20, %v2316_v12  ;;  %v3744_v30 = vrot.slane %v2031_v5, 9  ;;  %v2332_v32 = vrot.slane %v2032_v9, 5 }
 0x14c   : > { %v2038_v33 = vld [vmem:[%s4123_s20 + $0x9c] sm:$0x7]  ;;  %v2039_v34 = vld [vmem:[%s4123_s20 + $0xa0] sm:$0xe]  ;;  %2718 = vst.msk [vmem:[#allocation2 + $0x424] sm:$0xf] %vm343_vm0, %v2314_v28  ;;  %v2322_v35 = vsel %vm4799_vm7, %v3743_v13, %v2321_v24 }
 0x14d   : > { %2719 = vst.msk [vmem:[#allocation2 + $0x428] sm:$0xf] %vm343_vm0, %v2317_v29  ;;  %v2323_v36 = vrot.slane %v2321_v24, 4  ;;  %v2326_v37 = vrot.slane %v2324_v25, 4  ;;  %v2329_v38 = vrot.slane %v2327_v26, 4  ;;  %v2333_v40 = vsel %vm4799_vm7, %v3744_v30, %v2332_v32 }
 0x14e   : > { %2720 = vst.msk [vmem:[#allocation2 + $0x42c] sm:$0x3] %vm347_vm1, %v2318_v23  ;;  %v2040_v39 = vld [vmem:[%s4123_s20 + $0xa4] sm:$0xf]  ;;  %v2334_v41 = vrot.slane %v2332_v32, 4  ;;  %v2335_v42 = vrot.slane %v2033_v14, 5 }
 0x14f   : > { %2721 = vst.msk [vmem:[#allocation2 + $0x430] sm:$0xf] %vm343_vm0, %v2322_v35  ;;  %v2338_v44 = vrot.slane %v2034_v15, 5  ;;  %v2041_v45 = vld [vmem:[%s4123_s20 + $0xa8] sm:$0xf]  ;;  %v2325_v46 = vsel %vm4799_vm7, %v2323_v36, %v2324_v25  ;;  %v2328_v47 = vsel %vm4799_vm7, %v2326_v37, %v2327_v26  ;;  %v3745_v48 = vrot.slane %v2035_v21, 9 }
 0x150   : > { %2724 = vst.msk [vmem:[#allocation2 + $0x43c] sm:$0x3] %vm347_vm1, %v2329_v38  ;;  %v2343_v49 = vrot.slane %v2036_v22, 5  ;;  %v2042_v50 = vld [vmem:[%s4123_s20 + $0xac] sm:$0x7]  ;;  %v2336_v52 = vsel %vm4799_vm7, %v2334_v41, %v2335_v42  ;;  %v2337_v53 = vrot.slane %v2335_v42, 4 }
 0x151   : > { %2725 = vst.msk [vmem:[#allocation2 + $0x440] sm:$0xf] %vm343_vm0, %v2333_v40  ;;  %v2043_v51 = vld [vmem:[%s4123_s20 + $0xb0] sm:$0xe]  ;;  %2722 = vst.msk [vmem:[#allocation2 + $0x434] sm:$0xf] %vm343_vm0, %v2325_v46 }
 0x152   : > { %2723 = vst.msk [vmem:[#allocation2 + $0x438] sm:$0xf] %vm343_vm0, %v2328_v47  ;;  %v2340_v54 = vrot.slane %v2338_v44, 4  ;;  %v2346_v55 = vrot.slane %v2037_v27, 5  ;;  %v2044_v56 = vld [vmem:[%s4123_s20 + $0xb4] sm:$0xf]  ;;  %v2344_v59 = vsel %vm4799_vm7, %v3745_v48, %v2343_v49  ;;  %v2339_v0 = vsel %vm4799_vm7, %v2337_v53, %v2338_v44 }
 0x153   : > { %v2045_v57 = vld [vmem:[%s4123_s20 + $0xb8] sm:$0xf]  ;;  %v2046_v58 = vld [vmem:[%s4123_s20 + $0xbc] sm:$0x7]  ;;  %2726 = vst.msk [vmem:[#allocation2 + $0x444] sm:$0xf] %vm343_vm0, %v2336_v52 }
 0x154   : > { %v2345_v60 = vrot.slane %v2343_v49, 4  ;;  %v2349_v61 = vrot.slane %v2038_v33, 5  ;;  %v3746_v62 = vrot.slane %v2039_v34, 9  ;;  %v2047_v63 = vld [vmem:[%s4123_s20 + $0xc0] sm:$0xe]  ;;  %v2348_v1 = vrot.slane %v2346_v55, 4 }
 0x155   : > { %2728 = vst.msk [vmem:[#allocation2 + $0x44c] sm:$0x3] %vm347_vm1, %v2340_v54  ;;  %v2354_v2 = vrot.slane %v2040_v39, 5  ;;  %v2357_v3 = vrot.slane %v2041_v45, 5  ;;  %v2048_v4 = vld [vmem:[%s4123_s20 + $0xc4] sm:$0xf] }
 0x156   : > { %2729 = vst.msk [vmem:[#allocation2 + $0x450] sm:$0xf] %vm343_vm0, %v2344_v59  ;;  %2727 = vst.msk [vmem:[#allocation2 + $0x448] sm:$0xf] %vm343_vm0, %v2339_v0  ;;  %v2347_v5 = vsel %vm4799_vm7, %v2345_v60, %v2346_v55  ;;  %v2351_v6 = vrot.slane %v2349_v61, 4  ;;  %v2360_v18 = vrot.slane %v2042_v50, 5  ;;  %v2350_v10 = vsel %vm4799_vm7, %v2348_v1, %v2349_v61 }
 0x157   : > { %v3747_v7 = vrot.slane %v2043_v51, 9  ;;  %v2049_v8 = vld [vmem:[%s4123_s20 + $0xc8] sm:$0xf]  ;;  %v2050_v9 = vld [vmem:[%s4123_s20 + $0xcc] sm:$0x7]  ;;  %v2355_v11 = vsel %vm4799_vm7, %v3746_v62, %v2354_v2  ;;  %v2356_v12 = vrot.slane %v2354_v2, 4 }
 0x158   : > { %2730 = vst.msk [vmem:[#allocation2 + $0x454] sm:$0xf] %vm343_vm0, %v2347_v5  ;;  %v2359_v13 = vrot.slane %v2357_v3, 4  ;;  %v2051_v14 = vld [vmem:[%s4123_s20 + $0xd0] sm:$0xe]  ;;  %v2362_v16 = vrot.slane %v2360_v18, 4 }
 0x159   : > { %v2052_v15 = vld [vmem:[%s4123_s20 + $0xd4] sm:$0xf]  ;;  %2731 = vst.msk [vmem:[#allocation2 + $0x458] sm:$0xf] %vm343_vm0, %v2350_v10  ;;  %2733 = vst.msk [vmem:[#allocation2 + $0x460] sm:$0xf] %vm343_vm0, %v2355_v11  ;;  %v2358_v22 = vsel %vm4799_vm7, %v2356_v12, %v2357_v3 }
 0x15a   : > { %2732 = vst.msk [vmem:[#allocation2 + $0x45c] sm:$0x3] %vm347_vm1, %v2351_v6  ;;  %v2365_v17 = vrot.slane %v2044_v56, 5  ;;  %v2368_v19 = vrot.slane %v2045_v57, 5  ;;  %v2371_v20 = vrot.slane %v2046_v58, 5  ;;  %v2361_v23 = vsel %vm4799_vm7, %v2359_v13, %v2360_v18 }
 0x15b   : > { %v2053_v21 = vld [vmem:[%s4123_s20 + $0xd8] sm:$0xf]  ;;  %v3748_v24 = vrot.slane %v2047_v63, 9  ;;  %v2376_v25 = vrot.slane %v2048_v4, 5  ;;  %v2054_v26 = vld [vmem:[%s4123_s20 + $0xdc] sm:$0x7] }
 0x15c   : > { %v2055_v27 = vld [vmem:[%s4123_s20 + $0xe0] sm:$0xe]  ;;  %2734 = vst.msk [vmem:[#allocation2 + $0x464] sm:$0xf] %vm343_vm0, %v2358_v22  ;;  %2735 = vst.msk [vmem:[#allocation2 + $0x468] sm:$0xf] %vm343_vm0, %v2361_v23  ;;  %v2366_v28 = vsel %vm4799_vm7, %v3747_v7, %v2365_v17 }
 0x15d   : > { %2736 = vst.msk [vmem:[#allocation2 + $0x46c] sm:$0x3] %vm347_vm1, %v2362_v16  ;;  %v2367_v29 = vrot.slane %v2365_v17, 4  ;;  %v2370_v30 = vrot.slane %v2368_v19, 4  ;;  %v2373_v32 = vrot.slane %v2371_v20, 4  ;;  %v2377_v34 = vsel %vm4799_vm7, %v3748_v24, %v2376_v25 }
 0x15e   : > { %v2056_v33 = vld [vmem:[%s4123_s20 + $0xe4] sm:$0xf]  ;;  %2737 = vst.msk [vmem:[#allocation2 + $0x470] sm:$0xf] %vm343_vm0, %v2366_v28  ;;  %v2378_v35 = vrot.slane %v2376_v25, 4  ;;  %v2379_v36 = vrot.slane %v2049_v8, 5 }
 0x15f   : > { %v2382_v37 = vrot.slane %v2050_v9, 5  ;;  %v2057_v38 = vld [vmem:[%s4123_s20 + $0xe8] sm:$0xf]  ;;  %v2369_v39 = vsel %vm4799_vm7, %v2367_v29, %v2368_v19  ;;  %v2372_v40 = vsel %vm4799_vm7, %v2370_v30, %v2371_v20  ;;  %2740 = vst.msk [vmem:[#allocation2 + $0x47c] sm:$0x3] %vm347_vm1, %v2373_v32  ;;  %v3749_v41 = vrot.slane %v2051_v14, 9 }
 0x160   : > { %2741 = vst.msk [vmem:[#allocation2 + $0x480] sm:$0xf] %vm343_vm0, %v2377_v34  ;;  %v2387_v42 = vrot.slane %v2052_v15, 5  ;;  %v2058_v44 = vld [vmem:[%s4123_s20 + $0xec] sm:$0x7]  ;;  %v2380_v46 = vsel %vm4799_vm7, %v2378_v35, %v2379_v36  ;;  %v2381_v47 = vrot.slane %v2379_v36, 4 }
 0x161   : > { %v2059_v45 = vld [vmem:[%s4123_s20 + $0xf0] sm:$0xe]  ;;  %2738 = vst.msk [vmem:[#allocation2 + $0x474] sm:$0xf] %vm343_vm0, %v2369_v39  ;;  %2739 = vst.msk [vmem:[#allocation2 + $0x478] sm:$0xf] %vm343_vm0, %v2372_v40 }
 0x162   : > { %v2384_v48 = vrot.slane %v2382_v37, 4  ;;  %v2390_v49 = vrot.slane %v2053_v21, 5  ;;  %v2060_v50 = vld [vmem:[%s4123_s20 + $0xf4] sm:$0xf]  ;;  %v2061_v51 = vld [vmem:[%s4123_s20 + $0xf8] sm:$0xf]  ;;  %v2388_v53 = vsel %vm4799_vm7, %v3749_v41, %v2387_v42  ;;  %v2383_v58 = vsel %vm4799_vm7, %v2381_v47, %v2382_v37 }
 0x163   : > { %v2062_v52 = vld [vmem:[%s4123_s20 + $0xfc] sm:$0x7]  ;;  %2742 = vst.msk [vmem:[#allocation2 + $0x484] sm:$0xf] %vm343_vm0, %v2380_v46  ;;  %v2389_v54 = vrot.slane %v2387_v42, 4  ;;  %v2393_v55 = vrot.slane %v2054_v26, 5 }
 0x164   : > { %v3750_v56 = vrot.slane %v2055_v27, 9  ;;  %v2063_v57 = vld [vmem:[%s4123_s20 + $0x100] sm:$0xe]  ;;  %2744 = vst.msk [vmem:[#allocation2 + $0x48c] sm:$0x3] %vm347_vm1, %v2384_v48  ;;  %v2392_v59 = vrot.slane %v2390_v49, 4 }
 0x165   : > { %2745 = vst.msk [vmem:[#allocation2 + $0x490] sm:$0xf] %vm343_vm0, %v2388_v53  ;;  %v2398_v60 = vrot.slane %v2056_v33, 5  ;;  %v2401_v61 = vrot.slane %v2057_v38, 5  ;;  %v2064_v62 = vld [vmem:[%s4123_s20 + $0x104] sm:$0xf]  ;;  %v2391_v63 = vsel %vm4799_vm7, %v2389_v54, %v2390_v49 }
 0x166   : > { %2743 = vst.msk [vmem:[#allocation2 + $0x488] sm:$0xf] %vm343_vm0, %v2383_v58  ;;  %v2395_v0 = vrot.slane %v2393_v55, 4  ;;  %v2404_v1 = vrot.slane %v2058_v44, 5  ;;  %v3751_v2 = vrot.slane %v2059_v45, 9  ;;  %v2394_v5 = vsel %vm4799_vm7, %v2392_v59, %v2393_v55 }
 0x167   : > { %v2065_v3 = vld [vmem:[%s4123_s20 + $0x108] sm:$0xf]  ;;  %v2066_v4 = vld [vmem:[%s4123_s20 + $0x10c] sm:$0x7]  ;;  %2746 = vst.msk [vmem:[#allocation2 + $0x494] sm:$0xf] %vm343_vm0, %v2391_v63  ;;  %v2399_v6 = vsel %vm4799_vm7, %v3750_v56, %v2398_v60 }
 0x168   : > { %v2400_v18 = vrot.slane %v2398_v60, 4  ;;  %v2403_v7 = vrot.slane %v2401_v61, 4  ;;  %v2067_v8 = vld [vmem:[%s4123_s20 + $0x110] sm:$0xe]  ;;  %v2068_v9 = vld [vmem:[%s4123_s20 + $0x114] sm:$0xf] }
 0x169   : > { %2747 = vst.msk [vmem:[#allocation2 + $0x498] sm:$0xf] %vm343_vm0, %v2394_v5  ;;  %2749 = vst.msk [vmem:[#allocation2 + $0x4a0] sm:$0xf] %vm343_vm0, %v2399_v6  ;;  %v2406_v10 = vrot.slane %v2404_v1, 4  ;;  %v2409_v11 = vrot.slane %v2060_v50, 5 }
 0x16a   : > { %2748 = vst.msk [vmem:[#allocation2 + $0x49c] sm:$0x3] %vm347_vm1, %v2395_v0  ;;  %v2412_v12 = vrot.slane %v2061_v51, 5  ;;  %v2415_v13 = vrot.slane %v2062_v52, 5  ;;  %v2069_v14 = vld [vmem:[%s4123_s20 + $0x118] sm:$0xf]  ;;  %v2402_v15 = vsel %vm4799_vm7, %v2400_v18, %v2401_v61  ;;  %v2405_v16 = vsel %vm4799_vm7, %v2403_v7, %v2404_v1 }
 0x16b   : > { %v3752_v17 = vrot.slane %v2063_v57, 9  ;;  %v2420_v19 = vrot.slane %v2064_v62, 5  ;;  %v2070_v20 = vld [vmem:[%s4123_s20 + $0x11c] sm:$0x7]  ;;  %v2071_v21 = vld [vmem:[%s4123_s20 + $0x120] sm:$0xe]  ;;  %v2410_v22 = vsel %vm4799_vm7, %v3751_v2, %v2409_v11 }
 0x16c   : > { %2750 = vst.msk [vmem:[#allocation2 + $0x4a4] sm:$0xf] %vm343_vm0, %v2402_v15  ;;  %2751 = vst.msk [vmem:[#allocation2 + $0x4a8] sm:$0xf] %vm343_vm0, %v2405_v16  ;;  %v2411_v23 = vrot.slane %v2409_v11, 4  ;;  %v2414_v24 = vrot.slane %v2412_v12, 4 }
 0x16d   : > { %2752 = vst.msk [vmem:[#allocation2 + $0x4ac] sm:$0x3] %vm347_vm1, %v2406_v10  ;;  %v2417_v25 = vrot.slane %v2415_v13, 4  ;;  %v2072_v26 = vld [vmem:[%s4123_s20 + $0x124] sm:$0xf]  ;;  %v2421_v27 = vsel %vm4799_vm7, %v3752_v17, %v2420_v19  ;;  %v2422_v28 = vrot.slane %v2420_v19, 4 }
 0x16e   : > { %2753 = vst.msk [vmem:[#allocation2 + $0x4b0] sm:$0xf] %vm343_vm0, %v2410_v22  ;;  %v2423_v29 = vrot.slane %v2065_v3, 5  ;;  %v2426_v30 = vrot.slane %v2066_v4, 5  ;;  %v2073_v32 = vld [vmem:[%s4123_s20 + $0x128] sm:$0xf]  ;;  %v2413_v33 = vsel %vm4799_vm7, %v2411_v23, %v2412_v12  ;;  %v2416_v34 = vsel %vm4799_vm7, %v2414_v24, %v2415_v13 }
 0x16f   : > { %2756 = vst.msk [vmem:[#allocation2 + $0x4bc] sm:$0x3] %vm347_vm1, %v2417_v25  ;;  %v3753_v35 = vrot.slane %v2067_v8, 9  ;;  %v2431_v36 = vrot.slane %v2068_v9, 5  ;;  %v2074_v37 = vld [vmem:[%s4123_s20 + $0x12c] sm:$0x7] }
 0x170   : > { %2757 = vst.msk [vmem:[#allocation2 + $0x4c0] sm:$0xf] %vm343_vm0, %v2421_v27  ;;  %v2075_v38 = vld [vmem:[%s4123_s20 + $0x130] sm:$0xe]  ;;  %2754 = vst.msk [vmem:[#allocation2 + $0x4b4] sm:$0xf] %vm343_vm0, %v2413_v33  ;;  %v2424_v39 = vsel %vm4799_vm7, %v2422_v28, %v2423_v29 }
 0x171   : > { %2755 = vst.msk [vmem:[#allocation2 + $0x4b8] sm:$0xf] %vm343_vm0, %v2416_v34  ;;  %v2425_v40 = vrot.slane %v2423_v29, 4  ;;  %v2428_v41 = vrot.slane %v2426_v30, 4  ;;  %v2434_v42 = vrot.slane %v2069_v14, 5  ;;  %v2432_v47 = vsel %vm4799_vm7, %v3753_v35, %v2431_v36 }
 0x172   : > { %v2076_v44 = vld [vmem:[%s4123_s20 + $0x134] sm:$0xf]  ;;  %v2077_v45 = vld [vmem:[%s4123_s20 + $0x138] sm:$0xf]  ;;  %v2078_v46 = vld [vmem:[%s4123_s20 + $0x13c] sm:$0x7] }
 0x173   : > { %2758 = vst.msk [vmem:[#allocation2 + $0x4c4] sm:$0xf] %vm343_vm0, %v2424_v39  ;;  %v2433_v48 = vrot.slane %v2431_v36, 4  ;;  %v2437_v49 = vrot.slane %v2070_v20, 5  ;;  %v3754_v50 = vrot.slane %v2071_v21, 9  ;;  %v2427_v52 = vsel %vm4799_vm7, %v2425_v40, %v2426_v30 }
 0x174   : > { %v2079_v51 = vld [vmem:[%s4123_s20 + $0x140] sm:$0xe]  ;;  %2760 = vst.msk [vmem:[#allocation2 + $0x4cc] sm:$0x3] %vm347_vm1, %v2428_v41  ;;  %v2436_v53 = vrot.slane %v2434_v42, 4  ;;  %v2442_v54 = vrot.slane %v2072_v26, 5 }
 0x175   : > { %2761 = vst.msk [vmem:[#allocation2 + $0x4d0] sm:$0xf] %vm343_vm0, %v2432_v47  ;;  %v2445_v55 = vrot.slane %v2073_v32, 5  ;;  %v2080_v56 = vld [vmem:[%s4123_s20 + $0x144] sm:$0xf]  ;;  %v2435_v57 = vsel %vm4799_vm7, %v2433_v48, %v2434_v42  ;;  %v2439_v58 = vrot.slane %v2437_v49, 4 }
 0x176   : > { %2759 = vst.msk [vmem:[#allocation2 + $0x4c8] sm:$0xf] %vm343_vm0, %v2427_v52  ;;  %v2448_v59 = vrot.slane %v2074_v37, 5  ;;  %v3755_v60 = vrot.slane %v2075_v38, 9  ;;  %v2081_v61 = vld [vmem:[%s4123_s20 + $0x148] sm:$0xf]  ;;  %v2438_v63 = vsel %vm4799_vm7, %v2436_v53, %v2437_v49  ;;  %v2443_v0 = vsel %vm4799_vm7, %v3754_v50, %v2442_v54 }
 0x177   : > { %v2082_v62 = vld [vmem:[%s4123_s20 + $0x14c] sm:$0x7]  ;;  %2762 = vst.msk [vmem:[#allocation2 + $0x4d4] sm:$0xf] %vm343_vm0, %v2435_v57  ;;  %v2444_v1 = vrot.slane %v2442_v54, 4  ;;  %v2447_v2 = vrot.slane %v2445_v55, 4 }
 0x178   : > { %v2083_v3 = vld [vmem:[%s4123_s20 + $0x150] sm:$0xe]  ;;  %v2084_v4 = vld [vmem:[%s4123_s20 + $0x154] sm:$0xf]  ;;  %2763 = vst.msk [vmem:[#allocation2 + $0x4d8] sm:$0xf] %vm343_vm0, %v2438_v63 }
 0x179   : > { %2764 = vst.msk [vmem:[#allocation2 + $0x4dc] sm:$0x3] %vm347_vm1, %v2439_v58  ;;  %v2450_v5 = vrot.slane %v2448_v59, 4  ;;  %v2453_v6 = vrot.slane %v2076_v44, 5  ;;  %v2456_v18 = vrot.slane %v2077_v45, 5  ;;  %v2459_v7 = vrot.slane %v2078_v46, 5 }
 0x17a   : > { %2765 = vst.msk [vmem:[#allocation2 + $0x4e0] sm:$0xf] %vm343_vm0, %v2443_v0  ;;  %v2085_v8 = vld [vmem:[%s4123_s20 + $0x158] sm:$0xf]  ;;  %v2446_v9 = vsel %vm4799_vm7, %v2444_v1, %v2445_v55  ;;  %v2449_v10 = vsel %vm4799_vm7, %v2447_v2, %v2448_v59  ;;  %v3756_v11 = vrot.slane %v2079_v51, 9  ;;  %v2464_v12 = vrot.slane %v2080_v56, 5 }
 0x17b   : > { %v2086_v13 = vld [vmem:[%s4123_s20 + $0x15c] sm:$0x7]  ;;  %v2087_v14 = vld [vmem:[%s4123_s20 + $0x160] sm:$0xe]  ;;  %2766 = vst.msk [vmem:[#allocation2 + $0x4e4] sm:$0xf] %vm343_vm0, %v2446_v9  ;;  %v2454_v15 = vsel %vm4799_vm7, %v3755_v60, %v2453_v6 }
 0x17c   : > { %2767 = vst.msk [vmem:[#allocation2 + $0x4e8] sm:$0xf] %vm343_vm0, %v2449_v10  ;;  %v2455_v16 = vrot.slane %v2453_v6, 4  ;;  %v2458_v17 = vrot.slane %v2456_v18, 4  ;;  %v2461_v19 = vrot.slane %v2459_v7, 4  ;;  %v2465_v21 = vsel %vm4799_vm7, %v3756_v11, %v2464_v12 }
 0x17d   : > { %2768 = vst.msk [vmem:[#allocation2 + $0x4ec] sm:$0x3] %vm347_vm1, %v2450_v5  ;;  %v2088_v20 = vld [vmem:[%s4123_s20 + $0x164] sm:$0xf]  ;;  %v2466_v22 = vrot.slane %v2464_v12, 4  ;;  %v2467_v23 = vrot.slane %v2081_v61, 5 }
 0x17e   : > { %2769 = vst.msk [vmem:[#allocation2 + $0x4f0] sm:$0xf] %vm343_vm0, %v2454_v15  ;;  %v2470_v24 = vrot.slane %v2082_v62, 5  ;;  %v2089_v25 = vld [vmem:[%s4123_s20 + $0x168] sm:$0xf]  ;;  %v2457_v26 = vsel %vm4799_vm7, %v2455_v16, %v2456_v18  ;;  %v2460_v27 = vsel %vm4799_vm7, %v2458_v17, %v2459_v7  ;;  %v3757_v28 = vrot.slane %v2083_v3, 9 }
 0x17f   : > { %2772 = vst.msk [vmem:[#allocation2 + $0x4fc] sm:$0x3] %vm347_vm1, %v2461_v19  ;;  %v2475_v29 = vrot.slane %v2084_v4, 5  ;;  %v2090_v30 = vld [vmem:[%s4123_s20 + $0x16c] sm:$0x7]  ;;  %v2468_v33 = vsel %vm4799_vm7, %v2466_v22, %v2467_v23  ;;  %v2469_v34 = vrot.slane %v2467_v23, 4 }
 0x180   : > { %2773 = vst.msk [vmem:[#allocation2 + $0x500] sm:$0xf] %vm343_vm0, %v2465_v21  ;;  %v2091_v32 = vld [vmem:[%s4123_s20 + $0x170] sm:$0xe]  ;;  %2770 = vst.msk [vmem:[#allocation2 + $0x4f4] sm:$0xf] %vm343_vm0, %v2457_v26 }
 0x181   : > { %2771 = vst.msk [vmem:[#allocation2 + $0x4f8] sm:$0xf] %vm343_vm0, %v2460_v27  ;;  %v2472_v35 = vrot.slane %v2470_v24, 4  ;;  %v2478_v36 = vrot.slane %v2085_v8, 5  ;;  %v2092_v37 = vld [vmem:[%s4123_s20 + $0x174] sm:$0xf]  ;;  %v2476_v40 = vsel %vm4799_vm7, %v3757_v28, %v2475_v29  ;;  %v2471_v46 = vsel %vm4799_vm7, %v2469_v34, %v2470_v24 }
 0x182   : > { %v2093_v38 = vld [vmem:[%s4123_s20 + $0x178] sm:$0xf]  ;;  %v2094_v39 = vld [vmem:[%s4123_s20 + $0x17c] sm:$0x7]  ;;  %2774 = vst.msk [vmem:[#allocation2 + $0x504] sm:$0xf] %vm343_vm0, %v2468_v33 }
 0x183   : > { %v2477_v41 = vrot.slane %v2475_v29, 4  ;;  %v2481_v42 = vrot.slane %v2086_v13, 5  ;;  %v3758_v44 = vrot.slane %v2087_v14, 9  ;;  %v2095_v45 = vld [vmem:[%s4123_s20 + $0x180] sm:$0xe]  ;;  %v2480_v47 = vrot.slane %v2478_v36, 4 }
 0x184   : > { %2776 = vst.msk [vmem:[#allocation2 + $0x50c] sm:$0x3] %vm347_vm1, %v2472_v35  ;;  %v2486_v48 = vrot.slane %v2088_v20, 5  ;;  %v2489_v49 = vrot.slane %v2089_v25, 5  ;;  %v2096_v50 = vld [vmem:[%s4123_s20 + $0x184] sm:$0xf] }
 0x185   : > { %2777 = vst.msk [vmem:[#allocation2 + $0x510] sm:$0xf] %vm343_vm0, %v2476_v40  ;;  %2775 = vst.msk [vmem:[#allocation2 + $0x508] sm:$0xf] %vm343_vm0, %v2471_v46  ;;  %v2479_v51 = vsel %vm4799_vm7, %v2477_v41, %v2478_v36  ;;  %v2483_v52 = vrot.slane %v2481_v42, 4  ;;  %v2492_v53 = vrot.slane %v2090_v30, 5  ;;  %v2482_v57 = vsel %vm4799_vm7, %v2480_v47, %v2481_v42 }
 0x186   : > { %v3759_v54 = vrot.slane %v2091_v32, 9  ;;  %v2097_v55 = vld [vmem:[%s4123_s20 + $0x188] sm:$0xf]  ;;  %v2098_v56 = vld [vmem:[%s4123_s20 + $0x18c] sm:$0x7]  ;;  %v2487_v58 = vsel %vm4799_vm7, %v3758_v44, %v2486_v48  ;;  %v2488_v59 = vrot.slane %v2486_v48, 4 }
 0x187   : > { %2778 = vst.msk [vmem:[#allocation2 + $0x514] sm:$0xf] %vm343_vm0, %v2479_v51  ;;  %v2491_v60 = vrot.slane %v2489_v49, 4  ;;  %v2099_v61 = vld [vmem:[%s4123_s20 + $0x190] sm:$0xe]  ;;  %v2494_v63 = vrot.slane %v2492_v53, 4 }
 0x188   : > { %v2100_v62 = vld [vmem:[%s4123_s20 + $0x194] sm:$0xf]  ;;  %2779 = vst.msk [vmem:[#allocation2 + $0x518] sm:$0xf] %vm343_vm0, %v2482_v57  ;;  %2781 = vst.msk [vmem:[#allocation2 + $0x520] sm:$0xf] %vm343_vm0, %v2487_v58  ;;  %v2490_v4 = vsel %vm4799_vm7, %v2488_v59, %v2489_v49 }
 0x189   : > { %2780 = vst.msk [vmem:[#allocation2 + $0x51c] sm:$0x3] %vm347_vm1, %v2483_v52  ;;  %v2497_v0 = vrot.slane %v2092_v37, 5  ;;  %v2500_v1 = vrot.slane %v2093_v38, 5  ;;  %v2503_v2 = vrot.slane %v2094_v39, 5  ;;  %v2493_v5 = vsel %vm4799_vm7, %v2491_v60, %v2492_v53 }
 0x18a   : > { %v2101_v3 = vld [vmem:[%s4123_s20 + $0x198] sm:$0xf]  ;;  %v3760_v6 = vrot.slane %v2095_v45, 9  ;;  %v2508_v18 = vrot.slane %v2096_v50, 5  ;;  %v2102_v7 = vld [vmem:[%s4123_s20 + $0x19c] sm:$0x7] }
 0x18b   : > { %v2103_v8 = vld [vmem:[%s4123_s20 + $0x1a0] sm:$0xe]  ;;  %2782 = vst.msk [vmem:[#allocation2 + $0x524] sm:$0xf] %vm343_vm0, %v2490_v4  ;;  %2783 = vst.msk [vmem:[#allocation2 + $0x528] sm:$0xf] %vm343_vm0, %v2493_v5  ;;  %v2498_v9 = vsel %vm4799_vm7, %v3759_v54, %v2497_v0 }
 0x18c   : > { %2784 = vst.msk [vmem:[#allocation2 + $0x52c] sm:$0x3] %vm347_vm1, %v2494_v63  ;;  %v2499_v10 = vrot.slane %v2497_v0, 4  ;;  %v2502_v11 = vrot.slane %v2500_v1, 4  ;;  %v2505_v12 = vrot.slane %v2503_v2, 4  ;;  %v2509_v14 = vsel %vm4799_vm7, %v3760_v6, %v2508_v18 }
 0x18d   : > { %v2104_v13 = vld [vmem:[%s4123_s20 + $0x1a4] sm:$0xf]  ;;  %2785 = vst.msk [vmem:[#allocation2 + $0x530] sm:$0xf] %vm343_vm0, %v2498_v9  ;;  %v2510_v15 = vrot.slane %v2508_v18, 4  ;;  %v2511_v16 = vrot.slane %v2097_v55, 5 }
 0x18e   : > { %v2514_v17 = vrot.slane %v2098_v56, 5  ;;  %v2105_v19 = vld [vmem:[%s4123_s20 + $0x1a8] sm:$0xf]  ;;  %v2501_v20 = vsel %vm4799_vm7, %v2499_v10, %v2500_v1  ;;  %v2504_v21 = vsel %vm4799_vm7, %v2502_v11, %v2503_v2  ;;  %2788 = vst.msk [vmem:[#allocation2 + $0x53c] sm:$0x3] %vm347_vm1, %v2505_v12  ;;  %v3761_v22 = vrot.slane %v2099_v61, 9 }
 0x18f   : > { %2789 = vst.msk [vmem:[#allocation2 + $0x540] sm:$0xf] %vm343_vm0, %v2509_v14  ;;  %v2519_v23 = vrot.slane %v2100_v62, 5  ;;  %v2106_v24 = vld [vmem:[%s4123_s20 + $0x1ac] sm:$0x7]  ;;  %v2512_v26 = vsel %vm4799_vm7, %v2510_v15, %v2511_v16  ;;  %v2513_v27 = vrot.slane %v2511_v16, 4 }
 0x190   : > { %v2107_v25 = vld [vmem:[%s4123_s20 + $0x1b0] sm:$0xe]  ;;  %2786 = vst.msk [vmem:[#allocation2 + $0x534] sm:$0xf] %vm343_vm0, %v2501_v20  ;;  %2787 = vst.msk [vmem:[#allocation2 + $0x538] sm:$0xf] %vm343_vm0, %v2504_v21 }
 0x191   : > { %v2516_v28 = vrot.slane %v2514_v17, 4  ;;  %v2522_v29 = vrot.slane %v2101_v3, 5  ;;  %v2108_v30 = vld [vmem:[%s4123_s20 + $0x1b4] sm:$0xf]  ;;  %v2109_v32 = vld [vmem:[%s4123_s20 + $0x1b8] sm:$0xf]  ;;  %v2520_v33 = vsel %vm4799_vm7, %v3761_v22, %v2519_v23  ;;  %v2515_v38 = vsel %vm4799_vm7, %v2513_v27, %v2514_v17 }
 0x192   : > { %2790 = vst.msk [vmem:[#allocation2 + $0x544] sm:$0xf] %vm343_vm0, %v2512_v26  ;;  %v2521_v34 = vrot.slane %v2519_v23, 4  ;;  %v2525_v35 = vrot.slane %v2102_v7, 5  ;;  %v3762_v36 = vrot.slane %v2103_v8, 9  ;;  %v2530_v40 = vrot.slane %v2104_v13, 5 }
 0x193   : > { %v2110_v37 = vld [vmem:[%s4123_s20 + $0x1bc] sm:$0x7]  ;;  %2792 = vst.msk [vmem:[#allocation2 + $0x54c] sm:$0x3] %vm347_vm1, %v2516_v28  ;;  %v2524_v39 = vrot.slane %v2522_v29, 4  ;;  %v2533_v41 = vrot.slane %v2105_v19, 5 }
 0x194   : > { %2793 = vst.msk [vmem:[#allocation2 + $0x550] sm:$0xf] %vm343_vm0, %v2520_v33  ;;  %v2111_v42 = vld [vmem:[%s4123_s20 + $0x1c0] sm:$0xe]  ;;  %2791 = vst.msk [vmem:[#allocation2 + $0x548] sm:$0xf] %vm343_vm0, %v2515_v38  ;;  %v2523_v44 = vsel %vm4799_vm7, %v2521_v34, %v2522_v29  ;;  %v2531_v50 = vsel %vm4799_vm7, %v3762_v36, %v2530_v40 }
 0x195   : > { %v2527_v45 = vrot.slane %v2525_v35, 4  ;;  %v2536_v46 = vrot.slane %v2106_v24, 5  ;;  %v3763_v47 = vrot.slane %v2107_v25, 9  ;;  %v2112_v48 = vld [vmem:[%s4123_s20 + $0x1c4] sm:$0xf]  ;;  %v2526_v49 = vsel %vm4799_vm7, %v2524_v39, %v2525_v35 }
 0x196   : > { %2794 = vst.msk [vmem:[#allocation2 + $0x554] sm:$0xf] %vm343_vm0, %v2523_v44  ;;  %v2532_v51 = vrot.slane %v2530_v40, 4  ;;  %v2535_v52 = vrot.slane %v2533_v41, 4  ;;  %v2113_v53 = vld [vmem:[%s4123_s20 + $0x1c8] sm:$0xf] }
 0x197   : > { %2795 = vst.msk [vmem:[#allocation2 + $0x558] sm:$0xf] %vm343_vm0, %v2526_v49  ;;  %2797 = vst.msk [vmem:[#allocation2 + $0x560] sm:$0xf] %vm343_vm0, %v2531_v50  ;;  %v2538_v54 = vrot.slane %v2536_v46, 4  ;;  %v2541_v55 = vrot.slane %v2108_v30, 5 }
 0x198   : > { %2796 = vst.msk [vmem:[#allocation2 + $0x55c] sm:$0x3] %vm347_vm1, %v2527_v45  ;;  %v2544_v56 = vrot.slane %v2109_v32, 5  ;;  %v2547_v57 = vrot.slane %v2110_v37, 5  ;;  %v2114_v58 = vld [vmem:[%s4123_s20 + $0x1cc] sm:$0x7]  ;;  %v2534_v59 = vsel %vm4799_vm7, %v2532_v51, %v2533_v41  ;;  %v2537_v60 = vsel %vm4799_vm7, %v2535_v52, %v2536_v46 }
 0x199   : > { %v3764_v61 = vrot.slane %v2111_v42, 9  ;;  %v2552_v62 = vrot.slane %v2112_v48, 5  ;;  %v2115_v63 = vld [vmem:[%s4123_s20 + $0x1d0] sm:$0xe]  ;;  %v2116_v0 = vld [vmem:[%s4123_s20 + $0x1d4] sm:$0xf]  ;;  %v2542_v1 = vsel %vm4799_vm7, %v3763_v47, %v2541_v55 }
 0x19a   : > { %2798 = vst.msk [vmem:[#allocation2 + $0x564] sm:$0xf] %vm343_vm0, %v2534_v59  ;;  %2799 = vst.msk [vmem:[#allocation2 + $0x568] sm:$0xf] %vm343_vm0, %v2537_v60  ;;  %v2543_v2 = vrot.slane %v2541_v55, 4  ;;  %v2546_v3 = vrot.slane %v2544_v56, 4 }
 0x19b   : > { %2800 = vst.msk [vmem:[#allocation2 + $0x56c] sm:$0x3] %vm347_vm1, %v2538_v54  ;;  %v2549_v4 = vrot.slane %v2547_v57, 4  ;;  %v2117_v5 = vld [vmem:[%s4123_s20 + $0x1d8] sm:$0xf]  ;;  %v2553_v6 = vsel %vm4799_vm7, %v3764_v61, %v2552_v62  ;;  %v2554_v18 = vrot.slane %v2552_v62, 4 }
 0x19c   : > { %2801 = vst.msk [vmem:[#allocation2 + $0x570] sm:$0xf] %vm343_vm0, %v2542_v1  ;;  %v2555_v7 = vrot.slane %v2113_v53, 5  ;;  %v2558_v8 = vrot.slane %v2114_v58, 5  ;;  %v2118_v9 = vld [vmem:[%s4123_s20 + $0x1dc] sm:$0x7]  ;;  %v2545_v10 = vsel %vm4799_vm7, %v2543_v2, %v2544_v56  ;;  %v2548_v11 = vsel %vm4799_vm7, %v2546_v3, %v2547_v57 }
 0x19d   : > { %2804 = vst.msk [vmem:[#allocation2 + $0x57c] sm:$0x3] %vm347_vm1, %v2549_v4  ;;  %v3765_v12 = vrot.slane %v2115_v63, 9  ;;  %v2563_v13 = vrot.slane %v2116_v0, 5  ;;  %v2566_v17 = vrot.slane %v2117_v5, 5  ;;  %v2569_v21 = vrot.slane %v2118_v9, 5 }
 0x19e   : > { %2805 = vst.msk [vmem:[#allocation2 + $0x580] sm:$0xf] %vm343_vm0, %v2553_v6  ;;  %2802 = vst.msk [vmem:[#allocation2 + $0x574] sm:$0xf] %vm343_vm0, %v2545_v10  ;;  %v2556_v14 = vsel %vm4799_vm7, %v2554_v18, %v2555_v7  ;;  %v2557_v15 = vrot.slane %v2555_v7, 4  ;;  %v2560_v16 = vrot.slane %v2558_v8, 4 }
 0x19f   : > { %2803 = vst.msk [vmem:[#allocation2 + $0x578] sm:$0xf] %vm343_vm0, %v2548_v11  ;;  %2806 = vst.msk [vmem:[#allocation2 + $0x584] sm:$0xf] %vm343_vm0, %v2556_v14  ;;  %v2564_v19 = vsel %vm4799_vm7, %v3765_v12, %v2563_v13  ;;  %v2565_v20 = vrot.slane %v2563_v13, 4  ;;  %v2568_v23 = vrot.slane %v2566_v17, 4 }
 0x1a0   : > { %v2559_v22 = vsel %vm4799_vm7, %v2557_v15, %v2558_v8  ;;  %2808 = vst.msk [vmem:[#allocation2 + $0x58c] sm:$0x3] %vm347_vm1, %v2560_v16  ;;  %v2571_v25 = vrot.slane %v2569_v21, 4 }
 0x1a1   : > { %2809 = vst.msk [vmem:[#allocation2 + $0x590] sm:$0xf] %vm343_vm0, %v2564_v19  ;;  %2807 = vst.msk [vmem:[#allocation2 + $0x588] sm:$0xf] %vm343_vm0, %v2559_v22  ;;  %v2567_v24 = vsel %vm4799_vm7, %v2565_v20, %v2566_v17  ;;  %v2570_v26 = vsel %vm4799_vm7, %v2568_v23, %v2569_v21 }
 0x1a2   : > { %2810 = vst.msk [vmem:[#allocation2 + $0x594] sm:$0xf] %vm343_vm0, %v2567_v24  ;;  %2811 = vst.msk [vmem:[#allocation2 + $0x598] sm:$0xf] %vm343_vm0, %v2570_v26 }
 0x1a3   : > { %2812 = vst.msk [vmem:[#allocation2 + $0x59c] sm:$0x3] %vm347_vm1, %v2571_v25 }
 0x1a4 LB: >> { %v3774_v27 = vld [vmem:[%s5318_s1 + $0x2] sm:$0x3]  ;;  %vm2854_vm8 = vcmask 1040384   ;;  %vm2855_vm9 = vcmask 1041408   ;;  %v4081_v43 = vmov 65535   ;;  %s3866_s6 = sshll.u32 %s4079_s26, 4  ;;  %s4079_s26 = sphi %s5225_s26, %s2819_s26  }
 0x1a5   : >> { %v2856_v28 = vsel %vm2854_vm8, 4294967295, %v4081_v43  ;;  %v3810_v29 = vld [vmem:[%s5318_s1 + $0x8] sm:$0x3]  ;;  %v3821_v30 = vld [vmem:[%s5318_s1 + $0xa] sm:$0x3]  ;;  %s5251_s16 = scalar_lea.vmem [#allocation2], %s3866_s6  ;;  %s3578_s24 = scalar_lea.vmem %s4128_s23, %s3866_s6 }
 0x1a6   : >> { %v2857_v32 = vsel %vm2855_vm9, %v2856_v28, 0  ;;  %v2827_v33 = vld [vmem:[%s5318_s1] sm:$0x3]  ;;  %v3831_v36 = vld [vmem:[%s5318_s1 + $0xc] sm:$0x3]  ;;  %vm2847_vm10 = vcmask 23552  }
 0x1a7   : >> { %v2859_v34 = vand.u32 %v3774_v27, %v2857_v32  ;;  %v3167_v35 = vand.u32 %v3810_v29, %v2857_v32  ;;  %v3789_v37 = vld [vmem:[%s5318_s1 + $0x4] sm:$0x3]  ;;  %v3248_v39 = vand.u32 %v3821_v30, %v2857_v32  ;;  %v2927_v40 = vand.u32 %v2857_v32, %v2827_v33  ;;  %v3842_v50 = vld [vmem:[%s5318_s1 + $0xe] sm:$0x3]  ;;  %v3799_v52 = vld [vmem:[%s5318_s1 + $0x6] sm:$0x3] }
 0x1a8   : >> { %v3330_v46 = vand.u32 %v3831_v36, %v2857_v32  ;;  %v3004_v47 = vand.u32 %v3789_v37, %v2857_v32  ;;  %v3411_v55 = vand.u32 %v3842_v50, %v2857_v32  ;;  %v3086_v56 = vand.u32 %v3799_v52, %v2857_v32  ;;  %v3853_v59 = vld [vmem:[%s5318_s1 + $0x10] sm:$0x3]  ;;  %s2819_s26 = sadd.s32 1, %s4079_s26  }
 0x1a9   : >> { %3910 = vmatprep.subr.bf16.mxu1 %v2859_v34  ;;  %3934 = vmatprep.subr.bf16.mxu0 %v3167_v35  ;;  %v3492_v62 = vand.u32 %v3853_v59, %v2857_v32  ;;  %p2816_p5 = scmp.ge.s32.totalorder %s2819_s26, 28  }
 0x1aa   : >> { %v4031_v38 = vld [vmem:[%s5251_s16 + $0x1e0] sm:$0xff]   ;;  %v4032_v41 = vld [vmem:[%s5251_s16 + $0x1f0] sm:$0xff]   ;;  %3911 = vmatpush3.bf16.msra.mxu1 %v2859_v34  ;;  %3935 = vmatpush3.bf16.msra.mxu0 %v3167_v35  ;;  %v4033_v42 = vld [vmem:[%s5251_s16 + $0x1e8] sm:$0x3f]  }
 0x1ab   : >> { %3912 = vmatprep.mubr.msk.bf16.mxu1 %vm2847_vm10, %v4031_v38  ;;  %3936 = vmatprep.mubr.msk.bf16.mxu0 %vm2847_vm10, %v4032_v41  ;;  %v4034_v44 = vld [vmem:[%s5251_s16 + $0x1f8] sm:$0x3f]   ;;  %v4035_v45 = vld [vmem:[%s5251_s16] sm:$0xff]   ;;  %v4036_v48 = vld [vmem:[%s5251_s16 + $0x3d0] sm:$0xff]  }
 0x1ac   : >> { %3940 = vmatprep.subr.bf16.mxu0 %v3248_v39  ;;  %3916 = vmatprep.subr.bf16.mxu1 %v2927_v40  ;;  %v4037_v49 = vld [vmem:[%s5251_s16 + $0x8] sm:$0x3f]   ;;  %v4038_v51 = vld [vmem:[%s5251_s16 + $0x3d8] sm:$0x3f]   ;;  %v4039_v53 = vld [vmem:[%s5251_s16 + $0x3c0] sm:$0xff]  }
 0x1ad   : >> { %3913 = vmatmul.mubr.msk.bf16.vlgmr.msra.gmra.mrb[0].mxu1 %vm2847_vm10, %v4033_v42  ;;  %3937 = vmatmul.mubr.msk.bf16.vlgmr.msra.gmra.mrb[0].mxu0 %vm2847_vm10, %v4034_v44  ;;  %v4040_v54 = vld [vmem:[%s5251_s16 + $0x20] sm:$0xff]   ;;  %v4041_v57 = vld [vmem:[%s5251_s16 + $0x3c8] sm:$0x3f]   ;;  %v4043_v60 = vld [vmem:[%s5251_s16 + $0x10] sm:$0xff]  }
 0x1ae   : >> { %3941 = vmatpush3.bf16.msra.mxu0 %v3248_v39  ;;  %3917 = vmatpush3.bf16.msra.mxu1 %v2927_v40  ;;  %v4042_v58 = vld [vmem:[%s5251_s16 + $0x28] sm:$0x3f]   ;;  %v4044_v61 = vld [vmem:[%s5251_s16 + $0x200] sm:$0xff]   ;;  %v4045_v63 = vld [vmem:[%s5251_s16 + $0x18] sm:$0x3f]  }
 0x1af   : >> { %3918 = vmatprep.mubr.msk.bf16.mxu1 %vm2847_vm10, %v4035_v45  ;;  %3942 = vmatprep.mubr.msk.bf16.mxu0 %vm2847_vm10, %v4036_v48  ;;  %v4046_v0 = vld [vmem:[%s5251_s16 + $0x208] sm:$0x3f]   ;;  %v4047_v1 = vld [vmem:[%s5251_s16 + $0x3e0] sm:$0xff]  }
 0x1b0   : >> { %3946 = vmatprep.subr.bf16.mxu0 %v3330_v46  ;;  %3922 = vmatprep.subr.bf16.mxu1 %v3004_v47  ;;  %v4048_v2 = vld [vmem:[%s5251_s16 + $0x3e8] sm:$0x3f]  }
 0x1b9   : >> { %3919 = vmatmul.mubr.msk.bf16.vlgmr.msra.gmra.mrb[0].mxu1 %vm2847_vm10, %v4037_v49  ;;  %3943 = vmatmul.mubr.msk.bf16.vlgmr.msra.gmra.mrb[0].mxu0 %vm2847_vm10, %v4038_v51 }
 0x1ba   : >> { %3947 = vmatpush3.bf16.msra.mxu0 %v3330_v46  ;;  %3923 = vmatpush3.bf16.msra.mxu1 %v3004_v47 }
 0x1bb   : >> { %3924 = vmatprep.mubr.msk.bf16.mxu1 %vm2847_vm10, %v4039_v53  ;;  %3948 = vmatprep.mubr.msk.bf16.mxu0 %vm2847_vm10, %v4040_v54 }
 0x1bc   : >> { %3952 = vmatprep.subr.bf16.mxu0 %v3411_v55  ;;  %3928 = vmatprep.subr.bf16.mxu1 %v3086_v56 }
 0x1c5   : >> { %3925 = vmatmul.mubr.msk.bf16.vlgmr.msra.gmra.mrb[0].mxu1 %vm2847_vm10, %v4041_v57  ;;  %3949 = vmatmul.mubr.msk.bf16.vlgmr.msra.gmra.mrb[0].mxu0 %vm2847_vm10, %v4042_v58 }
 0x1c6   : >> { %3953 = vmatpush3.bf16.msra.mxu0 %v3411_v55  ;;  %3929 = vmatpush3.bf16.msra.mxu1 %v3086_v56 }
 0x1c7   : >> { %3930 = vmatprep.mubr.msk.bf16.mxu1 %vm2847_vm10, %v4043_v60  ;;  %3954 = vmatprep.mubr.msk.bf16.mxu0 %vm2847_vm10, %v4044_v61 }
 0x1c8   : >> { %3958 = vmatprep.subr.bf16.mxu0 %v3492_v62 }
 0x1d1   : >> { %3931 = vmatmul.mubr.msk.bf16.vlgmr.msra.gmra.mrb[0].mxu1 %vm2847_vm10, %v4045_v63  ;;  %3955 = vmatmul.mubr.msk.bf16.vlgmr.msra.gmra.mrb[0].mxu0 %vm2847_vm10, %v4046_v0 }
 0x1d2   : >> { %3959 = vmatpush3.bf16.msra.mxu0 %v3492_v62  ;;  %3960 = vmatprep.mubr.msk.bf16.mxu0 %vm2847_vm10, %v4047_v1 }
 0x1dd   : >> { %3961 = vmatmul.mubr.msk.bf16.vlgmr.msra.gmra.mrb[0].mxu0 %vm2847_vm10, %v4048_v2 }
 0x2a4   : >> { %v3932_v3 = vpop.f32.mrb[0].mxu1 }
 0x2a5   : >> { %v3122_v4 = vpop.f32.mrb[1].mxu1 }
 0x2a6   : >> { %v3933_v5 = vpop.f32.mrb[2].mxu1 }
 0x2a7   : >> { %v3125_v6 = vpop.f32.mrb[3].mxu1 }
 0x2b0   : >> { %v3962_v18 = vpop.f32.mrb[0].mxu0 }
 0x2b1   : >> { %v3964_v7 = vadd.f32 %v3962_v18, %v3932_v3  ;;  %v3528_v8 = vpop.f32.mrb[1].mxu0 }
 0x2b2   : >> { %v3965_v9 = vadd.f32 %v3528_v8, %v3122_v4  ;;  %v3963_v10 = vpop.f32.mrb[2].mxu0 }
 0x2b3   : >> { %v3555_v11 = vadd.f32 %v3964_v7, %v4791_v31  ;;  %v3966_v12 = vadd.f32 %v3963_v10, %v3933_v5  ;;  %v3531_v13 = vpop.f32.mrb[3].mxu0 }
 0x2b4   : >> { %v3553_v14 = vadd.f32 %v3965_v9, %v4791_v31  ;;  %v3967_v15 = vadd.f32 %v3531_v13, %v3125_v6 }
 0x2b5   : >> { %v3559_v16 = vmax.f32 %v3555_v11, 0.0  ;;  %v3556_v17 = vadd.f32 %v3966_v12, %v4791_v31 }
 0x2b6   : >> { %v3554_v19 = vadd.f32 %v3967_v15, %v4791_v31  ;;  %v3557_v22 = vmax.f32 %v3553_v14, 0.0  ;;  %2818 = sbr.rel (!%p2816_p5) target bundleno = 420 (0x1a4), region = 95 }
 0x2b7   : >> { %v3875_v20 = vpack.c.bf16 %v3559_v16, %v3559_v16  ;;  %v3560_v21 = vmax.f32 %v3556_v17, 0.0 }
 0x2b8   : >> { %v3558_v23 = vmax.f32 %v3554_v19, 0.0 }
 0x2b9   : >> { %3581 = vst [vmem:[%s3578_s24 + $0x8] sm:$0xf] %v3875_v20  ;;  %v3876_v24 = vpack.c.bf16 %v3560_v21, %v3560_v21 }
 0x2ba   : >> { %v3881_v25 = vpack.c.bf16 %v3558_v23, %v3557_v22 }
 0x2bb   : >> { %3582 = vst [vmem:[%s3578_s24 + $0xc] sm:$0x3] %v3876_v24 }
 0x2bc   : >> { %3882 = vst [vmem:[%s3578_s24] sm:$0xff] %v3881_v25  }
 0x2bd PF: > { %s13_s14 = sadd.s32 1, %s4075_s14   ;;  %s5325_s12 = smov %s4071_s13 }
 0x2be   : > { %p10_p6 = scmp.ge.s32.totalorder %s13_s14, 4   ;;  %s5326_s13 = smov %s5328_s15 }
 0x2c0   :  { %12 = sbr.rel (!%p10_p6) target bundleno = 2 (0x2), region = 106 }

</bundles_post_ra>
